<compile_context>
chip_gen: v7x
topology: tpu7x:2x2x1
jax: 0.10.0
libtpu: 0.0.40
codegen_flags: <defaults>
</compile_context>

<pallas_src>
import functools

import jax
import jax.numpy as jnp
from jax.experimental import pallas as pl
from jax.experimental.pallas import tpu as pltpu

EMBED = 32
HEADS = 2
HEAD_DIM = EMBED // HEADS
FWD_EXP = 4
HIDDEN = FWD_EXP * EMBED          # 128
SEQ = 8
EPS = 1e-5                        # torch nn.LayerNorm default
BLOCK_BATCH = 128                 # sequences per grid step (tunable)


def encoder_block_kernel(vkq_ref, wa_ref, w1_ref, w2_ref, vec_ref, out_ref):
    _, Bt, S, E = vkq_ref.shape
    R = Bt * S
    HD = E // HEADS
    f32 = jnp.float32
    bf16 = jnp.bfloat16

    # Stacked inputs: rows [0:R]=value, [R:2R]=key, [2R:3R]=query.
    vkq32 = vkq_ref[...].reshape(3 * R, E).astype(f32)
    q_res = vkq32[2 * R:3 * R, :]                       # residual (f32, exact)

    # Fused Q/K/V projection: one bf16 (3R,32)@(32,128) MXU dot against the
    # packed [Wq.T | Wk.T | Wv.T | Wo.T] slab; f32 accumulation.
    proj = jnp.dot(vkq32.astype(bf16), wa_ref[...], preferred_element_type=f32)
    V2 = proj[0 * R:1 * R, 2 * E:3 * E]                 # value rows @ Wv.T
    K2 = proj[1 * R:2 * R, 1 * E:2 * E]                 # key   rows @ Wk.T
    Q2 = proj[2 * R:3 * R, 0 * E:1 * E]                 # query rows @ Wq.T

    # Packed bias / LN vector slab (rows: b1, bo, g1, be1, b2, g2, be2).
    b1 = vec_ref[0:1, :]                                # (1, HIDDEN)
    bo = vec_ref[1:2, 0:E]
    g1 = vec_ref[2:3, 0:E]
    be1 = vec_ref[3:4, 0:E]
    b2 = vec_ref[4:5, 0:E]
    g2 = vec_ref[5:6, 0:E]
    be2 = vec_ref[6:7, 0:E]

    # Multi-head attention, both heads folded into one batched einsum/softmax
    # by stacking heads along the batch axis (batch = 2*Bt).
    def split_heads(x2):
        x3 = x2.reshape(Bt, S, E)
        return jnp.concatenate([x3[:, :, :HD], x3[:, :, HD:]], axis=0)

    qh, kh, vh = split_heads(Q2), split_heads(K2), split_heads(V2)

    scale = 1.0 / jnp.sqrt(jnp.float32(E))  # module divides by sqrt(embed)
    energy = jnp.einsum("bqd,bkd->bqk", qh, kh,
                        preferred_element_type=f32) * scale
    energy = energy - jnp.max(energy, axis=-1, keepdims=True)
    p = jnp.exp(energy)
    attn = p * pl.reciprocal(jnp.sum(p, axis=-1, keepdims=True), approx=True)
    hout = jnp.einsum("bqk,bkd->bqd", attn, vh,
                      preferred_element_type=f32)       # (2*Bt, S, HD)

    # Concat heads back along lanes, single bf16 dot through Wo.
    heads_cat = jnp.concatenate([hout[:Bt], hout[Bt:]], axis=-1).reshape(R, E)
    wo_t = wa_ref[:, 3 * E:4 * E]                       # (E, E) bf16
    attn_out = jnp.dot(heads_cat.astype(bf16), wo_t,
                       preferred_element_type=f32) + bo

    # Residual + LayerNorm 1 (dropout is identity in eval mode).
    # TODO(synk): training-mode dropout (random masking) not implemented.
    x = attn_out + q_res
    mu = jnp.mean(x, axis=-1, keepdims=True)
    var = jnp.mean((x - mu) ** 2, axis=-1, keepdims=True)
    x = (x - mu) * jax.lax.rsqrt(var + EPS) * g1 + be1

    # Feed-forward: Linear -> ReLU -> Linear (bf16 MXU operands, f32 acc).
    h1 = jnp.dot(x.astype(bf16), w1_ref[...], preferred_element_type=f32) + b1
    h1 = jnp.maximum(h1, 0.0)
    ff = jnp.dot(h1.astype(bf16), w2_ref[...], preferred_element_type=f32) + b2

    # Residual + LayerNorm 2.
    y = ff + x
    mu2 = jnp.mean(y, axis=-1, keepdims=True)
    var2 = jnp.mean((y - mu2) ** 2, axis=-1, keepdims=True)
    out = (y - mu2) * jax.lax.rsqrt(var2 + EPS) * g2 + be2

    out_ref[...] = out.reshape(Bt, S, E).astype(out_ref.dtype)


def pack_params(p):
    """One-time host-side packing: pre-transpose + bf16 weights, fuse vectors."""
    w_a = jnp.concatenate(
        [p["wq"].T, p["wk"].T, p["wv"].T, p["wo"].T],
        axis=1).astype(jnp.bfloat16)                               # (32, 128)
    w1_t = p["w1"].T.astype(jnp.bfloat16)                          # (32, 128)
    w2_t = p["w2"].T.astype(jnp.bfloat16)                          # (128, 32)

    def pad_row(v):
        v = v.reshape(1, -1).astype(jnp.float32)
        return jnp.pad(v, ((0, 0), (0, HIDDEN - v.shape[1])))

    vecs = jnp.concatenate(
        [p["b1"].reshape(1, -1).astype(jnp.float32),  # row 0: FFN bias 1 (128)
         pad_row(p["bo"]),             # row 1: attention out bias
         pad_row(p["g1"]),             # row 2: LN1 gamma
         pad_row(p["be1"]),            # row 3: LN1 beta
         pad_row(p["b2"]),             # row 4: FFN bias 2
         pad_row(p["g2"]),             # row 5: LN2 gamma
         pad_row(p["be2"]),            # row 6: LN2 beta
         jnp.zeros((1, HIDDEN), jnp.float32)],                     # pad to 8
        axis=0)                                                    # (8, 128)
    return {"w_a": w_a, "w1_t": w1_t, "w2_t": w2_t, "vecs": vecs}


@functools.partial(jax.jit, static_argnames=("block_batch",))
def encoder_block(value, key, query, packed, *, block_batch=BLOCK_BATCH):
    squeeze = value.ndim == 2
    if squeeze:
        value, key, query = value[None], key[None], query[None]
    B, S, E = query.shape
    Bt = min(block_batch, B)
    Bp = ((B + Bt - 1) // Bt) * Bt

    # Single stacked input -> one DMA per grid step instead of three.
    vkq = jnp.stack([value, key, query], axis=0).astype(jnp.float32)
    if Bp != B:
        vkq = jnp.pad(vkq, ((0, 0), (0, Bp - B), (0, 0), (0, 0)))

    vkq_spec = pl.BlockSpec((3, Bt, S, E), lambda i: (0, i, 0, 0))

    def const_spec(shape):
        return pl.BlockSpec(shape, lambda i: (0,) * len(shape))

    out = pl.pallas_call(
        encoder_block_kernel,
        out_shape=jax.ShapeDtypeStruct((Bp, S, E), jnp.float32),
        grid=(Bp // Bt,),
        in_specs=[vkq_spec,
                  const_spec(packed["w_a"].shape),
                  const_spec(packed["w1_t"].shape),
                  const_spec(packed["w2_t"].shape),
                  const_spec(packed["vecs"].shape)],
        out_specs=pl.BlockSpec((Bt, S, E), lambda i: (i, 0, 0)),
        compiler_params=pltpu.CompilerParams(
            dimension_semantics=("parallel",),
            vmem_limit_bytes=32 * 1024 * 1024),
    )(vkq, packed["w_a"], packed["w1_t"], packed["w2_t"], packed["vecs"])

    out = out[:B]
    return out[0] if squeeze else out


def reference_single(value, key, query, p):
    """Pure-JAX f32 reference mirroring the PyTorch forward for one (S,E) seq."""
    V = value @ p["wv"].T
    K = key @ p["wk"].T
    Q = query @ p["wq"].T
    Vh = V.reshape(SEQ, HEADS, HEAD_DIM)
    Kh = K.reshape(SEQ, HEADS, HEAD_DIM)
    Qh = Q.reshape(SEQ, HEADS, HEAD_DIM)
    energy = jnp.einsum("qhd,khd->hqk", Qh, Kh)
    attn = jax.nn.softmax(energy / jnp.sqrt(jnp.float32(EMBED)), axis=2)
    o = jnp.einsum("hql,lhd->qhd", attn, Vh).reshape(SEQ, EMBED)
    o = o @ p["wo"].T + p["bo"]

    def ln(x, g, b):
        mu = jnp.mean(x, axis=-1, keepdims=True)
        var = jnp.mean((x - mu) ** 2, axis=-1, keepdims=True)
        return (x - mu) / jnp.sqrt(var + EPS) * g + b

    x = ln(o + query, p["g1"], p["be1"])
    ff = jnp.maximum(x @ p["w1"].T + p["b1"], 0.0) @ p["w2"].T + p["b2"]
    return ln(ff + x, p["g2"], p["be2"])


def init_params(rng):
    keys = jax.random.split(rng, 8)
    s = 0.05
    return {
        "wv": jax.random.normal(keys[0], (EMBED, EMBED), jnp.float32) * s,
        "wk": jax.random.normal(keys[1], (EMBED, EMBED), jnp.float32) * s,
        "wq": jax.random.normal(keys[2], (EMBED, EMBED), jnp.float32) * s,
        "wo": jax.random.normal(keys[3], (EMBED, EMBED), jnp.float32) * s,
        "bo": jax.random.normal(keys[4], (EMBED,), jnp.float32) * s,
        "g1": jnp.ones((EMBED,), jnp.float32),
        "be1": jnp.zeros((EMBED,), jnp.float32),
        "w1": jax.random.normal(keys[5], (HIDDEN, EMBED), jnp.float32) * s,
        "b1": jax.random.normal(keys[6], (HIDDEN,), jnp.float32) * s,
        "w2": jax.random.normal(keys[7], (EMBED, HIDDEN), jnp.float32) * s,
        "b2": jnp.zeros((EMBED,), jnp.float32),
        "g2": jnp.ones((EMBED,), jnp.float32),
        "be2": jnp.zeros((EMBED,), jnp.float32),
    }


if __name__ == "__main__":
    root = jax.random.PRNGKey(0)
    k_v, k_k, k_q, k_p = jax.random.split(root, 4)
    B = 32                                      # independent sequences
    value = jax.random.normal(k_v, (B, SEQ, EMBED), jnp.float32)
    key = jax.random.normal(k_k, (B, SEQ, EMBED), jnp.float32)
    query = jax.random.normal(k_q, (B, SEQ, EMBED), jnp.float32)
    params = init_params(k_p)
    packed = pack_params(params)                # packed once, outside jit

    # Use a small block_batch here so the test exercises a multi-step grid.
    out = encoder_block(value, key, query, packed, block_batch=16)
    out = jax.block_until_ready(out)

    ref = jax.vmap(lambda v, k, q: reference_single(v, k, q, params))(
        value, key, query)
    assert out.shape == (B, SEQ, EMBED)
    err = float(jnp.max(jnp.abs(out - ref)))
    # Tolerance covers bf16 MXU operands + approx-EUP softmax reciprocal
    # (accumulation and all LN/softmax math are f32).
    assert jnp.allclose(out, ref, rtol=3e-2, atol=3e-2), f"max err {err}"

    # Unbatched (S, E) path, exactly like the PyTorch module signature.
    out1 = jax.block_until_ready(
        encoder_block(value[0], key[0], query[0], packed))
    assert out1.shape == (SEQ, EMBED)
    assert jnp.allclose(out1, ref[0], rtol=3e-2, atol=3e-2)

    print("KERNEL_OK")
</pallas_src>

<mosaic_0001>
module attributes {stable_mosaic.version = 11 : i64} {
  func.func @encoder_block_kernel(%arg0: i32, %arg1: memref<3x16x8x32xf32, #tpu.memory_space<vmem>>, %arg2: memref<32x128xbf16, #tpu.memory_space<vmem>>, %arg3: memref<32x128xbf16, #tpu.memory_space<vmem>>, %arg4: memref<128x32xbf16, #tpu.memory_space<vmem>>, %arg5: memref<8x128xf32, #tpu.memory_space<vmem>>, %arg6: memref<16x8x32xf32, #tpu.memory_space<vmem>>) attributes {dimension_semantics = [#tpu.dimension_semantics<parallel>], iteration_bounds = array<i64: 2>, scalar_prefetch = 0 : i64, scratch_operands = 0 : i64, tpu.core_type = #tpu.core_type<tc>, window_params = [{transform_indices = @transform_0, window_bounds = array<i64: 3, 16, 8, 32>}, {pipeline_mode = #tpu.pipeline_mode<synchronous>, transform_indices = @transform_1, window_bounds = array<i64: 32, 128>}, {pipeline_mode = #tpu.pipeline_mode<synchronous>, transform_indices = @transform_2, window_bounds = array<i64: 32, 128>}, {pipeline_mode = #tpu.pipeline_mode<synchronous>, transform_indices = @transform_3, window_bounds = array<i64: 128, 32>}, {pipeline_mode = #tpu.pipeline_mode<synchronous>, transform_indices = @transform_4, window_bounds = array<i64: 8, 128>}, {transform_indices = @transform_5, window_bounds = array<i64: 16, 8, 32>}]} {
    %c0 = arith.constant 0 : index
    %c0_0 = arith.constant 0 : index
    %c0_1 = arith.constant 0 : index
    %c0_2 = arith.constant 0 : index
    %0 = vector.load %arg1[%c0, %c0_0, %c0_1, %c0_2] : memref<3x16x8x32xf32, #tpu.memory_space<vmem>>, vector<3x16x8x32xf32>
    %1 = vector.shape_cast %0 : vector<3x16x8x32xf32> to vector<384x32xf32>
    %2 = vector.extract_strided_slice %1 {offsets = [256, 0], sizes = [128, 32], strides = [1, 1]} : vector<384x32xf32> to vector<128x32xf32>
    %3 = arith.truncf %1 : vector<384x32xf32> to vector<384x32xbf16>
    %c0_3 = arith.constant 0 : index
    %c0_4 = arith.constant 0 : index
    %4 = vector.load %arg2[%c0_3, %c0_4] : memref<32x128xbf16, #tpu.memory_space<vmem>>, vector<32x128xbf16>
    %cst = arith.constant dense<0.000000e+00> : vector<384x128xf32>
    %5 = tpu.matmul %3, %4, %cst {dimension_numbers = #tpu.dot_dimension_numbers<[1], [0], [0], [1], [0, 0, 1, 1], [], []>} : vector<384x32xbf16>, vector<32x128xbf16>, vector<384x128xf32> -> vector<384x128xf32>
    %6 = vector.extract_strided_slice %5 {offsets = [0, 64], sizes = [128, 32], strides = [1, 1]} : vector<384x128xf32> to vector<128x32xf32>
    %7 = vector.extract_strided_slice %5 {offsets = [128, 32], sizes = [128, 32], strides = [1, 1]} : vector<384x128xf32> to vector<128x32xf32>
    %8 = vector.extract_strided_slice %5 {offsets = [256, 0], sizes = [128, 32], strides = [1, 1]} : vector<384x128xf32> to vector<128x32xf32>
    %c0_5 = arith.constant 0 : index
    %c0_6 = arith.constant 0 : index
    %9 = vector.load %arg5[%c0_5, %c0_6] : memref<8x128xf32, #tpu.memory_space<vmem>>, vector<1x128xf32>
    %c1 = arith.constant 1 : index
    %c0_7 = arith.constant 0 : index
    %10 = vector.load %arg5[%c1, %c0_7] : memref<8x128xf32, #tpu.memory_space<vmem>>, vector<1x32xf32>
    %c2 = arith.constant 2 : index
    %c0_8 = arith.constant 0 : index
    %11 = vector.load %arg5[%c2, %c0_8] : memref<8x128xf32, #tpu.memory_space<vmem>>, vector<1x32xf32>
    %c3 = arith.constant 3 : index
    %c0_9 = arith.constant 0 : index
    %12 = vector.load %arg5[%c3, %c0_9] : memref<8x128xf32, #tpu.memory_space<vmem>>, vector<1x32xf32>
    %c4 = arith.constant 4 : index
    %c0_10 = arith.constant 0 : index
    %13 = vector.load %arg5[%c4, %c0_10] : memref<8x128xf32, #tpu.memory_space<vmem>>, vector<1x32xf32>
    %c5 = arith.constant 5 : index
    %c0_11 = arith.constant 0 : index
    %14 = vector.load %arg5[%c5, %c0_11] : memref<8x128xf32, #tpu.memory_space<vmem>>, vector<1x32xf32>
    %c6 = arith.constant 6 : index
    %c0_12 = arith.constant 0 : index
    %15 = vector.load %arg5[%c6, %c0_12] : memref<8x128xf32, #tpu.memory_space<vmem>>, vector<1x32xf32>
    %16 = vector.shape_cast %8 : vector<128x32xf32> to vector<16x8x32xf32>
    %17 = vector.extract_strided_slice %16 {offsets = [0, 0, 0], sizes = [16, 8, 16], strides = [1, 1, 1]} : vector<16x8x32xf32> to vector<16x8x16xf32>
    %18 = vector.extract_strided_slice %16 {offsets = [0, 0, 16], sizes = [16, 8, 16], strides = [1, 1, 1]} : vector<16x8x32xf32> to vector<16x8x16xf32>
    %19 = tpu.concatenate %17, %18 in 0 : vector<16x8x16xf32>, vector<16x8x16xf32> -> vector<32x8x16xf32>
    %20 = vector.shape_cast %7 : vector<128x32xf32> to vector<16x8x32xf32>
    %21 = vector.extract_strided_slice %20 {offsets = [0, 0, 0], sizes = [16, 8, 16], strides = [1, 1, 1]} : vector<16x8x32xf32> to vector<16x8x16xf32>
    %22 = vector.extract_strided_slice %20 {offsets = [0, 0, 16], sizes = [16, 8, 16], strides = [1, 1, 1]} : vector<16x8x32xf32> to vector<16x8x16xf32>
    %23 = tpu.concatenate %21, %22 in 0 : vector<16x8x16xf32>, vector<16x8x16xf32> -> vector<32x8x16xf32>
    %24 = vector.shape_cast %6 : vector<128x32xf32> to vector<16x8x32xf32>
    %25 = vector.extract_strided_slice %24 {offsets = [0, 0, 0], sizes = [16, 8, 16], strides = [1, 1, 1]} : vector<16x8x32xf32> to vector<16x8x16xf32>
    %26 = vector.extract_strided_slice %24 {offsets = [0, 0, 16], sizes = [16, 8, 16], strides = [1, 1, 1]} : vector<16x8x32xf32> to vector<16x8x16xf32>
    %27 = tpu.concatenate %25, %26 in 0 : vector<16x8x16xf32>, vector<16x8x16xf32> -> vector<32x8x16xf32>
    %cst_13 = arith.constant 3.200000e+01 : f32
    %28 = math.sqrt %cst_13 : f32
    %cst_14 = arith.constant 1.000000e+00 : f32
    %29 = arith.divf %cst_14, %28 : f32
    "tpu.trace_start"() <{level = 10 : i32, message = "bqd,bkd->bqk"}> : () -> ()
    %cst_15 = arith.constant dense<0.000000e+00> : vector<32x8x8xf32>
    %30 = tpu.matmul %19, %23, %cst_15 {dimension_numbers = #tpu.dot_dimension_numbers<[2], [2], [1], [1], [0, 0, 0, 1, 1, 1], [0], [0]>} : vector<32x8x16xf32>, vector<32x8x16xf32>, vector<32x8x8xf32> -> vector<32x8x8xf32>
    "tpu.trace_stop"() : () -> ()
    %31 = vector.broadcast %29 : f32 to vector<32x8x8xf32>
    %32 = arith.mulf %30, %31 : vector<32x8x8xf32>
    %cst_16 = arith.constant dense<0xFF800000> : vector<32x8xf32>
    %33 = vector.multi_reduction <maximumf>, %32, %cst_16 [2] : vector<32x8x8xf32> to vector<32x8xf32>
    %34 = vector.shape_cast %33 : vector<32x8xf32> to vector<32x8x1xf32>
    %35 = vector.broadcast %34 : vector<32x8x1xf32> to vector<32x8x8xf32>
    %36 = arith.subf %32, %35 : vector<32x8x8xf32>
    %37 = math.exp %36 : vector<32x8x8xf32>
    %cst_17 = arith.constant dense<0.000000e+00> : vector<32x8xf32>
    %38 = vector.multi_reduction <add>, %37, %cst_17 [2] : vector<32x8x8xf32> to vector<32x8xf32>
    %39 = vector.shape_cast %38 : vector<32x8xf32> to vector<32x8x1xf32>
    %40 = tpu.reciprocal %39 {approx = true} : vector<32x8x1xf32> -> vector<32x8x1xf32>
    %41 = vector.broadcast %40 : vector<32x8x1xf32> to vector<32x8x8xf32>
    %42 = arith.mulf %37, %41 : vector<32x8x8xf32>
    "tpu.trace_start"() <{level = 10 : i32, message = "bqk,bkd->bqd"}> : () -> ()
    %cst_18 = arith.constant dense<0.000000e+00> : vector<32x8x16xf32>
    %43 = tpu.matmul %42, %27, %cst_18 {dimension_numbers = #tpu.dot_dimension_numbers<[2], [1], [1], [2], [0, 0, 0, 1, 1, 2], [0], [0]>} : vector<32x8x8xf32>, vector<32x8x16xf32>, vector<32x8x16xf32> -> vector<32x8x16xf32>
    "tpu.trace_stop"() : () -> ()
    %44 = vector.extract_strided_slice %43 {offsets = [0, 0, 0], sizes = [16, 8, 16], strides = [1, 1, 1]} : vector<32x8x16xf32> to vector<16x8x16xf32>
    %45 = vector.extract_strided_slice %43 {offsets = [16, 0, 0], sizes = [16, 8, 16], strides = [1, 1, 1]} : vector<32x8x16xf32> to vector<16x8x16xf32>
    %46 = tpu.concatenate %44, %45 in 2 : vector<16x8x16xf32>, vector<16x8x16xf32> -> vector<16x8x32xf32>
    %47 = vector.shape_cast %46 : vector<16x8x32xf32> to vector<128x32xf32>
    %c0_19 = arith.constant 0 : index
    %c96 = arith.constant 96 : index
    %48 = vector.load %arg2[%c0_19, %c96] : memref<32x128xbf16, #tpu.memory_space<vmem>>, vector<32x32xbf16>
    %49 = arith.truncf %47 : vector<128x32xf32> to vector<128x32xbf16>
    %cst_20 = arith.constant dense<0.000000e+00> : vector<128x32xf32>
    %50 = tpu.matmul %49, %48, %cst_20 {dimension_numbers = #tpu.dot_dimension_numbers<[1], [0], [0], [1], [0, 0, 1, 1], [], []>} : vector<128x32xbf16>, vector<32x32xbf16>, vector<128x32xf32> -> vector<128x32xf32>
    %51 = vector.broadcast %10 : vector<1x32xf32> to vector<128x32xf32>
    %52 = arith.addf %50, %51 : vector<128x32xf32>
    %53 = arith.addf %52, %2 : vector<128x32xf32>
    %cst_21 = arith.constant dense<0.000000e+00> : vector<128xf32>
    %54 = vector.multi_reduction <add>, %53, %cst_21 [1] : vector<128x32xf32> to vector<128xf32>
    %55 = vector.shape_cast %54 : vector<128xf32> to vector<128x1xf32>
    %cst_22 = arith.constant 3.200000e+01 : f32
    %56 = vector.broadcast %cst_22 : f32 to vector<128x1xf32>
    %57 = arith.divf %55, %56 : vector<128x1xf32>
    %58 = vector.broadcast %57 : vector<128x1xf32> to vector<128x32xf32>
    %59 = arith.subf %53, %58 : vector<128x32xf32>
    %60 = arith.mulf %59, %59 : vector<128x32xf32>
    %cst_23 = arith.constant dense<0.000000e+00> : vector<128xf32>
    %61 = vector.multi_reduction <add>, %60, %cst_23 [1] : vector<128x32xf32> to vector<128xf32>
    %62 = vector.shape_cast %61 : vector<128xf32> to vector<128x1xf32>
    %cst_24 = arith.constant 3.200000e+01 : f32
    %63 = vector.broadcast %cst_24 : f32 to vector<128x1xf32>
    %64 = arith.divf %62, %63 : vector<128x1xf32>
    %65 = vector.broadcast %57 : vector<128x1xf32> to vector<128x32xf32>
    %66 = arith.subf %53, %65 : vector<128x32xf32>
    %cst_25 = arith.constant 9.99999974E-6 : f32
    %67 = vector.broadcast %cst_25 : f32 to vector<128x1xf32>
    %68 = arith.addf %64, %67 : vector<128x1xf32>
    %69 = math.rsqrt %68 : vector<128x1xf32>
    %70 = vector.broadcast %69 : vector<128x1xf32> to vector<128x32xf32>
    %71 = arith.mulf %66, %70 : vector<128x32xf32>
    %72 = vector.broadcast %11 : vector<1x32xf32> to vector<128x32xf32>
    %73 = arith.mulf %71, %72 : vector<128x32xf32>
    %74 = vector.broadcast %12 : vector<1x32xf32> to vector<128x32xf32>
    %75 = arith.addf %73, %74 : vector<128x32xf32>
    %76 = arith.truncf %75 : vector<128x32xf32> to vector<128x32xbf16>
    %c0_26 = arith.constant 0 : index
    %c0_27 = arith.constant 0 : index
    %77 = vector.load %arg3[%c0_26, %c0_27] : memref<32x128xbf16, #tpu.memory_space<vmem>>, vector<32x128xbf16>
    %cst_28 = arith.constant dense<0.000000e+00> : vector<128x128xf32>
    %78 = tpu.matmul %76, %77, %cst_28 {dimension_numbers = #tpu.dot_dimension_numbers<[1], [0], [0], [1], [0, 0, 1, 1], [], []>} : vector<128x32xbf16>, vector<32x128xbf16>, vector<128x128xf32> -> vector<128x128xf32>
    %79 = vector.broadcast %9 : vector<1x128xf32> to vector<128x128xf32>
    %80 = arith.addf %78, %79 : vector<128x128xf32>
    %cst_29 = arith.constant 0.000000e+00 : f32
    %81 = vector.broadcast %cst_29 : f32 to vector<128x128xf32>
    %82 = arith.maximumf %80, %81 : vector<128x128xf32>
    %83 = arith.truncf %82 : vector<128x128xf32> to vector<128x128xbf16>
    %c0_30 = arith.constant 0 : index
    %c0_31 = arith.constant 0 : index
    %84 = vector.load %arg4[%c0_30, %c0_31] : memref<128x32xbf16, #tpu.memory_space<vmem>>, vector<128x32xbf16>
    %cst_32 = arith.constant dense<0.000000e+00> : vector<128x32xf32>
    %85 = tpu.matmul %83, %84, %cst_32 {dimension_numbers = #tpu.dot_dimension_numbers<[1], [0], [0], [1], [0, 0, 1, 1], [], []>} : vector<128x128xbf16>, vector<128x32xbf16>, vector<128x32xf32> -> vector<128x32xf32>
    %86 = vector.broadcast %13 : vector<1x32xf32> to vector<128x32xf32>
    %87 = arith.addf %85, %86 : vector<128x32xf32>
    %88 = arith.addf %87, %75 : vector<128x32xf32>
    %cst_33 = arith.constant dense<0.000000e+00> : vector<128xf32>
    %89 = vector.multi_reduction <add>, %88, %cst_33 [1] : vector<128x32xf32> to vector<128xf32>
    %90 = vector.shape_cast %89 : vector<128xf32> to vector<128x1xf32>
    %cst_34 = arith.constant 3.200000e+01 : f32
    %91 = vector.broadcast %cst_34 : f32 to vector<128x1xf32>
    %92 = arith.divf %90, %91 : vector<128x1xf32>
    %93 = vector.broadcast %92 : vector<128x1xf32> to vector<128x32xf32>
    %94 = arith.subf %88, %93 : vector<128x32xf32>
    %95 = arith.mulf %94, %94 : vector<128x32xf32>
    %cst_35 = arith.constant dense<0.000000e+00> : vector<128xf32>
    %96 = vector.multi_reduction <add>, %95, %cst_35 [1] : vector<128x32xf32> to vector<128xf32>
    %97 = vector.shape_cast %96 : vector<128xf32> to vector<128x1xf32>
    %cst_36 = arith.constant 3.200000e+01 : f32
    %98 = vector.broadcast %cst_36 : f32 to vector<128x1xf32>
    %99 = arith.divf %97, %98 : vector<128x1xf32>
    %100 = vector.broadcast %92 : vector<128x1xf32> to vector<128x32xf32>
    %101 = arith.subf %88, %100 : vector<128x32xf32>
    %cst_37 = arith.constant 9.99999974E-6 : f32
    %102 = vector.broadcast %cst_37 : f32 to vector<128x1xf32>
    %103 = arith.addf %99, %102 : vector<128x1xf32>
    %104 = math.rsqrt %103 : vector<128x1xf32>
    %105 = vector.broadcast %104 : vector<128x1xf32> to vector<128x32xf32>
    %106 = arith.mulf %101, %105 : vector<128x32xf32>
    %107 = vector.broadcast %14 : vector<1x32xf32> to vector<128x32xf32>
    %108 = arith.mulf %106, %107 : vector<128x32xf32>
    %109 = vector.broadcast %15 : vector<1x32xf32> to vector<128x32xf32>
    %110 = arith.addf %108, %109 : vector<128x32xf32>
    %111 = vector.shape_cast %110 : vector<128x32xf32> to vector<16x8x32xf32>
    %c0_38 = arith.constant 0 : index
    %c0_39 = arith.constant 0 : index
    %c0_40 = arith.constant 0 : index
    %112 = vector.load %arg6[%c0_38, %c0_39, %c0_40] : memref<16x8x32xf32, #tpu.memory_space<vmem>>, vector<16x8x32xf32>
    tpu.vector_store %arg6[%c0_38, %c0_39, %c0_40], %111 {strides = array<i32>} : memref<16x8x32xf32, #tpu.memory_space<vmem>>, vector<16x8x32xf32>,
    return
  }
  func.func @transform_0(%arg0: i32) -> (i32, i32, i32, i32) {
    %c0_i32 = arith.constant 0 : i32
    %c0_i32_0 = arith.constant 0 : i32
    %c0_i32_1 = arith.constant 0 : i32
    %c0_i32_2 = arith.constant 0 : i32
    return %c0_i32, %arg0, %c0_i32_0, %c0_i32_1 : i32, i32, i32, i32
  }
  func.func @transform_1(%arg0: i32) -> (i32, i32) {
    %c0_i32 = arith.constant 0 : i32
    %c0_i32_0 = arith.constant 0 : i32
    %c0_i32_1 = arith.constant 0 : i32
    return %c0_i32, %c0_i32_0 : i32, i32
  }
  func.func @transform_2(%arg0: i32) -> (i32, i32) {
    %c0_i32 = arith.constant 0 : i32
    %c0_i32_0 = arith.constant 0 : i32
    %c0_i32_1 = arith.constant 0 : i32
    return %c0_i32, %c0_i32_0 : i32, i32
  }
  func.func @transform_3(%arg0: i32) -> (i32, i32) {
    %c0_i32 = arith.constant 0 : i32
    %c0_i32_0 = arith.constant 0 : i32
    %c0_i32_1 = arith.constant 0 : i32
    return %c0_i32, %c0_i32_0 : i32, i32
  }
  func.func @transform_4(%arg0: i32) -> (i32, i32) {
    %c0_i32 = arith.constant 0 : i32
    %c0_i32_0 = arith.constant 0 : i32
    %c0_i32_1 = arith.constant 0 : i32
    return %c0_i32, %c0_i32_0 : i32, i32
  }
  func.func @transform_5(%arg0: i32) -> (i32, i32, i32) {
    %c0_i32 = arith.constant 0 : i32
    %c0_i32_0 = arith.constant 0 : i32
    %c0_i32_1 = arith.constant 0 : i32
    return %arg0, %c0_i32, %c0_i32_0 : i32, i32, i32
  }
}

</mosaic_0001>

<bundles_post_ra>
// kernel: encoder_block.1
= control target key start
LH: loop header
LB: loop body
LE: loop exit
PB: predicated region body
PF: predicated region fallthrough
CT: control target
= control target key end

     0   :  { %10 = vsyncpa [#allocation4], 0  ;;  %s10713_s0 = inlined_call_operand.vmem [shape: f32[3,32,8,32], index: 0, kind: input, shape index: {}]   ;;  %s10714_s1 = inlined_call_operand.vmem [shape: bf16[32,128], index: 1, kind: input, shape index: {}]   ;;  %s10715_s2 = inlined_call_operand.vmem [shape: bf16[32,128], index: 2, kind: input, shape index: {}]   ;;  %s10716_s3 = inlined_call_operand.vmem [shape: bf16[128,32], index: 3, kind: input, shape index: {}]   ;;  %s10717_s4 = inlined_call_operand.vmem [shape: f32[8,128], index: 4, kind: input, shape index: {}]   ;;  %s10718_s5 = inlined_call_operand.hbm [shape: f32[32,8,32], index: 5, kind: output, shape index: {}]  }
   0x1   :  { %12 = vsyncpa [#allocation4 + $0x1], 0  ;;  %s8671_s18 = smov 0   ;;  %s8673_s19 = smov 0  }
   0x2   :  { %s8675_s20 = smov 0   ;;  %s8677_s21 = smov 0  }
   0x3 LB: > { %s7433_s22 = sadd.s32 4294967295, %s8629_s21   ;;  %s7434_s23 = sadd.s32 4294967294, %s8629_s21   ;;  %s8629_s21 = sphi %s8677_s21, %s10763_s21   ;;  %s8625_s20 = sphi %s8675_s20, %s10762_s20   ;;  %s8621_s19 = sphi %s8673_s19, %s10761_s19   ;;  %s8617_s18 = sphi %s8671_s18, %s10760_s18  }
   0x4   : > { %s8694_s24 = sadd.s32 1, %s8629_s21   ;;  %s25_s25 = sadd.s32 1, %s8625_s20 }
   0x5   : > { %s22_s26 = ssub.s32 %s8629_s21, %s8694_s24  ;;  %p32_p0 = scmp.ne.s32.totalorder %s8625_s20, %s8621_s19 }
   0x6   : > { %p23_p1 = scmp.eq.s32.totalorder %s22_s26, 0  ;;  %p33_p2 = scmp.eq.s32.totalorder %s8629_s21, 0 }
   0x7   : > { %p146_p3 = scmp.eq.s32.totalorder %s7433_s22, 1  ;;  %p151_p4 = scmp.ne.s32.totalorder %s8621_s19, %s8617_s18 }
   0x8   : > { %s8707_s27 = scalar_select %p23_p1, %s8625_s20, %s25_s25  }
   0x9   : > { %p34_p5 = por %p33_p2, %p32_p0  ;;  %p8709_p6 = por %p146_p3, %p32_p0 }
   0xa   : > { %p152_p7 = scmp.eq.s32.totalorder %s7434_s23, 1  ;;  %p7436_p9 = scmp.ge.s32.totalorder %s8629_s21, 2 }
   0xc   : > { %p8713_p8 = por %p152_p7, %p151_p4  ;;  %180 = sbr.rel (%p7436_p9) target bundleno = 48 (0x30), region = 32 }
  0x13   : > { %183 = sbr.rel (!%p34_p5) target bundleno = 48 (0x30), region = 36  ;;  %s185_s30 = sand.u32 (%p34_p5), 1, %s8625_s20  }
  0x14   : > { %s7603_s6 = sshll.u32 (%p34_p5), %s8629_s21, 7  ;;  %s8255_s7 = smul.u32 (%p34_p5), 384, %s185_s30 }
  0x15   : > { %s8725_s10 = scalar_lea.vmem (%p34_p5), %s10713_s0, %s7603_s6 }
  0x16   : > { %v312_v0 = vld [vmem:[%s8725_s10] sm:$0xff] (%p34_p5)  ;;  %v314_v1 = vld [vmem:[%s8725_s10 + $0x8] sm:$0xff] (%p34_p5)  ;;  %v316_v2 = vld [vmem:[%s8725_s10 + $0x10] sm:$0xff] (%p34_p5)  ;;  %s8733_s11 = scalar_lea.vmem (%p34_p5), [#allocation2], %s8255_s7 }
  0x17   : > { %v318_v3 = vld [vmem:[%s8725_s10 + $0x18] sm:$0xff] (%p34_p5)  ;;  %v320_v4 = vld [vmem:[%s8725_s10 + $0x20] sm:$0xff] (%p34_p5)  ;;  %v322_v5 = vld [vmem:[%s8725_s10 + $0x28] sm:$0xff] (%p34_p5)  ;;  %313 = vst [vmem:[%s8733_s11] sm:$0xff] (%p34_p5), %v312_v0 }
  0x18   : > { %315 = vst [vmem:[%s8733_s11 + $0x8] sm:$0xff] (%p34_p5), %v314_v1  ;;  %317 = vst [vmem:[%s8733_s11 + $0x10] sm:$0xff] (%p34_p5), %v316_v2  ;;  %v324_v6 = vld [vmem:[%s8725_s10 + $0x30] sm:$0xff] (%p34_p5)  ;;  %v326_v7 = vld [vmem:[%s8725_s10 + $0x38] sm:$0xff] (%p34_p5) }
  0x19   : > { %319 = vst [vmem:[%s8733_s11 + $0x18] sm:$0xff] (%p34_p5), %v318_v3  ;;  %321 = vst [vmem:[%s8733_s11 + $0x20] sm:$0xff] (%p34_p5), %v320_v4  ;;  %v328_v8 = vld [vmem:[%s8725_s10 + $0x40] sm:$0xff] (%p34_p5)  ;;  %v330_v9 = vld [vmem:[%s8725_s10 + $0x48] sm:$0xff] (%p34_p5) }
  0x1a   : > { %323 = vst [vmem:[%s8733_s11 + $0x28] sm:$0xff] %v322_v5  ;;  %325 = vst [vmem:[%s8733_s11 + $0x30] sm:$0xff] %v324_v6  ;;  %v332_v10 = vld [vmem:[%s8725_s10 + $0x50] sm:$0xff]  ;;  %v334_v11 = vld [vmem:[%s8725_s10 + $0x58] sm:$0xff] }
  0x1b   : > { %327 = vst [vmem:[%s8733_s11 + $0x38] sm:$0xff] %v326_v7  ;;  %329 = vst [vmem:[%s8733_s11 + $0x40] sm:$0xff] %v328_v8  ;;  %v336_v12 = vld [vmem:[%s8725_s10 + $0x60] sm:$0xff]  ;;  %v338_v13 = vld [vmem:[%s8725_s10 + $0x68] sm:$0xff] }
  0x1c   : > { %331 = vst [vmem:[%s8733_s11 + $0x48] sm:$0xff] %v330_v9  ;;  %333 = vst [vmem:[%s8733_s11 + $0x50] sm:$0xff] %v332_v10  ;;  %v340_v14 = vld [vmem:[%s8725_s10 + $0x70] sm:$0xff]  ;;  %v342_v15 = vld [vmem:[%s8725_s10 + $0x78] sm:$0xff] }
  0x1d   : > { %335 = vst [vmem:[%s8733_s11 + $0x58] sm:$0xff] %v334_v11  ;;  %337 = vst [vmem:[%s8733_s11 + $0x60] sm:$0xff] %v336_v12  ;;  %v344_v16 = vld [vmem:[%s8725_s10 + $0x100] sm:$0xff]  ;;  %v346_v17 = vld [vmem:[%s8725_s10 + $0x108] sm:$0xff] }
  0x1e   : > { %339 = vst [vmem:[%s8733_s11 + $0x68] sm:$0xff] %v338_v13  ;;  %341 = vst [vmem:[%s8733_s11 + $0x70] sm:$0xff] %v340_v14  ;;  %v348_v18 = vld [vmem:[%s8725_s10 + $0x110] sm:$0xff]  ;;  %v350_v19 = vld [vmem:[%s8725_s10 + $0x118] sm:$0xff] }
  0x1f   : > { %343 = vst [vmem:[%s8733_s11 + $0x78] sm:$0xff] %v342_v15  ;;  %345 = vst [vmem:[%s8733_s11 + $0x80] sm:$0xff] %v344_v16  ;;  %v352_v20 = vld [vmem:[%s8725_s10 + $0x120] sm:$0xff]  ;;  %v354_v21 = vld [vmem:[%s8725_s10 + $0x128] sm:$0xff] }
  0x20   : > { %347 = vst [vmem:[%s8733_s11 + $0x88] sm:$0xff] %v346_v17  ;;  %349 = vst [vmem:[%s8733_s11 + $0x90] sm:$0xff] %v348_v18  ;;  %v356_v22 = vld [vmem:[%s8725_s10 + $0x130] sm:$0xff]  ;;  %v358_v23 = vld [vmem:[%s8725_s10 + $0x138] sm:$0xff] }
  0x21   : > { %351 = vst [vmem:[%s8733_s11 + $0x98] sm:$0xff] %v350_v19  ;;  %353 = vst [vmem:[%s8733_s11 + $0xa0] sm:$0xff] %v352_v20  ;;  %v360_v24 = vld [vmem:[%s8725_s10 + $0x140] sm:$0xff]  ;;  %v362_v25 = vld [vmem:[%s8725_s10 + $0x148] sm:$0xff] }
  0x22   : > { %355 = vst [vmem:[%s8733_s11 + $0xa8] sm:$0xff] %v354_v21  ;;  %357 = vst [vmem:[%s8733_s11 + $0xb0] sm:$0xff] %v356_v22  ;;  %v364_v26 = vld [vmem:[%s8725_s10 + $0x150] sm:$0xff]  ;;  %v366_v27 = vld [vmem:[%s8725_s10 + $0x158] sm:$0xff] }
  0x23   : > { %359 = vst [vmem:[%s8733_s11 + $0xb8] sm:$0xff] %v358_v23  ;;  %361 = vst [vmem:[%s8733_s11 + $0xc0] sm:$0xff] %v360_v24  ;;  %v368_v28 = vld [vmem:[%s8725_s10 + $0x160] sm:$0xff]  ;;  %v370_v29 = vld [vmem:[%s8725_s10 + $0x168] sm:$0xff] }
  0x24   : > { %363 = vst [vmem:[%s8733_s11 + $0xc8] sm:$0xff] %v362_v25  ;;  %365 = vst [vmem:[%s8733_s11 + $0xd0] sm:$0xff] %v364_v26  ;;  %v372_v30 = vld [vmem:[%s8725_s10 + $0x170] sm:$0xff]  ;;  %v374_v31 = vld [vmem:[%s8725_s10 + $0x178] sm:$0xff] }
  0x25   : > { %367 = vst [vmem:[%s8733_s11 + $0xd8] sm:$0xff] %v366_v27  ;;  %369 = vst [vmem:[%s8733_s11 + $0xe0] sm:$0xff] %v368_v28  ;;  %v376_v32 = vld [vmem:[%s8725_s10 + $0x200] sm:$0xff]  ;;  %v378_v33 = vld [vmem:[%s8725_s10 + $0x208] sm:$0xff] }
  0x26   : > { %371 = vst [vmem:[%s8733_s11 + $0xe8] sm:$0xff] %v370_v29  ;;  %373 = vst [vmem:[%s8733_s11 + $0xf0] sm:$0xff] %v372_v30  ;;  %v380_v34 = vld [vmem:[%s8725_s10 + $0x210] sm:$0xff]  ;;  %v382_v35 = vld [vmem:[%s8725_s10 + $0x218] sm:$0xff] }
  0x27   : > { %375 = vst [vmem:[%s8733_s11 + $0xf8] sm:$0xff] %v374_v31  ;;  %377 = vst [vmem:[%s8733_s11 + $0x100] sm:$0xff] %v376_v32  ;;  %v384_v36 = vld [vmem:[%s8725_s10 + $0x220] sm:$0xff]  ;;  %v386_v37 = vld [vmem:[%s8725_s10 + $0x228] sm:$0xff] }
  0x28   : > { %379 = vst [vmem:[%s8733_s11 + $0x108] sm:$0xff] %v378_v33  ;;  %381 = vst [vmem:[%s8733_s11 + $0x110] sm:$0xff] %v380_v34  ;;  %v388_v38 = vld [vmem:[%s8725_s10 + $0x230] sm:$0xff]  ;;  %v390_v39 = vld [vmem:[%s8725_s10 + $0x238] sm:$0xff] }
  0x29   : > { %383 = vst [vmem:[%s8733_s11 + $0x118] sm:$0xff] %v382_v35  ;;  %385 = vst [vmem:[%s8733_s11 + $0x120] sm:$0xff] %v384_v36  ;;  %v392_v40 = vld [vmem:[%s8725_s10 + $0x240] sm:$0xff]  ;;  %v394_v41 = vld [vmem:[%s8725_s10 + $0x248] sm:$0xff] }
  0x2a   : > { %387 = vst [vmem:[%s8733_s11 + $0x128] sm:$0xff] %v386_v37  ;;  %389 = vst [vmem:[%s8733_s11 + $0x130] sm:$0xff] %v388_v38  ;;  %v396_v42 = vld [vmem:[%s8725_s10 + $0x250] sm:$0xff]  ;;  %v398_v43 = vld [vmem:[%s8725_s10 + $0x258] sm:$0xff] }
  0x2b   : > { %391 = vst [vmem:[%s8733_s11 + $0x138] sm:$0xff] %v390_v39  ;;  %393 = vst [vmem:[%s8733_s11 + $0x140] sm:$0xff] %v392_v40  ;;  %v400_v44 = vld [vmem:[%s8725_s10 + $0x260] sm:$0xff]  ;;  %v402_v45 = vld [vmem:[%s8725_s10 + $0x268] sm:$0xff] }
  0x2c   : > { %395 = vst [vmem:[%s8733_s11 + $0x148] sm:$0xff] %v394_v41  ;;  %397 = vst [vmem:[%s8733_s11 + $0x150] sm:$0xff] %v396_v42  ;;  %v404_v46 = vld [vmem:[%s8725_s10 + $0x270] sm:$0xff]  ;;  %v406_v47 = vld [vmem:[%s8725_s10 + $0x278] sm:$0xff] }
  0x2d   : > { %399 = vst [vmem:[%s8733_s11 + $0x158] sm:$0xff] %v398_v43  ;;  %401 = vst [vmem:[%s8733_s11 + $0x160] sm:$0xff] %v400_v44 }
  0x2e   : > { %403 = vst [vmem:[%s8733_s11 + $0x168] sm:$0xff] %v402_v45  ;;  %405 = vst [vmem:[%s8733_s11 + $0x170] sm:$0xff] %v404_v46 }
  0x2f   : > { %407 = vst [vmem:[%s8733_s11 + $0x178] sm:$0xff] %v406_v47 }
  0x30 PF: > { %p7439_p10 = scmp.ge.s32.totalorder %s8629_s21, 1  ;;  %p412_p11 = scmp.lt.s32.totalorder %s8629_s21, 3 }
  0x32   : > { %p413_p12 = pnand %p7439_p10, %p412_p11 }
  0x34   : > { %416 = sbr.rel (%p413_p12) target bundleno = 2964 (0xb94), region = 74 }
  0x3b   : > { %v8345_v48 = vld [vmem:[%s10714_s1] sm:$0xff]   ;;  %s8831_s14 = sand.u32 1, %s8621_s19   ;;  %v8346_v49 = vld [vmem:[%s10714_s1 + $0x8] sm:$0xff]   ;;  %vm537_vm0 = vcmask 261120   ;;  %s8631_s25 = smov 112   ;;  %vm8633_vm1 = vmmov 0  }
  0x3c   : > { %s8256_s17 = smul.u32 384, %s8831_s14  ;;  %7795 = vmatprep.subr.bf16.mxu0 %v8345_v48  ;;  %s8634_s26 = smov 96   ;;  %vm988_vm2 = vcmask 130048   ;;  %vm3451_vm3 = vcmask 64512  }
  0x3d   : > { %7796 = vmatpush3.bf16.msra.mxu0 %v8345_v48  ;;  %s8635_s30 = smov 64   ;;  %s8636_s8 = smov 32  }
  0x3e   : > { %7797 = vmatprep.subr.bf16.mxu0 %v8346_v49  ;;  %s8837_s23 = scalar_lea.vmem [#allocation2], %s8256_s17  ;;  %s8637_s11 = smov 16  }
  0x3f   : > { %v449_v50 = vld [vmem:[%s8837_s23] sm:$0xff]  ;;  %v450_v51 = vld [vmem:[%s8837_s23 + $0x8] sm:$0xff]  ;;  %v451_v52 = vld [vmem:[%s8837_s23 + $0x10] sm:$0xff]  ;;  %s7440_s15 = sshll.u32 %s8831_s14, 7  ;;  %s8638_s9 = smov [#allocation3]  }
  0x40   : > { %v497_v53 = vpack.c.bf16 %v450_v51, %v449_v50  ;;  %v452_v54 = vld [vmem:[%s8837_s23 + $0x18] sm:$0xff]  ;;  %v453_v55 = vld [vmem:[%s8837_s23 + $0x20] sm:$0xff]  ;;  %v454_v56 = vld [vmem:[%s8837_s23 + $0x28] sm:$0xff]  ;;  %s8571_s10 = sshll.u32 %s8638_s9, 4  ;;  %s8572_s10 = int_to_ptr.vmem [resolvable:$false] %s8571_s10 }
  0x41   : > { %v498_v57 = vpack.c.bf16 %v452_v54, %v451_v52  ;;  %7798 = vmatpush3.bf16.msra.mxu0 %v8346_v49  ;;  %v499_v58 = vpack.c.bf16 %v454_v56, %v453_v55  ;;  %v455_v59 = vld [vmem:[%s8837_s23 + $0x30] sm:$0xff]  ;;  %v456_v60 = vld [vmem:[%s8837_s23 + $0x38] sm:$0xff]  ;;  %v457_v61 = vld [vmem:[%s8837_s23 + $0x40] sm:$0xff] }
  0x42   : > { %7799 = vmatprep.mubr.msk.bf16.mxu0 %vm537_vm0, %v497_v53  ;;  %v458_v62 = vld [vmem:[%s8837_s23 + $0x48] sm:$0xff]  ;;  %v500_v63 = vpack.c.bf16 %v456_v60, %v455_v59  ;;  %v459_v1 = vld [vmem:[%s8837_s23 + $0x50] sm:$0xff]  ;;  %v460_v2 = vld [vmem:[%s8837_s23 + $0x58] sm:$0xff] }
  0x43   : > { %v501_v0 = vpack.c.bf16 %v458_v62, %v457_v61  ;;  %v461_v3 = vld [vmem:[%s8837_s23 + $0x60] sm:$0xff]  ;;  %v462_v4 = vld [vmem:[%s8837_s23 + $0x68] sm:$0xff]  ;;  %v502_v5 = vpack.c.bf16 %v460_v2, %v459_v1  ;;  %v463_v7 = vld [vmem:[%s8837_s23 + $0x70] sm:$0xff] }
  0x44   : > { %7800 = vmatmul.mubr.msk.bf16.vlgmr.msra.gmra.mrb[0].mxu0 %vm537_vm0, %v498_v57  ;;  %v503_v6 = vpack.c.bf16 %v462_v4, %v461_v3  ;;  %v464_v8 = vld [vmem:[%s8837_s23 + $0x78] sm:$0xff]  ;;  %v465_v9 = vld [vmem:[%s8837_s23 + $0x80] sm:$0xff]  ;;  %v466_v10 = vld [vmem:[%s8837_s23 + $0x88] sm:$0xff] }
  0x45   : > { %7803 = vmatprep.mubr.msk.bf16.mxu0 %vm537_vm0, %v499_v58  ;;  %v504_v11 = vpack.c.bf16 %v464_v8, %v463_v7  ;;  %v505_v12 = vpack.c.bf16 %v466_v10, %v465_v9  ;;  %v467_v13 = vld [vmem:[%s8837_s23 + $0x90] sm:$0xff]  ;;  %v468_v14 = vld [vmem:[%s8837_s23 + $0x98] sm:$0xff]  ;;  %v469_v15 = vld [vmem:[%s8837_s23 + $0xa0] sm:$0xff]  ;;  %v10719_v8 = vmov 0.0  }
  0x46   : > { %v470_v16 = vld [vmem:[%s8837_s23 + $0xa8] sm:$0xff]  ;;  %v506_v17 = vpack.c.bf16 %v468_v14, %v467_v13  ;;  %v471_v19 = vld [vmem:[%s8837_s23 + $0xb0] sm:$0xff]  ;;  %v472_v20 = vld [vmem:[%s8837_s23 + $0xb8] sm:$0xff]  ;;  %7847 = vmatprep.subr.mxu0 %v10719_v8  ;;  %7852 = vmatprep.subr.mxu1 %v10719_v8 }
  0x47   : > { %v507_v18 = vpack.c.bf16 %v470_v16, %v469_v15  ;;  %v473_v21 = vld [vmem:[%s8837_s23 + $0xc0] sm:$0xff]  ;;  %v474_v22 = vld [vmem:[%s8837_s23 + $0xc8] sm:$0xff]  ;;  %v508_v23 = vpack.c.bf16 %v472_v20, %v471_v19  ;;  %v475_v25 = vld [vmem:[%s8837_s23 + $0xd0] sm:$0xff]  ;;  %7854 = vmatprep.mubr.msk.f32.mxu1 %vm8633_vm1, %v10719_v8 }
  0x48   : > { %v509_v24 = vpack.c.bf16 %v474_v22, %v473_v21  ;;  %v476_v26 = vld [vmem:[%s8837_s23 + $0xd8] sm:$0xff]  ;;  %v477_v27 = vld [vmem:[%s8837_s23 + $0xe0] sm:$0xff]  ;;  %v478_v28 = vld [vmem:[%s8837_s23 + $0xe8] sm:$0xff] }
  0x49   : > { %v510_v29 = vpack.c.bf16 %v476_v26, %v475_v25  ;;  %v511_v30 = vpack.c.bf16 %v478_v28, %v477_v27  ;;  %v479_v31 = vld [vmem:[%s8837_s23 + $0xf0] sm:$0xff]  ;;  %v480_v32 = vld [vmem:[%s8837_s23 + $0xf8] sm:$0xff]  ;;  %v481_v33 = vld [vmem:[%s8837_s23 + $0x100] sm:$0xff] }
  0x4a   : > { %v482_v34 = vld [vmem:[%s8837_s23 + $0x108] sm:$0xff]  ;;  %v512_v35 = vpack.c.bf16 %v480_v32, %v479_v31  ;;  %v483_v37 = vld [vmem:[%s8837_s23 + $0x110] sm:$0xff]  ;;  %v484_v38 = vld [vmem:[%s8837_s23 + $0x118] sm:$0xff] }
  0x4b   : > { %v513_v36 = vpack.c.bf16 %v482_v34, %v481_v33  ;;  %v485_v39 = vld [vmem:[%s8837_s23 + $0x120] sm:$0xff]  ;;  %v486_v40 = vld [vmem:[%s8837_s23 + $0x128] sm:$0xff]  ;;  %v514_v41 = vpack.c.bf16 %v484_v38, %v483_v37  ;;  %v487_v43 = vld [vmem:[%s8837_s23 + $0x130] sm:$0xff] }
  0x4c   : > { %7804 = vmatmul.mubr.msk.bf16.gmra.mrb[4].mxu0 %vm537_vm0, %v500_v63  ;;  %v515_v42 = vpack.c.bf16 %v486_v40, %v485_v39  ;;  %v488_v44 = vld [vmem:[%s8837_s23 + $0x138] sm:$0xff]  ;;  %v489_v45 = vld [vmem:[%s8837_s23 + $0x140] sm:$0xff]  ;;  %v490_v46 = vld [vmem:[%s8837_s23 + $0x148] sm:$0xff] }
  0x4d   : > { %7807 = vmatprep.mubr.msk.bf16.mxu0 %vm537_vm0, %v501_v0  ;;  %v516_v47 = vpack.c.bf16 %v488_v44, %v487_v43  ;;  %v517_v48 = vpack.c.bf16 %v490_v46, %v489_v45  ;;  %v491_v49 = vld [vmem:[%s8837_s23 + $0x150] sm:$0xff]  ;;  %v492_v50 = vld [vmem:[%s8837_s23 + $0x158] sm:$0xff]  ;;  %v493_v51 = vld [vmem:[%s8837_s23 + $0x160] sm:$0xff] }
  0x4e   : > { %v494_v52 = vld [vmem:[%s8837_s23 + $0x168] sm:$0xff]  ;;  %v518_v53 = vpack.c.bf16 %v492_v50, %v491_v49  ;;  %v495_v55 = vld [vmem:[%s8837_s23 + $0x170] sm:$0xff]  ;;  %v496_v56 = vld [vmem:[%s8837_s23 + $0x178] sm:$0xff] }
  0x4f   : > { %v519_v54 = vpack.c.bf16 %v494_v52, %v493_v51  ;;  %v520_v57 = vpack.c.bf16 %v496_v56, %v495_v55 }
  0x54   : > { %7808 = vmatmul.mubr.msk.bf16.gmra.mrb[8].mxu0 %vm537_vm0, %v502_v5 }
  0x55   : > { %7811 = vmatprep.mubr.msk.bf16.mxu0 %vm537_vm0, %v503_v6 }
  0x5c   : > { %7812 = vmatmul.mubr.msk.bf16.gmra.mrb[12].mxu0 %vm537_vm0, %v504_v11 }
  0x5d   : > { %7815 = vmatprep.mubr.msk.bf16.mxu0 %vm537_vm0, %v505_v12 }
  0x64   : > { %7816 = vmatmul.mubr.msk.bf16.gmra.mrb[16].mxu0 %vm537_vm0, %v506_v17 }
  0x65   : > { %7819 = vmatprep.mubr.msk.bf16.mxu0 %vm537_vm0, %v507_v18 }
  0x6c   : > { %7820 = vmatmul.mubr.msk.bf16.gmra.mrb[20].mxu0 %vm537_vm0, %v508_v23 }
  0x6d   : > { %7823 = vmatprep.mubr.msk.bf16.mxu0 %vm537_vm0, %v509_v24 }
  0x74   : > { %7824 = vmatmul.mubr.msk.bf16.gmra.mrb[24].mxu0 %vm537_vm0, %v510_v29 }
  0x75   : > { %7827 = vmatprep.mubr.msk.bf16.mxu0 %vm537_vm0, %v511_v30 }
  0x7c   : > { %7828 = vmatmul.mubr.msk.bf16.gmra.mrb[28].mxu0 %vm537_vm0, %v512_v35 }
  0x7d   : > { %7831 = vmatprep.mubr.msk.bf16.mxu0 %vm537_vm0, %v513_v36 }
  0x84   : > { %7832 = vmatmul.mubr.msk.bf16.gmra.mrb[32].mxu0 %vm537_vm0, %v514_v41 }
  0x85   : > { %7835 = vmatprep.mubr.msk.bf16.mxu0 %vm537_vm0, %v515_v42 }
  0x8c   : > { %7836 = vmatmul.mubr.msk.bf16.gmra.mrb[36].mxu0 %vm537_vm0, %v516_v47 }
  0x8d   : > { %7839 = vmatprep.mubr.msk.bf16.mxu0 %vm537_vm0, %v517_v48 }
  0x94   : > { %7840 = vmatmul.mubr.msk.bf16.gmra.mrb[40].mxu0 %vm537_vm0, %v518_v53 }
  0x95   : > { %7843 = vmatprep.mubr.msk.bf16.mxu0 %vm537_vm0, %v519_v54 }
  0x9c   : > { %7844 = vmatmul.mubr.msk.bf16.gmra.mrb[44].mxu0 %vm537_vm0, %v520_v57 }
  0x9d   : > { %7849 = vmatprep.mubr.msk.f32.mxu0 %vm8633_vm1, %v10719_v8 }
 0x117   : > { %v8911_v58 = vpop.f32.mrb[0].mxu0 }
 0x118   : > { %958 = vrot.lane.b32.xlu1 %v8911_v58, %s8631_s25  ;;  %v8915_v59 = vpop.f32.mrb[1].mxu0 }
 0x119   : > { %v8917_v60 = vpop.f32.mrb[2].mxu0 }
 0x11a   : > { %v8919_v61 = vpop.f32.mrb[3].mxu0 }
 0x11b   : > { %956 = vrot.lane.b32.xlu0 %v8919_v61, %s8631_s25 }
 0x11c   : > { %954 = vrot.lane.b32.xlu1 %v8915_v59, %s8631_s25 }
 0x11f   : > { %v8925_v62 = vpop.f32.mrb[4].mxu0 }
 0x120   : > { %v8927_v63 = vpop.f32.mrb[5].mxu0 }
 0x121   : > { %v8929_v0 = vpop.f32.mrb[6].mxu0 }
 0x122   : > { %v8931_v1 = vpop.f32.mrb[7].mxu0 }
 0x127   : > { %v8933_v2 = vpop.f32.mrb[8].mxu0 }
 0x128   : > { %v8935_v3 = vpop.f32.mrb[9].mxu0 }
 0x129   : > { %v8937_v4 = vpop.f32.mrb[10].mxu0 }
 0x12a   : > { %v8939_v5 = vpop.f32.mrb[11].mxu0 }
 0x12f   : > { %v8941_v6 = vpop.f32.mrb[12].mxu0 }
 0x130   : > { %v8943_v7 = vpop.f32.mrb[13].mxu0 }
 0x131   : > { %v8947_v9 = vpop.f32.mrb[14].mxu0 }
 0x132   : > { %v8949_v10 = vpop.f32.mrb[15].mxu0 }
 0x137   : > { %v7817_v11 = vpop.f32.mrb[16].mxu0 }
 0x138   : > { %1139 = vrot.lane.b32.xlu1 %v7817_v11, %s8634_s26  ;;  %v708_v12 = vpop.f32.mrb[17].mxu0 }
 0x139   : > { %906 = vrot.lane.b32.xlu0 %v708_v12, %s8631_s25  ;;  %v7818_v13 = vpop.f32.mrb[18].mxu0 }
 0x13a   : > { %v711_v14 = vpop.f32.mrb[19].mxu0 }
 0x13c   : > { %910 = vrot.lane.b32.xlu1 %v7817_v11, %s8631_s25 }
 0x13d   : > { %1215 = vrot.lane.b32.xlu0 %v7818_v13, %s8634_s26 }
 0x13f   : > { %v7821_v15 = vpop.f32.mrb[20].mxu0 }
 0x140   : > { %986 = vrot.lane.b32.xlu1 %v708_v12, %s8634_s26  ;;  %v724_v16 = vpop.f32.mrb[21].mxu0 }
 0x141   : > { %1063 = vrot.lane.b32.xlu0 %v711_v14, %s8634_s26  ;;  %v7822_v17 = vpop.f32.mrb[22].mxu0 }
 0x142   : > { %v727_v18 = vpop.f32.mrb[23].mxu0 }
 0x144   : > { %912 = vrot.lane.b32.xlu1 %v7818_v13, %s8631_s25 }
 0x145   : > { %1443 = vrot.lane.b32.xlu0 %v7821_v15, %s8634_s26 }
 0x147   : > { %v7825_v19 = vpop.f32.mrb[24].mxu0 }
 0x148   : > { %908 = vrot.lane.b32.xlu1 %v711_v14, %s8631_s25  ;;  %v740_v20 = vpop.f32.mrb[25].mxu0 }
 0x149   : > { %1291 = vrot.lane.b32.xlu0 %v724_v16, %s8634_s26  ;;  %v7826_v21 = vpop.f32.mrb[26].mxu0 }
 0x14a   : > { %v743_v22 = vpop.f32.mrb[27].mxu0 }
 0x14c   : > { %918 = vrot.lane.b32.xlu1 %v7821_v15, %s8631_s25 }
 0x14d   : > { %1519 = vrot.lane.b32.xlu0 %v7822_v17, %s8634_s26 }
 0x14f   : > { %v7829_v23 = vpop.f32.mrb[28].mxu0 }
 0x150   : > { %914 = vrot.lane.b32.xlu1 %v724_v16, %s8631_s25  ;;  %v756_v24 = vpop.f32.mrb[29].mxu0 }
 0x151   : > { %1367 = vrot.lane.b32.xlu0 %v727_v18, %s8634_s26  ;;  %v7830_v25 = vpop.f32.mrb[30].mxu0 }
 0x152   : > { %v759_v26 = vpop.f32.mrb[31].mxu0 }
 0x154   : > { %920 = vrot.lane.b32.xlu1 %v7822_v17, %s8631_s25 }
 0x155   : > { %926 = vrot.lane.b32.xlu0 %v7825_v19, %s8631_s25 }
 0x157   : > { %v8971_v27 = vpop.f32.mrb[32].mxu0 }
 0x158   : > { %916 = vrot.lane.b32.xlu1 %v727_v18, %s8631_s25  ;;  %v8974_v28 = vpop.f32.mrb[33].mxu0 }
 0x159   : > { %1595 = vrot.lane.b32.xlu0 %v740_v20, %s8634_s26  ;;  %v8977_v29 = vpop.f32.mrb[34].mxu0 }
 0x15a   : > { %v775_v30 = vpop.f32.mrb[35].mxu0 }
 0x15c   : > { %1747 = vrot.lane.b32.xlu1 %v7825_v19, %s8634_s26 }
 0x15d   : > { %1823 = vrot.lane.b32.xlu0 %v7826_v21, %s8634_s26 }
 0x15f   : > { %v8981_v31 = vpop.f32.mrb[36].mxu0 }
 0x160   : > { %922 = vrot.lane.b32.xlu1 %v740_v20, %s8631_s25  ;;  %v8984_v32 = vpop.f32.mrb[37].mxu0 }
 0x161   : > { %1671 = vrot.lane.b32.xlu0 %v743_v22, %s8634_s26  ;;  %v8987_v33 = vpop.f32.mrb[38].mxu0 }
 0x162   : > { %v8989_v34 = vpop.f32.mrb[39].mxu0 }
 0x164   : > { %928 = vrot.lane.b32.xlu1 %v7826_v21, %s8631_s25 }
 0x165   : > { %924 = vrot.lane.b32.xlu0 %v743_v22, %s8631_s25 }
 0x167   : > { %v8993_v35 = vpop.f32.mrb[40].mxu0 }
 0x168   : > { %934 = vrot.lane.b32.xlu1 %v7829_v23, %s8631_s25  ;;  %v8996_v36 = vpop.f32.mrb[41].mxu0 }
 0x169   : > { %2051 = vrot.lane.b32.xlu0 %v7829_v23, %s8634_s26  ;;  %v8999_v37 = vpop.f32.mrb[42].mxu0 }
 0x16a   : > { %v9001_v38 = vpop.f32.mrb[43].mxu0 }
 0x16c   : > { %930 = vrot.lane.b32.xlu1 %v756_v24, %s8631_s25 }
 0x16d   : > { %1899 = vrot.lane.b32.xlu0 %v756_v24, %s8634_s26 }
 0x16f   : > { %v9005_v39 = vpop.f32.mrb[44].mxu0 }
 0x170   : > { %2127 = vrot.lane.b32.xlu1 %v7830_v25, %s8634_s26  ;;  %v9008_v40 = vpop.f32.mrb[45].mxu0 }
 0x171   : > { %936 = vrot.lane.b32.xlu0 %v7830_v25, %s8631_s25  ;;  %v9011_v41 = vpop.f32.mrb[46].mxu0 }
 0x172   : > { %v9013_v42 = vpop.f32.mrb[47].mxu0 }
 0x174   : > { %1975 = vrot.lane.b32.xlu1 %v759_v26, %s8634_s26 }
 0x175   : > { %932 = vrot.lane.b32.xlu0 %v759_v26, %s8631_s25 }
 0x178   : > { %862 = vrot.lane.b32.xlu1 %v8971_v27, %s8631_s25 }
 0x179   : > { %878 = vrot.lane.b32.xlu0 %v8993_v35, %s8631_s25 }
 0x17c   : > { %858 = vrot.lane.b32.xlu1 %v8974_v28, %s8631_s25 }
 0x17d   : > { %874 = vrot.lane.b32.xlu0 %v8996_v36, %s8631_s25 }
 0x180   : > { %864 = vrot.lane.b32.xlu1 %v8977_v29, %s8631_s25 }
 0x181   : > { %886 = vrot.lane.b32.xlu0 %v9005_v39, %s8631_s25 }
 0x184   : > { %860 = vrot.lane.b32.xlu1 %v775_v30, %s8631_s25 }
 0x185   : > { %882 = vrot.lane.b32.xlu0 %v9008_v40, %s8631_s25 }
 0x188   : > { %870 = vrot.lane.b32.xlu1 %v8981_v31, %s8631_s25 }
 0x18a   : > { %v9044_v43 = vpop.permute.xlu1 %958 }
 0x18c   : > { %866 = vrot.lane.b32.xlu1 %v8984_v32, %s8631_s25 }
 0x18d   : > { %v9052_v45 = vpop.permute.xlu0 %956 }
 0x18e   : > { %v9050_v44 = vpop.permute.xlu1 %954 }
 0x190   : > { %872 = vrot.lane.b32.xlu1 %v8987_v33, %s8631_s25 }
 0x194   : > { %868 = vrot.lane.b32.xlu1 %v8989_v34, %s8631_s25 }
 0x198   : > { %880 = vrot.lane.b32.xlu1 %v8999_v37, %s8631_s25 }
 0x19c   : > { %876 = vrot.lane.b32.xlu1 %v9001_v38, %s8631_s25 }
 0x1a0   : > { %888 = vrot.lane.b32.xlu1 %v9011_v41, %s8631_s25 }
 0x1a4   : > { %884 = vrot.lane.b32.xlu1 %v9013_v42, %s8631_s25 }
 0x1aa   : > { %v1140_v46 = vpop.permute.xlu1 %1139 }
 0x1ab   : > { %v907_v47 = vpop.permute.xlu0 %906 }
 0x1ae   : > { %v911_v48 = vpop.permute.xlu1 %910 }
 0x1af   : > { %v1216_v49 = vpop.permute.xlu0 %1215  ;;  %2355 = vrot.lane.b32.xlu0 %v911_v48, %s8634_s26 }
 0x1b2   : > { %v987_v50 = vpop.permute.xlu1 %986 }
 0x1b3   : > { %7848 = vmatpush3.xpose.msk.msra.mxu0 %vm988_vm2, %v987_v50  ;;  %v1064_v51 = vpop.permute.xlu0 %1063  ;;  %2203 = vrot.lane.b32.xlu0 %v907_v47, %s8634_s26 }
 0x1b4   : > { %7853 = vmatpush3.xpose.msk.msra.mxu1 %vm988_vm2, %v1064_v51  ;;  %7972 = vmatprep.subr.mxu0 %v10719_v8 }
 0x1b5   : > { %7857 = vmatprep.subr.mxu1 %v10719_v8 }
 0x1b6   : > { %v913_v52 = vpop.permute.xlu1 %912  ;;  %7850 = vmatmul.mubr.msk.f32.vlgmr.msra.gmra.mrb[48].mxu0 %vm988_vm2, %v8974_v28 }
 0x1b7   : > { %v1444_v53 = vpop.permute.xlu0 %1443  ;;  %7855 = vmatmul.mubr.msk.f32.vlgmr.msra.gmra.mrb[0].mxu1 %vm988_vm2, %v775_v30  ;;  %2431 = vrot.lane.b32.xlu0 %v913_v52, %s8634_s26 }
 0x1b8   : > { %7858 = vmatpush3.xpose.msk.msra.mxu1 %vm988_vm2, %v1140_v46  ;;  %7859 = vmatprep.mubr.msk.f32.mxu1 %vm8633_vm1, %v10719_v8 }
 0x1b9   : > { %7862 = vmatprep.subr.mxu1 %v10719_v8  ;;  %7974 = vmatprep.mubr.msk.f32.mxu0 %vm8633_vm1, %v10719_v8 }
 0x1ba   : > { %v909_v54 = vpop.permute.xlu1 %908 }
 0x1bb   : > { %v1292_v55 = vpop.permute.xlu0 %1291  ;;  %7860 = vmatmul.mubr.msk.f32.vlgmr.msra.gmra.mrb[2].mxu1 %vm988_vm2, %v8971_v27  ;;  %2279 = vrot.lane.b32.xlu0 %v909_v54, %s8634_s26 }
 0x1bc   : > { %7863 = vmatpush3.xpose.msk.msra.mxu1 %vm988_vm2, %v1216_v49  ;;  %7864 = vmatprep.mubr.msk.f32.mxu1 %vm8633_vm1, %v10719_v8 }
 0x1bd   : > { %7867 = vmatprep.subr.mxu1 %v10719_v8 }
 0x1be   : > { %v919_v56 = vpop.permute.xlu1 %918 }
 0x1bf   : > { %v1520_v57 = vpop.permute.xlu0 %1519  ;;  %7865 = vmatmul.mubr.msk.f32.vlgmr.msra.gmra.mrb[4].mxu1 %vm988_vm2, %v8977_v29  ;;  %2659 = vrot.lane.b32.xlu0 %v919_v56, %s8634_s26 }
 0x1c0   : > { %7868 = vmatpush3.xpose.msk.msra.mxu1 %vm988_vm2, %v1292_v55  ;;  %7869 = vmatprep.mubr.msk.f32.mxu1 %vm8633_vm1, %v10719_v8 }
 0x1c1   : > { %7872 = vmatprep.subr.mxu1 %v10719_v8 }
 0x1c2   : > { %v915_v11 = vpop.permute.xlu1 %914 }
 0x1c3   : > { %v1368_v12 = vpop.permute.xlu0 %1367  ;;  %7870 = vmatmul.mubr.msk.f32.vlgmr.msra.gmra.mrb[6].mxu1 %vm988_vm2, %v8984_v32  ;;  %2507 = vrot.lane.b32.xlu0 %v915_v11, %s8634_s26 }
 0x1c4   : > { %7873 = vmatpush3.xpose.msk.msra.mxu1 %vm988_vm2, %v1368_v12  ;;  %7874 = vmatprep.mubr.msk.f32.mxu1 %vm8633_vm1, %v10719_v8 }
 0x1c5   : > { %7877 = vmatprep.subr.mxu1 %v10719_v8 }
 0x1c6   : > { %v921_v13 = vpop.permute.xlu1 %920 }
 0x1c7   : > { %v927_v14 = vpop.permute.xlu0 %926  ;;  %7875 = vmatmul.mubr.msk.f32.vlgmr.msra.gmra.mrb[8].mxu1 %vm988_vm2, %v8989_v34  ;;  %2735 = vrot.lane.b32.xlu0 %v921_v13, %s8634_s26 }
 0x1c8   : > { %7878 = vmatpush3.xpose.msk.msra.mxu1 %vm988_vm2, %v1444_v53  ;;  %7879 = vmatprep.mubr.msk.f32.mxu1 %vm8633_vm1, %v10719_v8 }
 0x1c9   : > { %7882 = vmatprep.subr.mxu1 %v10719_v8 }
 0x1ca   : > { %v917_v15 = vpop.permute.xlu1 %916 }
 0x1cb   : > { %v1596_v16 = vpop.permute.xlu0 %1595  ;;  %7880 = vmatmul.mubr.msk.f32.vlgmr.msra.gmra.mrb[10].mxu1 %vm988_vm2, %v8981_v31  ;;  %2583 = vrot.lane.b32.xlu0 %v917_v15, %s8634_s26 }
 0x1cc   : > { %7883 = vmatpush3.xpose.msk.msra.mxu1 %vm988_vm2, %v1520_v57  ;;  %7884 = vmatprep.mubr.msk.f32.mxu1 %vm8633_vm1, %v10719_v8 }
 0x1cd   : > { %7887 = vmatprep.subr.mxu1 %v10719_v8 }
 0x1ce   : > { %v1748_v17 = vpop.permute.xlu1 %1747 }
 0x1cf   : > { %v1824_v18 = vpop.permute.xlu0 %1823  ;;  %7885 = vmatmul.mubr.msk.f32.vlgmr.msra.gmra.mrb[12].mxu1 %vm988_vm2, %v8987_v33  ;;  %960 = vrot.lane.b32.xlu0 %v8917_v60, %s8631_s25 }
 0x1d0   : > { %7888 = vmatpush3.xpose.msk.msra.mxu1 %vm988_vm2, %v1596_v16  ;;  %7889 = vmatprep.mubr.msk.f32.mxu1 %vm8633_vm1, %v10719_v8 }
 0x1d1   : > { %7892 = vmatprep.subr.mxu1 %v10719_v8 }
 0x1d2   : > { %v923_v19 = vpop.permute.xlu1 %922 }
 0x1d3   : > { %v1672_v20 = vpop.permute.xlu0 %1671  ;;  %7890 = vmatmul.mubr.msk.f32.vlgmr.msra.gmra.mrb[14].mxu1 %vm988_vm2, %v8996_v36  ;;  %2963 = vrot.lane.b32.xlu0 %v927_v14, %s8634_s26 }
 0x1d4   : > { %7893 = vmatpush3.xpose.msk.msra.mxu1 %vm988_vm2, %v1672_v20  ;;  %7894 = vmatprep.mubr.msk.f32.mxu1 %vm8633_vm1, %v10719_v8 }
 0x1d5   : > { %7897 = vmatprep.subr.mxu1 %v10719_v8 }
 0x1d6   : > { %v929_v21 = vpop.permute.xlu1 %928 }
 0x1d7   : > { %v925_v22 = vpop.permute.xlu0 %924  ;;  %7895 = vmatmul.mubr.msk.f32.vlgmr.msra.gmra.mrb[16].mxu1 %vm988_vm2, %v9001_v38  ;;  %2811 = vrot.lane.b32.xlu0 %v923_v19, %s8634_s26 }
 0x1d8   : > { %3039 = vrot.lane.b32.xlu1 %v929_v21, %s8634_s26  ;;  %7898 = vmatpush3.xpose.msk.msra.mxu1 %vm988_vm2, %v1748_v17 }
 0x1d9   : > { %7899 = vmatprep.mubr.msk.f32.mxu1 %vm8633_vm1, %v10719_v8  ;;  %7902 = vmatprep.subr.mxu1 %v10719_v8 }
 0x1da   : > { %v935_v23 = vpop.permute.xlu1 %934 }
 0x1db   : > { %v2052_v24 = vpop.permute.xlu0 %2051  ;;  %7900 = vmatmul.mubr.msk.f32.vlgmr.msra.gmra.mrb[18].mxu1 %vm988_vm2, %v8993_v35  ;;  %3267 = vrot.lane.b32.xlu0 %v935_v23, %s8634_s26 }
 0x1dc   : > { %2887 = vrot.lane.b32.xlu1 %v925_v22, %s8634_s26  ;;  %7903 = vmatpush3.xpose.msk.msra.mxu1 %vm988_vm2, %v1824_v18 }
 0x1dd   : > { %7904 = vmatprep.mubr.msk.f32.mxu1 %vm8633_vm1, %v10719_v8  ;;  %7907 = vmatprep.subr.mxu1 %v10719_v8 }
 0x1de   : > { %v931_v25 = vpop.permute.xlu1 %930 }
 0x1df   : > { %v1900_v26 = vpop.permute.xlu0 %1899  ;;  %7905 = vmatmul.mubr.msk.f32.vlgmr.msra.gmra.mrb[20].mxu1 %vm988_vm2, %v8999_v37  ;;  %3115 = vrot.lane.b32.xlu0 %v931_v25, %s8634_s26 }
 0x1e0   : > { %7908 = vmatpush3.xpose.msk.msra.mxu1 %vm988_vm2, %v1900_v26  ;;  %7909 = vmatprep.mubr.msk.f32.mxu1 %vm8633_vm1, %v10719_v8 }
 0x1e1   : > { %7912 = vmatprep.subr.mxu1 %v10719_v8 }
 0x1e2   : > { %v2128_v27 = vpop.permute.xlu1 %2127 }
 0x1e3   : > { %v937_v28 = vpop.permute.xlu0 %936  ;;  %964 = vrot.lane.b32.xlu0 %v8931_v1, %s8631_s25  ;;  %7910 = vmatmul.mubr.msk.f32.vlgmr.msra.gmra.mrb[22].mxu1 %vm988_vm2, %v9008_v40 }
 0x1e4   : > { %3343 = vrot.lane.b32.xlu1 %v937_v28, %s8634_s26  ;;  %7914 = vmatprep.mubr.msk.f32.mxu1 %vm8633_vm1, %v10719_v8 }
 0x1e6   : > { %v1976_v29 = vpop.permute.xlu1 %1975 }
 0x1e7   : > { %v933_v30 = vpop.permute.xlu0 %932  ;;  %968 = vrot.lane.b32.xlu0 %v8929_v0, %s8631_s25  ;;  %7913 = vmatpush3.xpose.msk.msra.mxu1 %vm988_vm2, %v1976_v29 }
 0x1e8   : > { %3191 = vrot.lane.b32.xlu1 %v933_v30, %s8634_s26  ;;  %7917 = vmatprep.subr.mxu1 %v10719_v8 }
 0x1ea   : > { %7915 = vmatmul.mubr.msk.f32.vlgmr.msra.gmra.mrb[24].mxu1 %vm988_vm2, %v9013_v42  ;;  %v863_v31 = vpop.permute.xlu1 %862 }
 0x1eb   : > { %972 = vrot.lane.b32.xlu0 %v8939_v5, %s8631_s25  ;;  %7918 = vmatpush3.xpose.msk.msra.mxu1 %vm988_vm2, %v2052_v24 }
 0x1ec   : > { %962 = vrot.lane.b32.xlu1 %v8927_v63, %s8631_s25  ;;  %7919 = vmatprep.mubr.msk.f32.mxu1 %vm8633_vm1, %v10719_v8 }
 0x1ed   : > { %7922 = vmatprep.subr.mxu1 %v10719_v8 }
 0x1ee   : > { %7920 = vmatmul.mubr.msk.f32.vlgmr.msra.gmra.mrb[26].mxu1 %vm988_vm2, %v9005_v39 }
 0x1ef   : > { %976 = vrot.lane.b32.xlu0 %v8937_v4, %s8631_s25  ;;  %7923 = vmatpush3.xpose.msk.msra.mxu1 %vm988_vm2, %v2128_v27 }
 0x1f0   : > { %966 = vrot.lane.b32.xlu1 %v8925_v62, %s8631_s25  ;;  %7924 = vmatprep.mubr.msk.f32.mxu1 %vm8633_vm1, %v10719_v8 }
 0x1f1   : > { %7927 = vmatprep.subr.mxu1 %v10719_v8 }
 0x1f2   : > { %7925 = vmatmul.mubr.msk.f32.vlgmr.msra.gmra.mrb[28].mxu1 %vm988_vm2, %v9011_v41 }
 0x1f3   : > { %980 = vrot.lane.b32.xlu0 %v8949_v10, %s8631_s25  ;;  %7929 = vmatprep.mubr.msk.f32.mxu1 %vm8633_vm1, %v10719_v8 }
 0x1f4   : > { %970 = vrot.lane.b32.xlu1 %v8935_v3, %s8631_s25 }
 0x1f7   : > { %3880 = vrot.lane.b32.xlu0 %v8919_v61, %s8635_s30  ;;  %v859_v61 = vpop.permute.xlu1 %858 }
 0x1f8   : > { %974 = vrot.lane.b32.xlu1 %v8933_v2, %s8631_s25 }
 0x1fb   : > { %3956 = vrot.lane.b32.xlu0 %v8911_v58, %s8635_s30  ;;  %v9203_v58 = vpop.permute.xlu0 %878 }
 0x1fc   : > { %978 = vrot.lane.b32.xlu1 %v8943_v7, %s8631_s25 }
 0x1ff   : > { %4108 = vrot.lane.b32.xlu0 %v8927_v63, %s8635_s30 }
 0x200   : > { %3804 = vrot.lane.b32.xlu1 %v8915_v59, %s8635_s30  ;;  %v9209_v59 = vpop.permute.xlu0 %874 }
 0x203   : > { %4260 = vrot.lane.b32.xlu0 %v8925_v62, %s8635_s30  ;;  %v865_v62 = vpop.permute.xlu1 %864 }
 0x204   : > { %982 = vrot.lane.b32.xlu1 %v8941_v6, %s8631_s25  ;;  %v9215_v63 = vpop.permute.xlu0 %886 }
 0x207   : > { %4412 = vrot.lane.b32.xlu0 %v8935_v3, %s8635_s30  ;;  %v861_v3 = vpop.permute.xlu1 %860 }
 0x208   : > { %984 = vrot.lane.b32.xlu1 %v8947_v9, %s8631_s25  ;;  %v9219_v32 = vpop.permute.xlu0 %882  ;;  %s7604_s25 = sshll.u32 %s7433_s22, 11  ;;  %s7353_s22 = scalar_lea.sflag [#allocation4], %s8831_s14 }
 0x209   : > { %s10662_s7 = scalar_lea.hbm %s10718_s5, %s7604_s25 }
 0x20b   : > { %4564 = vrot.lane.b32.xlu0 %v8933_v2, %s8635_s30  ;;  %v871_v2 = vpop.permute.xlu1 %870 }
 0x20c   : > { %4032 = vrot.lane.b32.xlu1 %v8917_v60, %s8635_s30 }
 0x20f   : > { %v867_v33 = vpop.permute.xlu1 %866 }
 0x210   : > { %4184 = vrot.lane.b32.xlu1 %v8931_v1, %s8635_s30 }
 0x214   : > { %4336 = vrot.lane.b32.xlu1 %v8929_v0, %s8635_s30  ;;  %v873_v0 = vpop.permute.xlu1 %872 }
 0x218   : > { %4488 = vrot.lane.b32.xlu1 %v8939_v5, %s8635_s30  ;;  %v869_v35 = vpop.permute.xlu1 %868 }
 0x21c   : > { %4640 = vrot.lane.b32.xlu1 %v8937_v4, %s8635_s30  ;;  %v881_v36 = vpop.permute.xlu1 %880 }
 0x220   : > { %v877_v39 = vpop.permute.xlu1 %876 }
 0x221   : > { %v2356_v60 = vpop.permute.xlu0 %2355 }
 0x224   : > { %v889_v41 = vpop.permute.xlu1 %888 }
 0x225   : > { %v2204_v34 = vpop.permute.xlu0 %2203 }
 0x226   : > { %7928 = vmatpush3.xpose.msk.msra.mxu1 %vm988_vm2, %v2204_v34 }
 0x227   : > { %7932 = vmatprep.subr.mxu1 %v10719_v8 }
 0x228   : > { %v885_v47 = vpop.permute.xlu1 %884 }
 0x229   : > { %v2432_v1 = vpop.permute.xlu0 %2431  ;;  %7930 = vmatmul.mubr.msk.f32.vlgmr.msra.gmra.mrb[30].mxu1 %vm988_vm2, %v859_v61 }
 0x22a   : > { %7934 = vmatprep.mubr.msk.f32.mxu1 %vm8633_vm1, %v10719_v8 }
 0x22d   : > { %v2280_v5 = vpop.permute.xlu0 %2279 }
 0x22e   : > { %7933 = vmatpush3.xpose.msk.msra.mxu1 %vm988_vm2, %v2280_v5 }
 0x22f   : > { %7937 = vmatprep.subr.mxu1 %v10719_v8 }
 0x231   : > { %v2660_v4 = vpop.permute.xlu0 %2659  ;;  %7935 = vmatmul.mubr.msk.f32.vlgmr.msra.gmra.mrb[32].mxu1 %vm988_vm2, %v861_v3 }
 0x232   : > { %7938 = vmatpush3.xpose.msk.msra.mxu1 %vm988_vm2, %v2356_v60  ;;  %7939 = vmatprep.mubr.msk.f32.mxu1 %vm8633_vm1, %v10719_v8 }
 0x233   : > { %7942 = vmatprep.subr.mxu1 %v10719_v8 }
 0x235   : > { %v2508_v37 = vpop.permute.xlu0 %2507  ;;  %7940 = vmatmul.mubr.msk.f32.vlgmr.msra.gmra.mrb[34].mxu1 %vm988_vm2, %v863_v31 }
 0x236   : > { %7943 = vmatpush3.xpose.msk.msra.mxu1 %vm988_vm2, %v2432_v1  ;;  %7944 = vmatprep.mubr.msk.f32.mxu1 %vm8633_vm1, %v10719_v8 }
 0x237   : > { %7947 = vmatprep.subr.mxu1 %v10719_v8 }
 0x239   : > { %v2736_v38 = vpop.permute.xlu0 %2735  ;;  %7945 = vmatmul.mubr.msk.f32.vlgmr.msra.gmra.mrb[36].mxu1 %vm988_vm2, %v865_v62 }
 0x23a   : > { %7948 = vmatpush3.xpose.msk.msra.mxu1 %vm988_vm2, %v2508_v37  ;;  %7949 = vmatprep.mubr.msk.f32.mxu1 %vm8633_vm1, %v10719_v8 }
 0x23b   : > { %7952 = vmatprep.subr.mxu1 %v10719_v8 }
 0x23d   : > { %v2584_v40 = vpop.permute.xlu0 %2583  ;;  %7950 = vmatmul.mubr.msk.f32.vlgmr.msra.gmra.mrb[38].mxu1 %vm988_vm2, %v867_v33 }
 0x23e   : > { %7953 = vmatpush3.xpose.msk.msra.mxu1 %vm988_vm2, %v2584_v40  ;;  %7954 = vmatprep.mubr.msk.f32.mxu1 %vm8633_vm1, %v10719_v8 }
 0x23f   : > { %7957 = vmatprep.subr.mxu1 %v10719_v8 }
 0x241   : > { %v9250_v42 = vpop.permute.xlu0 %960  ;;  %7955 = vmatmul.mubr.msk.f32.vlgmr.msra.gmra.mrb[40].mxu1 %vm988_vm2, %v869_v35 }
 0x242   : > { %10729 = vst [vmem:[#allocation6_spill] sm:$0xff] %v9250_v42  ;;  %7958 = vmatpush3.xpose.msk.msra.mxu1 %vm988_vm2, %v2660_v4  ;;  %7959 = vmatprep.mubr.msk.f32.mxu1 %vm8633_vm1, %v10719_v8 }
 0x243   : > { %7962 = vmatprep.subr.mxu1 %v10719_v8 }
 0x245   : > { %v2964_v46 = vpop.permute.xlu0 %2963  ;;  %7960 = vmatmul.mubr.msk.f32.vlgmr.msra.gmra.mrb[42].mxu1 %vm988_vm2, %v871_v2 }
 0x246   : > { %7963 = vmatpush3.xpose.msk.msra.mxu1 %vm988_vm2, %v2736_v38  ;;  %7964 = vmatprep.mubr.msk.f32.mxu1 %vm8633_vm1, %v10719_v8 }
 0x247   : > { %7967 = vmatprep.subr.mxu1 %v10719_v8 }
 0x249   : > { %v2812_v48 = vpop.permute.xlu0 %2811  ;;  %7965 = vmatmul.mubr.msk.f32.vlgmr.msra.gmra.mrb[44].mxu1 %vm988_vm2, %v873_v0 }
 0x24a   : > { %v3040_v49 = vpop.permute.xlu1 %3039  ;;  %7968 = vmatpush3.xpose.msk.msra.mxu1 %vm988_vm2, %v2812_v48  ;;  %7969 = vmatprep.mubr.msk.f32.mxu1 %vm8633_vm1, %v10719_v8 }
 0x24b   : > { %7977 = vmatprep.subr.mxu1 %v10719_v8 }
 0x24d   : > { %v3268_v50 = vpop.permute.xlu0 %3267  ;;  %7970 = vmatmul.mubr.msk.f32.vlgmr.msra.gmra.mrb[46].mxu1 %vm988_vm2, %v9209_v59 }
 0x24e   : > { %v2888_v51 = vpop.permute.xlu1 %2887  ;;  %7978 = vmatpush3.xpose.msk.msra.mxu1 %vm988_vm2, %v2964_v46  ;;  %7979 = vmatprep.mubr.msk.f32.mxu1 %vm8633_vm1, %v10719_v8 }
 0x24f   : > { %7973 = vmatpush3.xpose.msk.msra.mxu0 %vm988_vm2, %v2888_v51  ;;  %7987 = vmatprep.subr.mxu1 %v10719_v8 }
 0x250   : > { %7982 = vmatprep.subr.mxu0 %v10719_v8 }
 0x251   : > { %v3116_v52 = vpop.permute.xlu0 %3115  ;;  %7980 = vmatmul.mubr.msk.f32.vlgmr.msra.gmra.mrb[48].mxu1 %vm988_vm2, %v9203_v58 }
 0x252   : > { %7975 = vmatmul.mubr.msk.f32.vlgmr.msra.gmra.mrb[50].mxu0 %vm988_vm2, %v877_v39  ;;  %7988 = vmatpush3.xpose.msk.msra.mxu1 %vm988_vm2, %v3116_v52 }
 0x253   : > { %7983 = vmatpush3.xpose.msk.msra.mxu0 %vm988_vm2, %v3040_v49  ;;  %7984 = vmatprep.mubr.msk.f32.mxu0 %vm8633_vm1, %v10719_v8 }
 0x254   : > { %7989 = vmatprep.mubr.msk.f32.mxu1 %vm8633_vm1, %v10719_v8  ;;  %7997 = vmatprep.subr.mxu1 %v10719_v8 }
 0x255   : > { %v9285_v53 = vpop.permute.xlu0 %964  ;;  %7990 = vmatmul.mubr.msk.f32.vlgmr.msra.gmra.mrb[50].mxu1 %vm988_vm2, %v9219_v32  ;;  %7992 = vmatprep.subr.mxu0 %v10719_v8 }
 0x256   : > { %10730 = vst [vmem:[#allocation7_spill] sm:$0xff] %v9285_v53  ;;  %7985 = vmatmul.mubr.msk.f32.vlgmr.msra.gmra.mrb[52].mxu0 %vm988_vm2, %v881_v36  ;;  %v3344_v54 = vpop.permute.xlu1 %3343  ;;  %7998 = vmatpush3.xpose.msk.msra.mxu1 %vm988_vm2, %v3268_v50 }
 0x257   : > { %7999 = vmatprep.mubr.msk.f32.mxu1 %vm8633_vm1, %v10719_v8  ;;  %7994 = vmatprep.mubr.msk.f32.mxu0 %vm8633_vm1, %v10719_v8 }
 0x258   : > { %8007 = vmatprep.subr.mxu1 %v10719_v8 }
 0x259   : > { %v9297_v55 = vpop.permute.xlu0 %968  ;;  %8000 = vmatmul.mubr.msk.f32.vlgmr.msra.gmra.mrb[52].mxu1 %vm988_vm2, %v9215_v63 }
 0x25a   : > { %10731 = vst [vmem:[#allocation8_spill] sm:$0xff] %v9297_v55  ;;  %v3192_v56 = vpop.permute.xlu1 %3191  ;;  %8009 = vmatprep.mubr.msk.f32.mxu1 %vm8633_vm1, %v10719_v8 }
 0x25b   : > { %7993 = vmatpush3.xpose.msk.msra.mxu0 %vm988_vm2, %v3192_v56 }
 0x25c   : > { %8002 = vmatprep.subr.mxu0 %v10719_v8 }
 0x25d   : > { %v9305_v57 = vpop.permute.xlu0 %972 }
 0x25e   : > { %10732 = vst [vmem:[#allocation9_spill] sm:$0xff] %v9305_v57  ;;  %7995 = vmatmul.mubr.msk.f32.vlgmr.msra.gmra.mrb[54].mxu0 %vm988_vm2, %v885_v47  ;;  %v9308_v11 = vpop.permute.xlu1 %962 }
 0x25f   : > { %8003 = vmatpush3.xpose.msk.msra.mxu0 %vm988_vm2, %v3344_v54  ;;  %8004 = vmatprep.mubr.msk.f32.mxu0 %vm8633_vm1, %v10719_v8 }
 0x260   : > { %8012 = vmatprep.subr.mxu0 %v10719_v8 }
 0x261   : > { %v9314_v12 = vpop.permute.xlu0 %976 }
 0x262   : > { %10733 = vst [vmem:[#allocation10_spill] sm:$0xff] %v9314_v12  ;;  %8005 = vmatmul.mubr.msk.f32.vlgmr.msra.gmra.mrb[56].mxu0 %vm988_vm2, %v889_v41  ;;  %v9317_v13 = vpop.permute.xlu1 %966 }
 0x263   : > { %8014 = vmatprep.mubr.msk.f32.mxu0 %vm8633_vm1, %v10719_v8 }
 0x265   : > { %v9321_v14 = vpop.permute.xlu0 %980 }
 0x266   : > { %10734 = vst [vmem:[#allocation11_spill] sm:$0xff] %v9321_v14  ;;  %v9323_v15 = vpop.permute.xlu1 %970 }
 0x269   : > { %v3881_v16 = vpop.permute.xlu0 %3880 }
 0x26a   : > { %8013 = vmatpush3.msra.mxu0 %v3881_v16  ;;  %v9325_v17 = vpop.permute.xlu1 %974 }
 0x26b   : > { %8022 = vmatprep.subr.mxu0 %v10719_v8 }
 0x26e   : > { %v9328_v18 = vpop.permute.xlu1 %978 }
 0x26f   : > { %10735 = vst [vmem:[#allocation12_spill] sm:$0xff] %v9328_v18 }
 0x272   : > { %v3805_v19 = vpop.permute.xlu1 %3804 }
 0x273   : > { %8008 = vmatpush3.msra.mxu1 %v3805_v19 }
 0x274   : > { %8017 = vmatprep.subr.mxu1 %v10719_v8 }
 0x289   : > { %v1059_v20 = vpop.f32.mrb[48].mxu0 }
 0x28a   : > { %v9331_v21 = vmul.f32 0.17677669, %v1059_v20  ;;  %v1135_v22 = vpop.f32.mrb[0].mxu1  ;;  %v7851_v24 = vpop.f32.mrb[49].mxu0 }
 0x28b   : > { %v9333_v23 = vmul.f32 0.17677669, %v1135_v22  ;;  %v7856_v25 = vpop.f32.mrb[1].mxu1 }
 0x28c   : > { %v3452_v26 = vsel %vm3451_vm3, %v9331_v21, -inf }
 0x28d   : > { %3453 = vmax.xlane.f32.xlu0 %v3452_v26  ;;  %v3455_v27 = vsel %vm3451_vm3, %v9333_v23, -inf }
 0x28e   : > { %v1211_v28 = vpop.f32.mrb[2].mxu1  ;;  %3456 = vmax.xlane.f32.xlu1 %v3455_v27 }
 0x28f   : > { %v9339_v29 = vmul.f32 0.17677669, %v1211_v28  ;;  %v7861_v30 = vpop.f32.mrb[3].mxu1 }
 0x291   : > { %v3458_v31 = vsel %vm3451_vm3, %v9339_v29, -inf }
 0x292   : > { %v1287_v58 = vpop.f32.mrb[4].mxu1  ;;  %3459 = vmax.xlane.f32.xlu0 %v3458_v31 }
 0x293   : > { %v9343_v61 = vmul.f32 0.17677669, %v1287_v58  ;;  %v7866_v59 = vpop.f32.mrb[5].mxu1 }
 0x295   : > { %v3461_v62 = vsel %vm3451_vm3, %v9343_v61, -inf }
 0x296   : > { %v1363_v63 = vpop.f32.mrb[6].mxu1  ;;  %3462 = vmax.xlane.f32.xlu0 %v3461_v62 }
 0x297   : > { %v9347_v3 = vmul.f32 0.17677669, %v1363_v63  ;;  %v7871_v32 = vpop.f32.mrb[7].mxu1 }
 0x299   : > { %v3464_v2 = vsel %vm3451_vm3, %v9347_v3, -inf }
 0x29a   : > { %v1439_v60 = vpop.f32.mrb[8].mxu1  ;;  %3465 = vmax.xlane.f32.xlu1 %v3464_v2 }
 0x29b   : > { %v9351_v33 = vmul.f32 0.17677669, %v1439_v60  ;;  %v7876_v34 = vpop.f32.mrb[9].mxu1 }
 0x29d   : > { %v3467_v0 = vsel %vm3451_vm3, %v9351_v33, -inf }
 0x29e   : > { %v1515_v1 = vpop.f32.mrb[10].mxu1  ;;  %3468 = vmax.xlane.f32.xlu0 %v3467_v0 }
 0x29f   : > { %v9355_v5 = vmul.f32 0.17677669, %v1515_v1  ;;  %v7881_v35 = vpop.f32.mrb[11].mxu1 }
 0x2a0   : > { %v9395_v35 = vpop.permute.xlu1 %982 }
 0x2a1   : > { %v3470_v4 = vsel %vm3451_vm3, %v9355_v5, -inf  ;;  %10736 = vst [vmem:[#allocation13_spill] sm:$0xff] %v9395_v35 }
 0x2a2   : > { %v1591_v36 = vpop.f32.mrb[12].mxu1  ;;  %3471 = vmax.xlane.f32.xlu1 %v3470_v4 }
 0x2a3   : > { %v9359_v37 = vmul.f32 0.17677669, %v1591_v36  ;;  %v7886_v38 = vpop.f32.mrb[13].mxu1 }
 0x2a5   : > { %v3473_v39 = vsel %vm3451_vm3, %v9359_v37, -inf }
 0x2a6   : > { %v1667_v40 = vpop.f32.mrb[14].mxu1  ;;  %3474 = vmax.xlane.f32.xlu0 %v3473_v39  ;;  %v9399_v39 = vpop.permute.xlu0 %3956 }
 0x2a7   : > { %v9363_v41 = vmul.f32 0.17677669, %v1667_v40  ;;  %v7891_v46 = vpop.f32.mrb[15].mxu1 }
 0x2a8   : > { %v9403_v46 = vpop.permute.xlu1 %984 }
 0x2a9   : > { %v3476_v47 = vsel %vm3451_vm3, %v9363_v41, -inf  ;;  %10737 = vst [vmem:[#allocation14_spill] sm:$0xff] %v9403_v46 }
 0x2aa   : > { %v1743_v48 = vpop.f32.mrb[16].mxu1  ;;  %3477 = vmax.xlane.f32.xlu1 %v3476_v47  ;;  %v9405_v47 = vpop.permute.xlu0 %4108 }
 0x2ab   : > { %v9367_v49 = vmul.f32 0.17677669, %v1743_v48  ;;  %v7896_v50 = vpop.f32.mrb[17].mxu1 }
 0x2ad   : > { %v3479_v51 = vsel %vm3451_vm3, %v9367_v49, -inf }
 0x2ae   : > { %v1819_v52 = vpop.f32.mrb[18].mxu1  ;;  %3480 = vmax.xlane.f32.xlu0 %v3479_v51 }
 0x2af   : > { %v9371_v54 = vmul.f32 0.17677669, %v1819_v52  ;;  %v7901_v56 = vpop.f32.mrb[19].mxu1  ;;  %v9409_v52 = vpop.permute.xlu1 %4032 }
 0x2b1   : > { %v3482_v16 = vsel %vm3451_vm3, %v9371_v54, -inf }
 0x2b2   : > { %v1895_v19 = vpop.f32.mrb[20].mxu1  ;;  %3483 = vmax.xlane.f32.xlu1 %v3482_v16 }
 0x2b3   : > { %v9375_v20 = vmul.f32 0.17677669, %v1895_v19  ;;  %v7906_v22 = vpop.f32.mrb[21].mxu1 }
 0x2b5   : > { %v3485_v24 = vsel %vm3451_vm3, %v9375_v20, -inf }
 0x2b6   : > { %v1971_v25 = vpop.f32.mrb[22].mxu1  ;;  %3486 = vmax.xlane.f32.xlu0 %v3485_v24  ;;  %v9415_v24 = vpop.permute.xlu0 %4260 }
 0x2b7   : > { %v9379_v26 = vmul.f32 0.17677669, %v1971_v25  ;;  %v7911_v27 = vpop.f32.mrb[23].mxu1 }
 0x2b9   : > { %v3488_v28 = vsel %vm3451_vm3, %v9379_v26, -inf }
 0x2ba   : > { %3489 = vmax.xlane.f32.xlu1 %v3488_v28  ;;  %v9419_v28 = vpop.permute.xlu1 %4184 }
 0x2bd   : > { %v2047_v30 = vpop.f32.mrb[24].mxu1 }
 0x2be   : > { %v9383_v31 = vmul.f32 0.17677669, %v2047_v30  ;;  %v7916_v58 = vpop.f32.mrb[25].mxu1 }
 0x2c0   : > { %v3491_v59 = vsel %vm3451_vm3, %v9383_v31, -inf }
 0x2c1   : > { %v2123_v62 = vpop.f32.mrb[26].mxu1  ;;  %3492 = vmax.xlane.f32.xlu0 %v3491_v59 }
 0x2c2   : > { %v9387_v63 = vmul.f32 0.17677669, %v2123_v62  ;;  %v7921_v32 = vpop.f32.mrb[27].mxu1  ;;  %v9425_v62 = vpop.permute.xlu0 %4412 }
 0x2c4   : > { %v3494_v2 = vsel %vm3451_vm3, %v9387_v63, -inf }
 0x2c5   : > { %3495 = vmax.xlane.f32.xlu1 %v3494_v2  ;;  %v2199_v60 = vpop.f32.mrb[28].mxu1 }
 0x2c6   : > { %v9391_v34 = vmul.f32 0.17677669, %v2199_v60  ;;  %v7926_v0 = vpop.f32.mrb[29].mxu1 }
 0x2c7   : > { %v9429_v0 = vpop.permute.xlu1 %4336 }
 0x2c8   : > { %v3497_v1 = vsel %vm3451_vm3, %v9391_v34, -inf }
 0x2c9   : > { %3498 = vmax.xlane.f32.xlu0 %v3497_v1 }
 0x2fc   : > { %v2275_v4 = vpop.f32.mrb[30].mxu1 }
 0x2fd   : > { %v9397_v36 = vmul.f32 0.17677669, %v2275_v4  ;;  %v7931_v38 = vpop.f32.mrb[31].mxu1 }
 0x2ff   : > { %v3500_v40 = vsel %vm3451_vm3, %v9397_v36, -inf }
 0x300   : > { %3501 = vmax.xlane.f32.xlu1 %v3500_v40  ;;  %v9433_v40 = vpop.permute.xlu0 %4564 }
 0x304   : > { %v2351_v48 = vpop.f32.mrb[32].mxu1 }
 0x305   : > { %v9407_v50 = vmul.f32 0.17677669, %v2351_v48  ;;  %v7936_v51 = vpop.f32.mrb[33].mxu1 }
 0x306   : > { %v9435_v51 = vpop.permute.xlu1 %4488 }
 0x307   : > { %v3503_v56 = vsel %vm3451_vm3, %v9407_v50, -inf }
 0x308   : > { %v2427_v16 = vpop.f32.mrb[34].mxu1  ;;  %3504 = vmax.xlane.f32.xlu0 %v3503_v56 }
 0x309   : > { %v9413_v19 = vmul.f32 0.17677669, %v2427_v16  ;;  %v7941_v22 = vpop.f32.mrb[35].mxu1 }
 0x30b   : > { %v3506_v25 = vsel %vm3451_vm3, %v9413_v19, -inf }
 0x30c   : > { %3507 = vmax.xlane.f32.xlu1 %v3506_v25  ;;  %v2503_v27 = vpop.f32.mrb[36].mxu1 }
 0x30d   : > { %v9421_v30 = vmul.f32 0.17677669, %v2503_v27  ;;  %v7946_v58 = vpop.f32.mrb[37].mxu1 }
 0x30f   : > { %v3509_v59 = vsel %vm3451_vm3, %v9421_v30, -inf }
 0x310   : > { %v2579_v32 = vpop.f32.mrb[38].mxu1  ;;  %3510 = vmax.xlane.f32.xlu0 %v3509_v59 }
 0x311   : > { %v9427_v2 = vmul.f32 0.17677669, %v2579_v32  ;;  %v7951_v60 = vpop.f32.mrb[39].mxu1 }
 0x312   : > { %v9444_v60 = vpop.permute.xlu1 %4640 }
 0x313   : > { %v3512_v1 = vsel %vm3451_vm3, %v9427_v2, -inf }
 0x314   : > { %3513 = vmax.xlane.f32.xlu1 %v3512_v1  ;;  %v2655_v4 = vpop.f32.mrb[40].mxu1 }
 0x315   : > { %v7956_v38 = vpop.f32.mrb[41].mxu1 }
 0x318   : > { %v2731_v48 = vpop.f32.mrb[42].mxu1 }
 0x319   : > { %v9437_v56 = vmul.f32 0.17677669, %v2731_v48  ;;  %v7961_v16 = vpop.f32.mrb[43].mxu1 }
 0x31a   : > { %v3454_v22 = vpop.xlane.xlu0 %3453 }
 0x31b   : > { %v3548_v25 = vsub.f32 %v9331_v21, %v3454_v22  ;;  %v3518_v27 = vsel %vm3451_vm3, %v9437_v56, -inf  ;;  %v3457_v46 = vpop.xlane.xlu1 %3456 }
 0x31c   : > { %3519 = vmax.xlane.f32.xlu1 %v3518_v27  ;;  %v9442_v58 = vpop.f32.mrb[44].mxu1  ;;  %v3549_v55 = vsub.f32 %v9333_v23, %v3457_v46 }
 0x31d   : > { %v7966_v59 = vpop.f32.mrb[45].mxu1  ;;  %v3580_v32 = vmul.f32 1.442695, %v3548_v25 }
 0x31f   : > { %v3460_v1 = vpop.xlane.xlu0 %3459  ;;  %8359 = vpow2.f32 %v3580_v32 }
 0x320   : > { %v2883_v38 = vpop.f32.mrb[46].mxu1  ;;  %v3550_v16 = vsub.f32 %v9339_v29, %v3460_v1 }
 0x321   : > { %v9446_v8 = vmul.f32 0.17677669, %v2883_v38  ;;  %v7971_v48 = vpop.f32.mrb[47].mxu1 }
 0x322   : > { %v3584_v59 = vmul.f32 1.442695, %v3550_v16  ;;  %v9457_v48 = vmul.f32 0.17677669, %v2655_v4 }
 0x323   : > { %v3524_v21 = vsel %vm3451_vm3, %v9446_v8, -inf }
 0x324   : > { %3525 = vmax.xlane.f32.xlu1 %v3524_v21  ;;  %v3035_v22 = vpop.f32.mrb[48].mxu1  ;;  %8361 = vpow2.f32 %v3584_v59  ;;  %v3582_v59 = vmul.f32 1.442695, %v3549_v55 }
 0x325   : > { %v2959_v27 = vpop.f32.mrb[50].mxu0  ;;  %v9451_v14 = vmul.f32 0.17677669, %v3035_v22  ;;  %v7981_v25 = vpop.f32.mrb[49].mxu1 }
 0x326   : > { %v9453_v12 = vmul.f32 0.17677669, %v2959_v27  ;;  %v7976_v57 = vpop.f32.mrb[51].mxu0 }
 0x327   : > { %v3466_v38 = vpop.xlane.xlu1 %3465  ;;  %v3530_v32 = vsel %vm3451_vm3, %v9451_v14, -inf }
 0x328   : > { %v3552_v29 = vsub.f32 %v9347_v3, %v3466_v38  ;;  %3531 = vmax.xlane.f32.xlu1 %v3530_v32  ;;  %v3187_v1 = vpop.f32.mrb[50].mxu1  ;;  %v3527_v21 = vsel %vm3451_vm3, %v9453_v12, -inf  ;;  %v3463_v3 = vpop.xlane.xlu0 %3462 }
 0x329   : > { %v9462_v22 = vmul.f32 0.17677669, %v3187_v1  ;;  %3528 = vmax.xlane.f32.xlu0 %v3527_v21  ;;  %v3111_v16 = vpop.f32.mrb[52].mxu0  ;;  %v7991_v27 = vpop.f32.mrb[51].mxu1  ;;  %v3515_v1 = vsel %vm3451_vm3, %v9457_v48, -inf }
 0x32a   : > { %v3588_v57 = vmul.f32 1.442695, %v3552_v29  ;;  %v7986_v25 = vpop.f32.mrb[53].mxu0  ;;  %v9467_v53 = vpop.eup %8359  ;;  %v9469_v38 = vmul.f32 0.17677669, %v3111_v16  ;;  %v3551_v29 = vsub.f32 %v9343_v61, %v3463_v3 }
 0x32b   : > { %v3536_v4 = vsel %vm3451_vm3, %v9462_v22, -inf  ;;  %v3644_v27 = vsel %vm3451_vm3, %v9467_v53, 0.0 }
 0x32c   : > { %3537 = vmax.xlane.f32.xlu1 %v3536_v4  ;;  %v3339_v32 = vpop.f32.mrb[52].mxu1  ;;  %8363 = vpow2.f32 %v3588_v57  ;;  %v3469_v25 = vpop.xlane.xlu0 %3468  ;;  %v3533_v4 = vsel %vm3451_vm3, %v9469_v38, -inf  ;;  %v3586_v61 = vmul.f32 1.442695, %v3551_v29 }
 0x32d   : > { %3516 = vmax.xlane.f32.xlu0 %v3515_v1  ;;  %v8001_v21 = vpop.f32.mrb[53].mxu1  ;;  %v9474_v23 = vmul.f32 0.17677669, %v3339_v32  ;;  %8365 = vpow2.f32 %v3582_v59  ;;  %v3553_v3 = vsub.f32 %v9351_v33, %v3469_v25 }
 0x32e   : > { %v9486_v35 = vpop.eup %8361 }
 0x32f   : > { %v3472_v46 = vpop.xlane.xlu1 %3471  ;;  %v3542_v32 = vsel %vm3451_vm3, %v9474_v23, -inf  ;;  %v3590_v29 = vmul.f32 1.442695, %v3553_v3 }
 0x330   : > { %v3554_v16 = vsub.f32 %v9355_v5, %v3472_v46  ;;  %3645 = vadd.xlane.f32.xlu1 %v3644_v27  ;;  %v9489_v5 = vmul.f32 0.17677669, %v9442_v58 }
 0x331   : > { %3534 = vmax.xlane.f32.xlu0 %v3533_v4  ;;  %v3263_v1 = vpop.f32.mrb[54].mxu0  ;;  %v3650_v4 = vsel %vm3451_vm3, %v9486_v35, 0.0 }
 0x332   : > { %v3592_v21 = vmul.f32 1.442695, %v3554_v16  ;;  %v9481_v57 = vmul.f32 0.17677669, %v3263_v1  ;;  %v7996_v55 = vpop.f32.mrb[55].mxu0 }
 0x333   : > { %v3475_v46 = vpop.xlane.xlu0 %3474  ;;  %v3521_v55 = vsel %vm3451_vm3, %v9489_v5, -inf }
 0x334   : > { %8367 = vpow2.f32 %v3592_v21  ;;  %3543 = vmax.xlane.f32.xlu1 %v3542_v32  ;;  %v3539_v27 = vsel %vm3451_vm3, %v9481_v57, -inf  ;;  %v3555_v33 = vsub.f32 %v9359_v37, %v3475_v46 }
 0x335   : > { %3540 = vmax.xlane.f32.xlu0 %v3539_v27  ;;  %v3415_v16 = vpop.f32.mrb[56].mxu0  ;;  %8369 = vpow2.f32 %v3586_v61 }
 0x336   : > { %v8006_v59 = vpop.f32.mrb[57].mxu0  ;;  %v9496_v1 = vpop.eup %8363  ;;  %v9498_v58 = vmul.f32 0.17677669, %v3415_v16  ;;  %8371 = vpow2.f32 %v3590_v29  ;;  %v3594_v61 = vmul.f32 1.442695, %v3555_v33 }
 0x337   : > { %v3478_v25 = vpop.xlane.xlu1 %3477  ;;  %v3656_v37 = vsel %vm3451_vm3, %v9496_v1, 0.0 }
 0x338   : > { %v3556_v21 = vsub.f32 %v9363_v41, %v3478_v25  ;;  %3651 = vadd.xlane.f32.xlu1 %v3650_v4  ;;  %v3545_v27 = vsel %vm3451_vm3, %v9498_v58, -inf  ;;  %v9508_v41 = vpop.eup %8365 }
 0x339   : > { %3522 = vmax.xlane.f32.xlu0 %v3521_v55 }
 0x33a   : > { %v3596_v32 = vmul.f32 1.442695, %v3556_v21 }
 0x33b   : > { %v3481_v3 = vpop.xlane.xlu0 %3480 }
 0x33c   : > { %8373 = vpow2.f32 %v3596_v32  ;;  %v3557_v46 = vsub.f32 %v9367_v49, %v3481_v3  ;;  %3657 = vadd.xlane.f32.xlu1 %v3656_v37  ;;  %v3647_v49 = vsel %vm3451_vm3, %v9508_v41, 0.0 }
 0x33d   : > { %3546 = vmax.xlane.f32.xlu0 %v3545_v27  ;;  %8375 = vpow2.f32 %v3594_v61 }
 0x33e   : > { %v9510_v16 = vpop.eup %8367  ;;  %v3598_v59 = vmul.f32 1.442695, %v3557_v46 }
 0x33f   : > { %v3484_v29 = vpop.xlane.xlu1 %3483  ;;  %v3662_v33 = vsel %vm3451_vm3, %v9510_v16, 0.0  ;;  %v9517_v4 = vpop.eup %8369 }
 0x340   : > { %v3558_v25 = vsub.f32 %v9371_v54, %v3484_v29  ;;  %3663 = vadd.xlane.f32.xlu1 %v3662_v33  ;;  %8377 = vpow2.f32 %v3598_v59  ;;  %v3653_v61 = vsel %vm3451_vm3, %v9517_v4, 0.0  ;;  %v9522_v3 = vpop.eup %8371 }
 0x341   : > { %3648 = vadd.xlane.f32.xlu0 %v3647_v49 }
 0x342   : > { %v3600_v21 = vmul.f32 1.442695, %v3558_v25 }
 0x343   : > { %v3487_v55 = vpop.xlane.xlu0 %3486 }
 0x344   : > { %8379 = vpow2.f32 %v3600_v21  ;;  %v3559_v32 = vsub.f32 %v9375_v20, %v3487_v55  ;;  %v3659_v20 = vsel %vm3451_vm3, %v9522_v3, 0.0 }
 0x345   : > { %3654 = vadd.xlane.f32.xlu0 %v3653_v61 }
 0x346   : > { %v9524_v54 = vpop.eup %8373  ;;  %v3602_v37 = vmul.f32 1.442695, %v3559_v32 }
 0x347   : > { %v3490_v46 = vpop.xlane.xlu1 %3489  ;;  %v3668_v27 = vsel %vm3451_vm3, %v9524_v54, 0.0  ;;  %v9531_v29 = vpop.eup %8375 }
 0x348   : > { %8381 = vpow2.f32 %v3602_v37  ;;  %v3560_v59 = vsub.f32 %v9379_v26, %v3490_v46  ;;  %3669 = vadd.xlane.f32.xlu1 %v3668_v27  ;;  %v3665_v25 = vsel %vm3451_vm3, %v9531_v29, 0.0 }
 0x349   : > { %3660 = vadd.xlane.f32.xlu0 %v3659_v20 }
 0x34a   : > { %v3604_v33 = vmul.f32 1.442695, %v3560_v59  ;;  %v9535_v49 = vpop.eup %8377 }
 0x34b   : > { %v3671_v61 = vsel %vm3451_vm3, %v9535_v49, 0.0 }
 0x34c   : > { %8383 = vpow2.f32 %v3604_v33 }
 0x34d   : > { %3666 = vadd.xlane.f32.xlu0 %v3665_v25 }
 0x34e   : > { %v9537_v21 = vpop.eup %8379  ;;  %v3493_v55 = vpop.xlane.xlu0 %3492 }
 0x34f   : > { %v3561_v26 = vsub.f32 %v9383_v31, %v3493_v55  ;;  %v3674_v32 = vsel %vm3451_vm3, %v9537_v21, 0.0 }
 0x350   : > { %3675 = vadd.xlane.f32.xlu1 %v3674_v32 }
 0x351   : > { %v3606_v37 = vmul.f32 1.442695, %v3561_v26  ;;  %3672 = vadd.xlane.f32.xlu0 %v3671_v61 }
 0x352   : > { %v9544_v46 = vpop.eup %8381  ;;  %v3496_v27 = vpop.xlane.xlu1 %3495 }
 0x353   : > { %8385 = vpow2.f32 %v3606_v37  ;;  %v3562_v59 = vsub.f32 %v9387_v63, %v3496_v27  ;;  %v3677_v20 = vsel %vm3451_vm3, %v9544_v46, 0.0 }
 0x355   : > { %v3608_v33 = vmul.f32 1.442695, %v3562_v59  ;;  %3678 = vadd.xlane.f32.xlu0 %v3677_v20 }
 0x356   : > { %v9549_v31 = vpop.eup %8383  ;;  %v3499_v25 = vpop.xlane.xlu0 %3498 }
 0x357   : > { %8387 = vpow2.f32 %v3608_v33  ;;  %v3563_v55 = vsub.f32 %v9391_v34, %v3499_v25  ;;  %v3680_v26 = vsel %vm3451_vm3, %v9549_v31, 0.0 }
 0x358   : > { %3681 = vadd.xlane.f32.xlu1 %v3680_v26 }
 0x359   : > { %v3610_v32 = vmul.f32 1.442695, %v3563_v55 }
 0x35b   : > { %8389 = vpow2.f32 %v3610_v32 }
 0x35d   : > { %v9554_v61 = vpop.eup %8385 }
 0x35e   : > { %v3683_v63 = vsel %vm3451_vm3, %v9554_v61, 0.0 }
 0x35f   : > { %3684 = vadd.xlane.f32.xlu0 %v3683_v63 }
 0x361   : > { %v9558_v37 = vpop.eup %8387 }
 0x362   : > { %10738 = vst [vmem:[#allocation15_spill] sm:$0xff] %v9558_v37  ;;  %v3686_v27 = vsel %vm3451_vm3, %v9558_v37, 0.0 }
 0x363   : > { %3687 = vadd.xlane.f32.xlu0 %v3686_v27 }
 0x365   : > { %v9562_v59 = vpop.eup %8389 }
 0x366   : > { %v3689_v34 = vsel %vm3451_vm3, %v9562_v59, 0.0 }
 0x367   : > { %3690 = vadd.xlane.f32.xlu1 %v3689_v34 }
 0x38d   : > { %v3502_v20 = vpop.xlane.xlu1 %3501 }
 0x38e   : > { %v3564_v33 = vsub.f32 %v9397_v36, %v3502_v20 }
 0x390   : > { %v3612_v25 = vmul.f32 1.442695, %v3564_v33 }
 0x392   : > { %8391 = vpow2.f32 %v3612_v25 }
 0x395   : > { %v3505_v55 = vpop.xlane.xlu0 %3504 }
 0x396   : > { %v3565_v26 = vsub.f32 %v9407_v50, %v3505_v55 }
 0x398   : > { %v3614_v32 = vmul.f32 1.442695, %v3565_v26 }
 0x399   : > { %v3508_v63 = vpop.xlane.xlu1 %3507 }
 0x39a   : > { %8393 = vpow2.f32 %v3614_v32  ;;  %v3566_v42 = vsub.f32 %v9413_v19, %v3508_v63 }
 0x39c   : > { %v9569_v27 = vpop.eup %8391  ;;  %v3616_v18 = vmul.f32 1.442695, %v3566_v42 }
 0x39d   : > { %v3511_v37 = vpop.xlane.xlu0 %3510  ;;  %v3692_v34 = vsel %vm3451_vm3, %v9569_v27, 0.0 }
 0x39e   : > { %8395 = vpow2.f32 %v3616_v18  ;;  %v3567_v36 = vsub.f32 %v9421_v30, %v3511_v37  ;;  %3693 = vadd.xlane.f32.xlu0 %v3692_v34 }
 0x3a0   : > { %v3618_v20 = vmul.f32 1.442695, %v3567_v36 }
 0x3a1   : > { %v3514_v33 = vpop.xlane.xlu1 %3513 }
 0x3a2   : > { %8397 = vpow2.f32 %v3618_v20  ;;  %v3568_v50 = vsub.f32 %v9427_v2, %v3514_v33 }
 0x3a4   : > { %v9575_v25 = vpop.eup %8393  ;;  %v3620_v55 = vmul.f32 1.442695, %v3568_v50 }
 0x3a5   : > { %v3695_v19 = vsel %vm3451_vm3, %v9575_v25, 0.0 }
 0x3a6   : > { %8399 = vpow2.f32 %v3620_v55  ;;  %3696 = vadd.xlane.f32.xlu1 %v3695_v19 }
 0x3a8   : > { %v9579_v42 = vpop.eup %8395 }
 0x3a9   : > { %10739 = vst [vmem:[#allocation16_spill] sm:$0xff] %v9579_v42  ;;  %v3520_v26 = vpop.xlane.xlu1 %3519  ;;  %v3698_v18 = vsel %vm3451_vm3, %v9579_v42, 0.0 }
 0x3aa   : > { %v3570_v30 = vsub.f32 %v9437_v56, %v3520_v26  ;;  %3699 = vadd.xlane.f32.xlu0 %v3698_v18 }
 0x3ac   : > { %v9584_v37 = vpop.eup %8397  ;;  %v3624_v2 = vmul.f32 1.442695, %v3570_v30 }
 0x3ad   : > { %10740 = vst [vmem:[#allocation17_spill] sm:$0xff] %v9584_v37  ;;  %v3701_v32 = vsel %vm3451_vm3, %v9584_v37, 0.0 }
 0x3ae   : > { %8401 = vpow2.f32 %v3624_v2  ;;  %3702 = vadd.xlane.f32.xlu1 %v3701_v32 }
 0x3b0   : > { %v9588_v63 = vpop.eup %8399 }
 0x3b1   : > { %10741 = vst [vmem:[#allocation18_spill] sm:$0xff] %v9588_v63  ;;  %v3526_v34 = vpop.xlane.xlu1 %3525  ;;  %v3704_v36 = vsel %vm3451_vm3, %v9588_v63, 0.0 }
 0x3b2   : > { %v3572_v20 = vsub.f32 %v9446_v8, %v3526_v34  ;;  %3705 = vadd.xlane.f32.xlu0 %v3704_v36 }
 0x3b4   : > { %v3628_v33 = vmul.f32 1.442695, %v3572_v20 }
 0x3b5   : > { %v9593_v56 = vpop.xlane.xlu1 %3531 }
 0x3b6   : > { %8403 = vpow2.f32 %v3628_v33  ;;  %v3529_v50 = vpop.xlane.xlu0 %3528 }
 0x3b8   : > { %v9595_v55 = vpop.eup %8401 }
 0x3b9   : > { %10742 = vst [vmem:[#allocation19_spill] sm:$0xff] %v9595_v55  ;;  %v9597_v19 = vpop.xlane.xlu1 %3537  ;;  %v3710_v26 = vsel %vm3451_vm3, %v9595_v55, 0.0 }
 0x3ba   : > { %v3517_v18 = vpop.xlane.xlu0 %3516  ;;  %3711 = vadd.xlane.f32.xlu0 %v3710_v26  ;;  %v3573_v26 = vsub.f32 %v9453_v12, %v3529_v50  ;;  %v10744_v50 = vmov 0.0  }
 0x3bb   : > { %v3569_v30 = vsub.f32 %v9457_v48, %v3517_v18 }
 0x3bd   : > { %v3622_v2 = vmul.f32 1.442695, %v3569_v30  ;;  %v3646_v32 = vpop.xlane.xlu1 %3645 }
 0x3be   : > { %v9602_v8 = vpop.xlane.xlu0 %3534 }
 0x3bf   : > { %8405 = vpow2.f32 %v3622_v2  ;;  %v3630_v2 = vmul.f32 1.442695, %v3573_v26 }
 0x3c0   : > { %v9604_v34 = vpop.eup %8403  ;;  %8407 = vrcp.f32 %v3646_v32 }
 0x3c1   : > { %10743 = vst [vmem:[#allocation20_spill] sm:$0xff] %v9604_v34  ;;  %v9606_v36 = vpop.xlane.xlu1 %3543  ;;  %v3716_v20 = vsel %vm3451_vm3, %v9604_v34, 0.0 }
 0x3c2   : > { %v9610_v33 = vpop.xlane.xlu0 %3540  ;;  %3717 = vadd.xlane.f32.xlu0 %v3716_v20 }
 0x3c5   : > { %v3652_v37 = vpop.xlane.xlu1 %3651 }
 0x3c6   : > { %v3523_v48 = vpop.xlane.xlu0 %3522  ;;  %8409 = vrcp.f32 %v3652_v37 }
 0x3c7   : > { %v3571_v18 = vsub.f32 %v9489_v5, %v3523_v48 }
 0x3c9   : > { %v9614_v30 = vpop.eup %8405  ;;  %v3626_v55 = vmul.f32 1.442695, %v3571_v18  ;;  %v3658_v32 = vpop.xlane.xlu1 %3657 }
 0x3ca   : > { %v8408_v63 = vpop.eup %8407  ;;  %8411 = vrcp.f32 %v3658_v32  ;;  %v3707_v34 = vsel %vm3451_vm3, %v9614_v30, 0.0  ;;  %v9618_v42 = vpop.xlane.xlu0 %3546 }
 0x3cb   : > { %8413 = vpow2.f32 %v3626_v55  ;;  %3708 = vadd.xlane.f32.xlu1 %v3707_v34  ;;  %v3772_v12 = vmul.f32 %v8408_v63, %v9467_v53 }
 0x3cc   : > { %8415 = vpow2.f32 %v3630_v2 }
 0x3cd   : > { %8010 = vmatmul.mubr.msk.f32.vlgmr.msra.gmra.mrb[54].mxu1 %vm3451_vm3, %v3772_v12  ;;  %v3664_v5 = vpop.xlane.xlu1 %3663 }
 0x3ce   : > { %8018 = vmatpush3.msra.mxu1 %v9399_v39  ;;  %8417 = vrcp.f32 %v3664_v5  ;;  %v3649_v37 = vpop.xlane.xlu0 %3648  ;;  %8019 = vmatprep.mubr.msk.f32.mxu1 %vm8633_vm1, %v10744_v50 }
 0x3cf   : > { %8027 = vmatprep.subr.mxu1 %v10744_v50  ;;  %8419 = vrcp.f32 %v3649_v37 }
 0x3d0   : > { %v8410_v20 = vpop.eup %8409 }
 0x3d1   : > { %v3774_v55 = vmul.f32 %v8410_v20, %v9486_v35 }
 0x3d2   : > { %v3655_v26 = vpop.xlane.xlu0 %3654 }
 0x3d3   : > { %8421 = vrcp.f32 %v3655_v26  ;;  %8020 = vmatmul.mubr.msk.f32.vlgmr.msra.gmra.mrb[56].mxu1 %vm3451_vm3, %v3774_v55 }
 0x3d4   : > { %v8412_v53 = vpop.eup %8411  ;;  %8028 = vmatpush3.msra.mxu1 %v9405_v47  ;;  %8029 = vmatprep.mubr.msk.f32.mxu1 %vm8633_vm1, %v10744_v50 }
 0x3d5   : > { %v9627_v63 = vpop.eup %8413  ;;  %v3670_v34 = vpop.xlane.xlu1 %3669  ;;  %v3776_v39 = vmul.f32 %v8412_v53, %v9496_v1  ;;  %8037 = vmatprep.subr.mxu1 %v10744_v50  ;;  %v3576_v53 = vsub.f32 %v9462_v22, %v9597_v19 }
 0x3d6   : > { %8423 = vrcp.f32 %v3670_v34  ;;  %v3661_v48 = vpop.xlane.xlu0 %3660  ;;  %v3713_v18 = vsel %vm3451_vm3, %v9627_v63, 0.0  ;;  %v9636_v2 = vpop.eup %8415 }
 0x3d7   : > { %8425 = vrcp.f32 %v3661_v48  ;;  %3714 = vadd.xlane.f32.xlu1 %v3713_v18  ;;  %8030 = vmatmul.mubr.msk.f32.vlgmr.msra.gmra.mrb[58].mxu1 %vm3451_vm3, %v3776_v39  ;;  %v3719_v12 = vsel %vm3451_vm3, %v9636_v2, 0.0  ;;  %v3636_v34 = vmul.f32 1.442695, %v3576_v53  ;;  %v10754_v53 = vld [vmem:[#allocation14_spill] sm:$0xff] }
 0x3d8   : > { %v8418_v35 = vpop.eup %8417  ;;  %4716 = vrot.lane.b32.xlu0 %v8943_v7, %s8635_s30  ;;  %8038 = vmatpush3.msra.mxu1 %v9415_v24 }
 0x3d9   : > { %v3778_v47 = vmul.f32 %v8418_v35, %v9510_v16  ;;  %v8420_v1 = vpop.eup %8419  ;;  %8039 = vmatprep.mubr.msk.f32.mxu1 %vm8633_vm1, %v10744_v50  ;;  %8047 = vmatprep.subr.mxu1 %v10744_v50 }
 0x3da   : > { %v3667_v32 = vpop.xlane.xlu0 %3666  ;;  %v3773_v7 = vmul.f32 %v8420_v1, %v9508_v41 }
 0x3db   : > { %8427 = vrcp.f32 %v3667_v32  ;;  %3720 = vadd.xlane.f32.xlu1 %v3719_v12  ;;  %8040 = vmatmul.mubr.msk.f32.vlgmr.msra.gmra.mrb[60].mxu1 %vm3451_vm3, %v3778_v47 }
 0x3dc   : > { %8015 = vmatmul.mubr.msk.f32.vlgmr.msra.gmra.mrb[58].mxu0 %vm3451_vm3, %v3773_v7  ;;  %8048 = vmatpush3.msra.mxu1 %v9425_v62 }
 0x3dd   : > { %v8422_v5 = vpop.eup %8421  ;;  %v3676_v16 = vpop.xlane.xlu1 %3675  ;;  %8023 = vmatpush3.msra.mxu0 %v9409_v52  ;;  %8024 = vmatprep.mubr.msk.f32.mxu0 %vm8633_vm1, %v10744_v50  ;;  %v3574_v52 = vsub.f32 %v9451_v14, %v9593_v56 }
 0x3de   : > { %8429 = vrcp.f32 %v3676_v16  ;;  %v3673_v24 = vpop.xlane.xlu0 %3672  ;;  %v3775_v37 = vmul.f32 %v8422_v5, %v9517_v4  ;;  %8032 = vmatprep.subr.mxu0 %v10744_v50  ;;  %8049 = vmatprep.mubr.msk.f32.mxu1 %vm8633_vm1, %v10744_v50 }
 0x3df   : > { %8431 = vrcp.f32 %v3673_v24  ;;  %8057 = vmatprep.subr.mxu1 %v10744_v50 }
 0x3e0   : > { %v8424_v41 = vpop.eup %8423  ;;  %8025 = vmatmul.mubr.msk.f32.vlgmr.msra.gmra.mrb[60].mxu0 %vm3451_vm3, %v3775_v37 }
 0x3e1   : > { %v8426_v20 = vpop.eup %8425  ;;  %v3780_v62 = vmul.f32 %v8424_v41, %v9524_v54  ;;  %8033 = vmatpush3.msra.mxu0 %v9419_v28  ;;  %8034 = vmatprep.mubr.msk.f32.mxu0 %vm8633_vm1, %v10744_v50  ;;  %v3632_v54 = vmul.f32 1.442695, %v3574_v52  ;;  %v3579_v41 = vsub.f32 %v9498_v58, %v9618_v42 }
 0x3e2   : > { %v3679_v4 = vpop.xlane.xlu0 %3678  ;;  %v3777_v26 = vmul.f32 %v8426_v20, %v9522_v3  ;;  %8042 = vmatprep.subr.mxu0 %v10744_v50 }
 0x3e3   : > { %8433 = vrcp.f32 %v3679_v4  ;;  %8050 = vmatmul.mubr.msk.f32.vlgmr.msra.gmra.mrb[62].mxu1 %vm3451_vm3, %v3780_v62  ;;  %v3642_v20 = vmul.f32 1.442695, %v3579_v41 }
 0x3e4   : > { %8058 = vmatpush3.msra.mxu1 %v9433_v40  ;;  %8059 = vmatprep.mubr.msk.f32.mxu1 %vm8633_vm1, %v10744_v50  ;;  %8435 = vpow2.f32 %v3632_v54  ;;  %v10745_v54 = vld [vmem:[#allocation15_spill] sm:$0xff] }
 0x3e5   : > { %v8428_v14 = vpop.eup %8427  ;;  %8035 = vmatmul.mubr.msk.f32.vlgmr.msra.gmra.mrb[62].mxu0 %vm3451_vm3, %v3777_v26  ;;  %8067 = vmatprep.subr.mxu1 %v10744_v50 }
 0x3e6   : > { %8043 = vmatpush3.msra.mxu0 %v9429_v0  ;;  %8044 = vmatprep.mubr.msk.f32.mxu0 %vm8633_vm1, %v10744_v50  ;;  %v3779_v28 = vmul.f32 %v8428_v14, %v9531_v29 }
 0x3e7   : > { %8052 = vmatprep.subr.mxu0 %v10744_v50 }
 0x3e8   : > { %v8430_v3 = vpop.eup %8429 }
 0x3e9   : > { %v8432_v40 = vpop.eup %8431  ;;  %8045 = vmatmul.mubr.msk.f32.vlgmr.msra.gmra.mrb[64].mxu0 %vm3451_vm3, %v3779_v28  ;;  %v3782_v56 = vmul.f32 %v8430_v3, %v9537_v21  ;;  %v10750_v3 = vld [vmem:[#allocation8_spill] sm:$0xff] }
 0x3ea   : > { %8053 = vmatpush3.msra.mxu0 %v9435_v51  ;;  %8054 = vmatprep.mubr.msk.f32.mxu0 %vm8633_vm1, %v10744_v50  ;;  %v3781_v0 = vmul.f32 %v8432_v40, %v9535_v49  ;;  %v10751_v40 = vld [vmem:[#allocation9_spill] sm:$0xff] }
 0x3eb   : > { %8060 = vmatmul.mubr.msk.f32.vlgmr.msra.gmra.mrb[64].mxu1 %vm3451_vm3, %v3782_v56  ;;  %8062 = vmatprep.subr.mxu0 %v10744_v50  ;;  %v10752_v56 = vld [vmem:[#allocation10_spill] sm:$0xff] }
 0x3ec   : > { %4792 = vrot.lane.b32.xlu1 %v8949_v10, %s8635_s30  ;;  %8069 = vmatprep.mubr.msk.f32.mxu1 %vm8633_vm1, %v10744_v50  ;;  %v3685_v48 = vpop.xlane.xlu0 %3684 }
 0x3ed   : > { %v8434_v29 = vpop.eup %8433  ;;  %8055 = vmatmul.mubr.msk.f32.vlgmr.msra.gmra.mrb[66].mxu0 %vm3451_vm3, %v3781_v0 }
 0x3ee   : > { %8063 = vmatpush3.msra.mxu0 %v9444_v60  ;;  %8064 = vmatprep.mubr.msk.f32.mxu0 %vm8633_vm1, %v10744_v50  ;;  %v3783_v51 = vmul.f32 %v8434_v29, %v9544_v46  ;;  %v9702_v10 = vpop.eup %8435  ;;  %v3575_v60 = vsub.f32 %v9469_v38, %v9602_v8 }
 0x3ef   : > { %8072 = vmatprep.subr.mxu0 %v10744_v50  ;;  %v3722_v49 = vsel %vm3451_vm3, %v9702_v10, 0.0 }
 0x3f0   : > { %v3634_v21 = vmul.f32 1.442695, %v3575_v60  ;;  %v3688_v18 = vpop.xlane.xlu0 %3687 }
 0x3f1   : > { %8065 = vmatmul.mubr.msk.f32.vlgmr.msra.gmra.mrb[68].mxu0 %vm3451_vm3, %v3783_v51  ;;  %v10753_v51 = vld [vmem:[#allocation11_spill] sm:$0xff] }
 0x3f2   : > { %8074 = vmatprep.mubr.msk.f32.mxu0 %vm8633_vm1, %v10744_v50  ;;  %8437 = vpow2.f32 %v3634_v21 }
 0x3f3   : > { %8439 = vpow2.f32 %v3636_v34 }
 0x3f7   : > { %3723 = vadd.xlane.f32.xlu0 %v3722_v49 }
 0x3fc   : > { %v9708_v55 = vpop.eup %8437 }
 0x3fd   : > { %v3725_v46 = vsel %vm3451_vm3, %v9708_v55, 0.0  ;;  %v9718_v38 = vpop.eup %8439 }
 0x3fe   : > { %v3728_v8 = vsel %vm3451_vm3, %v9718_v38, 0.0 }
 0x40d   : > { %4868 = vrot.lane.b32.xlu0 %v8941_v6, %s8635_s30  ;;  %v3577_v6 = vsub.f32 %v9481_v57, %v9610_v33  ;;  %v3578_v33 = vsub.f32 %v9474_v23, %v9606_v36 }
 0x40f   : > { %v3638_v39 = vmul.f32 1.442695, %v3577_v6  ;;  %v3640_v32 = vmul.f32 1.442695, %v3578_v33 }
 0x410   : > { %3726 = vadd.xlane.f32.xlu1 %v3725_v46 }
 0x411   : > { %8441 = vpow2.f32 %v3638_v39 }
 0x41b   : > { %v9726_v22 = vpop.eup %8441 }
 0x41c   : > { %v3731_v47 = vsel %vm3451_vm3, %v9726_v22, 0.0 }
 0x421   : > { %4944 = vrot.lane.b32.xlu1 %v8947_v9, %s8635_s30  ;;  %v3682_v9 = vpop.xlane.xlu1 %3681 }
 0x422   : > { %8443 = vrcp.f32 %v3682_v9 }
 0x423   : > { %8445 = vpow2.f32 %v3640_v32 }
 0x424   : > { %8447 = vrcp.f32 %v3685_v48 }
 0x425   : > { %v3691_v16 = vpop.xlane.xlu1 %3690  ;;  %8449 = vpow2.f32 %v3642_v20 }
 0x426   : > { %8451 = vrcp.f32 %v3688_v18 }
 0x427   : > { %8453 = vrcp.f32 %v3691_v16 }
 0x42b   : > { %v9724_v35 = vpop.xlane.xlu0 %3693 }
 0x42c   : > { %3729 = vadd.xlane.f32.xlu0 %v3728_v8  ;;  %v8444_v7 = vpop.eup %8443  ;;  %8455 = vrcp.f32 %v9724_v35 }
 0x42d   : > { %v3784_v5 = vmul.f32 %v8444_v7, %v9549_v31  ;;  %v9753_v24 = vpop.eup %8445 }
 0x42e   : > { %v3734_v37 = vsel %vm3451_vm3, %v9753_v24, 0.0  ;;  %v8448_v62 = vpop.eup %8447 }
 0x42f   : > { %v3785_v26 = vmul.f32 %v8448_v62, %v9554_v61  ;;  %v9770_v14 = vpop.eup %8449 }
 0x430   : > { %v3737_v58 = vsel %vm3451_vm3, %v9770_v14, 0.0  ;;  %v8452_v42 = vpop.eup %8451 }
 0x431   : > { %v3786_v28 = vmul.f32 %v8452_v42, %v10745_v54  ;;  %v8454_v29 = vpop.eup %8453 }
 0x432   : > { %v3787_v46 = vmul.f32 %v8454_v29, %v9562_v59  ;;  %v10757_v29 = vld [vmem:[#allocation19_spill] sm:$0xff] }
 0x433   : > { %v9749_v23 = vpop.xlane.xlu1 %3696 }
 0x434   : > { %8457 = vrcp.f32 %v9749_v23 }
 0x437   : > { %v9730_v19 = vpop.xlane.xlu0 %3699 }
 0x438   : > { %8459 = vrcp.f32 %v9730_v19 }
 0x43b   : > { %v9751_v36 = vpop.xlane.xlu1 %3702 }
 0x43f   : > { %v9734_v57 = vpop.xlane.xlu0 %3705 }
 0x440   : > { %8461 = vrcp.f32 %v9734_v57  ;;  %v10756_v57 = vld [vmem:[#allocation18_spill] sm:$0xff] }
 0x442   : > { %5020 = vrot.lane.b32.xlu0 %v9050_v44, %s8635_s30 }
 0x445   : > { %3732 = vadd.xlane.f32.xlu1 %v3731_v47 }
 0x447   : > { %v9738_v1 = vpop.xlane.xlu0 %3711 }
 0x448   : > { %8463 = vrcp.f32 %v9738_v1 }
 0x44f   : > { %v9740_v12 = vpop.xlane.xlu0 %3717 }
 0x450   : > { %8465 = vrcp.f32 %v9740_v12 }
 0x453   : > { %v4717_v44 = vpop.permute.xlu0 %4716 }
 0x454   : > { %8068 = vmatpush3.msra.mxu1 %v4717_v44 }
 0x455   : > { %8070 = vmatmul.mubr.msk.f32.vlgmr.msra.gmra.mrb[66].mxu1 %vm3451_vm3, %v3784_v5  ;;  %8077 = vmatprep.subr.mxu1 %v10744_v50 }
 0x456   : > { %5096 = vrot.lane.b32.xlu1 %v9052_v45, %s8635_s30  ;;  %8079 = vmatprep.mubr.msk.f32.mxu1 %vm8633_vm1, %v10744_v50 }
 0x458   : > { %v9755_v31 = vpop.xlane.xlu1 %3708 }
 0x461   : > { %3735 = vadd.xlane.f32.xlu0 %v3734_v37  ;;  %v8456_v37 = vpop.eup %8455 }
 0x462   : > { %v3788_v62 = vmul.f32 %v8456_v37, %v9569_v27 }
 0x464   : > { %v9761_v45 = vpop.xlane.xlu1 %3714 }
 0x468   : > { %v9763_v52 = vpop.xlane.xlu1 %3720 }
 0x46c   : > { %v4793_v4 = vpop.permute.xlu1 %4792 }
 0x46d   : > { %8073 = vmatpush3.msra.mxu0 %v4793_v4 }
 0x46e   : > { %8075 = vmatmul.mubr.msk.f32.vlgmr.msra.gmra.mrb[70].mxu0 %vm3451_vm3, %v3785_v26  ;;  %8082 = vmatprep.subr.mxu0 %v10744_v50 }
 0x46f   : > { %8084 = vmatprep.mubr.msk.f32.mxu0 %vm8633_vm1, %v10744_v50 }
 0x477   : > { %5172 = vrot.lane.b32.xlu0 %v9044_v43, %s8635_s30 }
 0x47a   : > { %3738 = vadd.xlane.f32.xlu1 %v3737_v58 }
 0x47b   : > { %5324 = vrot.lane.b32.xlu0 %v9308_v11, %s8635_s30  ;;  %v10746_v11 = vld [vmem:[#allocation12_spill] sm:$0xff] }
 0x47f   : > { %5476 = vrot.lane.b32.xlu0 %v9317_v13, %s8635_s30  ;;  %v10747_v13 = vld [vmem:[#allocation6_spill] sm:$0xff] }
 0x483   : > { %5628 = vrot.lane.b32.xlu0 %v9323_v15, %s8635_s30  ;;  %v10748_v15 = vld [vmem:[#allocation13_spill] sm:$0xff] }
 0x484   : > { %v9782_v61 = vpop.xlane.xlu0 %3723 }
 0x485   : > { %8467 = vrcp.f32 %v9782_v61 }
 0x487   : > { %5780 = vrot.lane.b32.xlu0 %v9325_v17, %s8635_s30  ;;  %v10749_v17 = vld [vmem:[#allocation7_spill] sm:$0xff] }
 0x488   : > { %v4869_v43 = vpop.permute.xlu0 %4868 }
 0x489   : > { %8078 = vmatpush3.msra.mxu1 %v4869_v43 }
 0x48a   : > { %8080 = vmatmul.mubr.msk.f32.vlgmr.msra.gmra.mrb[68].mxu1 %vm3451_vm3, %v3786_v28  ;;  %8087 = vmatprep.subr.mxu1 %v10744_v50  ;;  %v8458_v28 = vpop.eup %8457 }
 0x48b   : > { %5932 = vrot.lane.b32.xlu0 %v10746_v11, %s8635_s30  ;;  %5248 = vrot.lane.b32.xlu1 %v10747_v13, %s8635_s30  ;;  %v3789_v13 = vmul.f32 %v8458_v28, %v9575_v25  ;;  %v10755_v25 = vld [vmem:[#allocation16_spill] sm:$0xff] }
 0x48c   : > { %8089 = vmatprep.mubr.msk.f32.mxu1 %vm8633_vm1, %v10744_v50 }
 0x48f   : > { %6084 = vrot.lane.b32.xlu0 %v10748_v15, %s8635_s30  ;;  %5400 = vrot.lane.b32.xlu1 %v10749_v17, %s8635_s30  ;;  %v8460_v15 = vpop.eup %8459 }
 0x493   : > { %5552 = vrot.lane.b32.xlu1 %v10750_v3, %s8635_s30  ;;  %v3790_v3 = vmul.f32 %v8460_v15, %v10755_v25  ;;  %v8347_v25 = vld [vmem:[%s10714_s1] sm:$0xff]  }
 0x494   : > { %6342 = vrot.lane.b32.xlu0 %v8347_v25, %s8636_s8 }
 0x497   : > { %5704 = vrot.lane.b32.xlu1 %v10751_v40, %s8635_s30  ;;  %v8462_v40 = vpop.eup %8461 }
 0x498   : > { %v3792_v1 = vmul.f32 %v8462_v40, %v10756_v57 }
 0x49b   : > { %5856 = vrot.lane.b32.xlu1 %v10752_v56, %s8635_s30  ;;  %v8464_v56 = vpop.eup %8463 }
 0x49c   : > { %v8466_v61 = vpop.eup %8465 }
 0x49d   : > { %v9805_v0 = vpop.xlane.xlu1 %3726 }
 0x49f   : > { %6008 = vrot.lane.b32.xlu1 %v10753_v51, %s8635_s30  ;;  %v3794_v51 = vmul.f32 %v8464_v56, %v10757_v29 }
 0x4a0   : > { %v9809_v49 = vpop.f32.mrb[54].mxu1 }
 0x4a1   : > { %v8011_v60 = vpop.f32.mrb[55].mxu1  ;;  %v4945_v21 = vpop.permute.xlu1 %4944 }
 0x4a2   : > { %8083 = vmatpush3.msra.mxu0 %v4945_v21  ;;  %v10758_v21 = vld [vmem:[#allocation20_spill] sm:$0xff] }
 0x4a3   : > { %6160 = vrot.lane.b32.xlu1 %v10754_v53, %s8635_s30  ;;  %8085 = vmatmul.mubr.msk.f32.vlgmr.msra.gmra.mrb[72].mxu0 %vm3451_vm3, %v3787_v46  ;;  %v3796_v46 = vmul.f32 %v8466_v61, %v10758_v21  ;;  %v8468_v53 = vpop.eup %8467 }
 0x4a4   : > { %8092 = vmatprep.subr.mxu0 %v10744_v50  ;;  %8094 = vmatprep.mubr.msk.f32.mxu0 %vm8633_vm1, %v10744_v50 }
 0x4a6   : > { %v9818_v34 = vpop.f32.mrb[56].mxu1 }
 0x4a7   : > { %v8021_v8 = vpop.f32.mrb[57].mxu1 }
 0x4aa   : > { %v9820_v6 = vpop.f32.mrb[58].mxu1 }
 0x4ab   : > { %v8031_v39 = vpop.f32.mrb[59].mxu1 }
 0x4ac   : > { %v3798_v39 = vmul.f32 %v8468_v53, %v9702_v10 }
 0x4ae   : > { %v9823_v59 = vpop.f32.mrb[60].mxu1 }
 0x4af   : > { %v9825_v48 = vpop.f32.mrb[58].mxu0  ;;  %v8041_v18 = vpop.f32.mrb[61].mxu1 }
 0x4b0   : > { %v8016_v9 = vpop.f32.mrb[59].mxu0 }
 0x4b3   : > { %v9827_v47 = vpop.f32.mrb[60].mxu0 }
 0x4b4   : > { %v8026_v33 = vpop.f32.mrb[61].mxu0 }
 0x4b6   : > { %v9829_v32 = vpop.f32.mrb[62].mxu1 }
 0x4b7   : > { %v8051_v7 = vpop.f32.mrb[63].mxu1 }
 0x4b8   : > { %v9831_v44 = vpop.f32.mrb[62].mxu0 }
 0x4b9   : > { %v8036_v5 = vpop.f32.mrb[63].mxu0  ;;  %v3730_v16 = vpop.xlane.xlu0 %3729 }
 0x4ba   : > { %8469 = vrcp.f32 %v3730_v16 }
 0x4bc   : > { %v9833_v41 = vpop.f32.mrb[64].mxu0 }
 0x4bd   : > { %v8046_v35 = vpop.f32.mrb[65].mxu0  ;;  %v5021_v20 = vpop.permute.xlu0 %5020 }
 0x4be   : > { %v9836_v4 = vpop.f32.mrb[64].mxu1  ;;  %8088 = vmatpush3.msra.mxu1 %v5021_v20 }
 0x4bf   : > { %v8061_v26 = vpop.f32.mrb[65].mxu1  ;;  %8090 = vmatmul.mubr.msk.f32.vlgmr.msra.gmra.mrb[70].mxu1 %vm3451_vm3, %v3788_v62  ;;  %8097 = vmatprep.subr.mxu1 %v10744_v50 }
 0x4c0   : > { %v9840_v58 = vpop.f32.mrb[66].mxu0  ;;  %8099 = vmatprep.mubr.msk.f32.mxu1 %vm8633_vm1, %v10744_v50 }
 0x4c1   : > { %v8056_v42 = vpop.f32.mrb[67].mxu0 }
 0x4c4   : > { %v9844_v43 = vpop.f32.mrb[68].mxu0  ;;  %v8470_v18 = vpop.eup %8469 }
 0x4c5   : > { %v8066_v54 = vpop.f32.mrb[69].mxu0 }
 0x4d2   : > { %v9847_v27 = vpop.xlane.xlu1 %3732 }
 0x4d6   : > { %v5097_v11 = vpop.permute.xlu1 %5096 }
 0x4d7   : > { %8093 = vmatpush3.msra.mxu0 %v5097_v11 }
 0x4d8   : > { %8095 = vmatmul.mubr.msk.f32.vlgmr.msra.gmra.mrb[74].mxu0 %vm3451_vm3, %v3789_v13  ;;  %8102 = vmatprep.subr.mxu0 %v10744_v50 }
 0x4d9   : > { %8104 = vmatprep.mubr.msk.f32.mxu0 %vm8633_vm1, %v10744_v50 }
 0x4ee   : > { %v3736_v23 = vpop.xlane.xlu0 %3735 }
 0x4ef   : > { %8471 = vrcp.f32 %v3736_v23 }
 0x4f0   : > { %8473 = vrcp.f32 %v9751_v36  ;;  %v3800_v36 = vmul.f32 %v8470_v18, %v9718_v38  ;;  %v10759_v38 = vld [vmem:[#allocation17_spill] sm:$0xff] }
 0x4f1   : > { %8475 = vrcp.f32 %v9755_v31 }
 0x4f2   : > { %v5173_v17 = vpop.permute.xlu0 %5172  ;;  %8477 = vrcp.f32 %v9761_v45 }
 0x4f3   : > { %8098 = vmatpush3.msra.mxu1 %v5173_v17  ;;  %8479 = vrcp.f32 %v9763_v52 }
 0x4f4   : > { %8100 = vmatmul.mubr.msk.f32.vlgmr.msra.gmra.mrb[72].mxu1 %vm3451_vm3, %v3790_v3  ;;  %8107 = vmatprep.subr.mxu1 %v10744_v50  ;;  %8481 = vrcp.f32 %v9805_v0 }
 0x4f5   : > { %8109 = vmatprep.mubr.msk.f32.mxu1 %vm8633_vm1, %v10744_v50  ;;  %8483 = vrcp.f32 %v9847_v27 }
 0x4f6   : > { %v5325_v19 = vpop.permute.xlu0 %5324 }
 0x4f7   : > { %8108 = vmatpush3.msra.mxu1 %v5325_v19 }
 0x4f8   : > { %8110 = vmatmul.mubr.msk.f32.vlgmr.msra.gmra.mrb[74].mxu1 %vm3451_vm3, %v3792_v1  ;;  %8117 = vmatprep.subr.mxu1 %v10744_v50 }
 0x4f9   : > { %8119 = vmatprep.mubr.msk.f32.mxu1 %vm8633_vm1, %v10744_v50  ;;  %v8472_v33 = vpop.eup %8471 }
 0x4fa   : > { %v5477_v12 = vpop.permute.xlu0 %5476  ;;  %v8474_v31 = vpop.eup %8473  ;;  %v3802_v10 = vmul.f32 %v8472_v33, %v9753_v24 }
 0x4fb   : > { %8118 = vmatpush3.msra.mxu1 %v5477_v12  ;;  %v3791_v16 = vmul.f32 %v8474_v31, %v10759_v38  ;;  %v8476_v37 = vpop.eup %8475 }
 0x4fc   : > { %8120 = vmatmul.mubr.msk.f32.vlgmr.msra.gmra.mrb[76].mxu1 %vm3451_vm3, %v3794_v51  ;;  %8127 = vmatprep.subr.mxu1 %v10744_v50  ;;  %v3793_v24 = vmul.f32 %v8476_v37, %v9614_v30  ;;  %v8478_v35 = vpop.eup %8477 }
 0x4fd   : > { %8129 = vmatprep.mubr.msk.f32.mxu1 %vm8633_vm1, %v10744_v50  ;;  %v3795_v0 = vmul.f32 %v8478_v35, %v9627_v63  ;;  %v8480_v62 = vpop.eup %8479 }
 0x4fe   : > { %v5629_v60 = vpop.permute.xlu0 %5628  ;;  %v3797_v26 = vmul.f32 %v8480_v62, %v9636_v2  ;;  %v8482_v42 = vpop.eup %8481 }
 0x4ff   : > { %8128 = vmatpush3.msra.mxu1 %v5629_v60  ;;  %v3799_v63 = vmul.f32 %v8482_v42, %v9708_v55  ;;  %v8484_v27 = vpop.eup %8483 }
 0x500   : > { %8130 = vmatmul.mubr.msk.f32.vlgmr.msra.gmra.mrb[78].mxu1 %vm3451_vm3, %v3796_v46  ;;  %8137 = vmatprep.subr.mxu1 %v10744_v50  ;;  %v3801_v2 = vmul.f32 %v8484_v27, %v9726_v22 }
 0x501   : > { %8139 = vmatprep.mubr.msk.f32.mxu1 %vm8633_vm1, %v10744_v50 }
 0x502   : > { %v5781_v8 = vpop.permute.xlu0 %5780 }
 0x503   : > { %8138 = vmatpush3.msra.mxu1 %v5781_v8 }
 0x504   : > { %8140 = vmatmul.mubr.msk.f32.vlgmr.msra.gmra.mrb[80].mxu1 %vm3451_vm3, %v3798_v39  ;;  %8147 = vmatprep.subr.mxu1 %v10744_v50 }
 0x505   : > { %8149 = vmatprep.mubr.msk.f32.mxu1 %vm8633_vm1, %v10744_v50 }
 0x506   : > { %v5933_v9 = vpop.permute.xlu0 %5932 }
 0x507   : > { %v3739_v7 = vpop.xlane.xlu1 %3738  ;;  %8148 = vmatpush3.msra.mxu1 %v5933_v9 }
 0x508   : > { %8150 = vmatmul.mubr.msk.f32.vlgmr.msra.gmra.mrb[82].mxu1 %vm3451_vm3, %v3800_v36  ;;  %8157 = vmatprep.subr.mxu1 %v10744_v50  ;;  %8485 = vrcp.f32 %v3739_v7 }
 0x509   : > { %8159 = vmatprep.mubr.msk.f32.mxu1 %vm8633_vm1, %v10744_v50 }
 0x50a   : > { %v6085_v5 = vpop.permute.xlu0 %6084 }
 0x50b   : > { %v5249_v45 = vpop.permute.xlu1 %5248  ;;  %8158 = vmatpush3.msra.mxu1 %v6085_v5 }
 0x50c   : > { %8103 = vmatpush3.msra.mxu0 %v5249_v45  ;;  %8160 = vmatmul.mubr.msk.f32.vlgmr.msra.gmra.mrb[84].mxu1 %vm3451_vm3, %v3802_v10 }
 0x50d   : > { %8105 = vmatmul.mubr.msk.f32.vlgmr.msra.gmra.mrb[76].mxu0 %vm3451_vm3, %v3791_v16  ;;  %8112 = vmatprep.subr.mxu0 %v10744_v50 }
 0x50e   : > { %8114 = vmatprep.mubr.msk.f32.mxu0 %vm8633_vm1, %v10744_v50  ;;  %v6343_v8 = vpop.permute.xlu0 %6342 }
 0x50f   : > { %v5401_v52 = vpop.permute.xlu1 %5400  ;;  %8167 = vmatprep.subr.bf16.mxu1 %v6343_v8 }
 0x510   : > { %8113 = vmatpush3.msra.mxu0 %v5401_v52  ;;  %8168 = vmatpush3.bf16.msra.mxu1 %v6343_v8 }
 0x511   : > { %8115 = vmatmul.mubr.msk.f32.vlgmr.msra.gmra.mrb[78].mxu0 %vm3451_vm3, %v3793_v24  ;;  %8122 = vmatprep.subr.mxu0 %v10744_v50 }
 0x512   : > { %8124 = vmatprep.mubr.msk.f32.mxu0 %vm8633_vm1, %v10744_v50  ;;  %v8486_v11 = vpop.eup %8485 }
 0x513   : > { %v5553_v20 = vpop.permute.xlu1 %5552  ;;  %v3803_v55 = vmul.f32 %v8486_v11, %v9770_v14 }
 0x514   : > { %8123 = vmatpush3.msra.mxu0 %v5553_v20 }
 0x515   : > { %8125 = vmatmul.mubr.msk.f32.vlgmr.msra.gmra.mrb[80].mxu0 %vm3451_vm3, %v3795_v0  ;;  %8132 = vmatprep.subr.mxu0 %v10744_v50 }
 0x516   : > { %8134 = vmatprep.mubr.msk.f32.mxu0 %vm8633_vm1, %v10744_v50 }
 0x517   : > { %v5705_v30 = vpop.permute.xlu1 %5704 }
 0x518   : > { %8133 = vmatpush3.msra.mxu0 %v5705_v30 }
 0x519   : > { %8135 = vmatmul.mubr.msk.f32.vlgmr.msra.gmra.mrb[82].mxu0 %vm3451_vm3, %v3797_v26  ;;  %8142 = vmatprep.subr.mxu0 %v10744_v50 }
 0x51a   : > { %8144 = vmatprep.mubr.msk.f32.mxu0 %vm8633_vm1, %v10744_v50 }
 0x51b   : > { %v5857_v54 = vpop.permute.xlu1 %5856 }
 0x51c   : > { %8143 = vmatpush3.msra.mxu0 %v5857_v54 }
 0x51d   : > { %8145 = vmatmul.mubr.msk.f32.vlgmr.msra.gmra.mrb[84].mxu0 %vm3451_vm3, %v3799_v63  ;;  %8152 = vmatprep.subr.mxu0 %v10744_v50 }
 0x51e   : > { %8154 = vmatprep.mubr.msk.f32.mxu0 %vm8633_vm1, %v10744_v50 }
 0x51f   : > { %v6009_v28 = vpop.permute.xlu1 %6008 }
 0x520   : > { %8153 = vmatpush3.msra.mxu0 %v6009_v28 }
 0x521   : > { %8155 = vmatmul.mubr.msk.f32.vlgmr.msra.gmra.mrb[86].mxu0 %vm3451_vm3, %v3801_v2  ;;  %8162 = vmatprep.subr.mxu0 %v10744_v50 }
 0x522   : > { %8164 = vmatprep.mubr.msk.f32.mxu0 %vm8633_vm1, %v10744_v50  ;;  %v8348_v50 = vld [vmem:[%s10714_s1 + $0x8] sm:$0xff]  }
 0x523   : > { %v6161_v13 = vpop.permute.xlu1 %6160  ;;  %6344 = vrot.lane.b32.xlu0 %v8348_v50, %s8636_s8 }
 0x524   : > { %8163 = vmatpush3.msra.mxu0 %v6161_v13 }
 0x525   : > { %8165 = vmatmul.mubr.msk.f32.vlgmr.msra.gmra.mrb[88].mxu0 %vm3451_vm3, %v3803_v55 }
 0x528   : > { %v9929_v23 = vpop.f32.mrb[66].mxu1 }
 0x529   : > { %v8071_v15 = vpop.f32.mrb[67].mxu1 }
 0x541   : > { %v9931_v22 = vpop.f32.mrb[70].mxu0 }
 0x542   : > { %v8076_v17 = vpop.f32.mrb[71].mxu0 }
 0x55d   : > { %v9936_v3 = vpop.f32.mrb[68].mxu1 }
 0x55e   : > { %v8081_v40 = vpop.f32.mrb[69].mxu1 }
 0x576   : > { %v9941_v14 = vpop.f32.mrb[72].mxu0 }
 0x577   : > { %v8086_v19 = vpop.f32.mrb[73].mxu0 }
 0x592   : > { %v5092_v57 = vpop.f32.mrb[70].mxu1 }
 0x593   : > { %v8091_v1 = vpop.f32.mrb[71].mxu1 }
 0x595   : > { %v6345_v36 = vpop.permute.xlu0 %6344 }
 0x596   : > { %8169 = vmatprep.subr.bf16.mxu1 %v6345_v36 }
 0x597   : > { %8170 = vmatpush3.bf16.msra.mxu1 %v6345_v36 }
 0x5ab   : > { %v5168_v56 = vpop.f32.mrb[74].mxu0 }
 0x5ac   : > { %v8305_v12 = vpack.i.bf16 %v5168_v56, %v5092_v57  ;;  %v8096_v29 = vpop.f32.mrb[75].mxu0 }
 0x5ae   : > { %8306 = vrot.lane.b32.xlu1 %v8305_v12, %s8637_s11 }
 0x5c7   : > { %v5244_v51 = vpop.f32.mrb[72].mxu1 }
 0x5c8   : > { %v8101_v61 = vpop.f32.mrb[73].mxu1 }
 0x5cb   : > { %v5396_v60 = vpop.f32.mrb[74].mxu1 }
 0x5cc   : > { %v8111_v21 = vpop.f32.mrb[75].mxu1 }
 0x5cf   : > { %v5548_v46 = vpop.f32.mrb[76].mxu1 }
 0x5d0   : > { %v8121_v53 = vpop.f32.mrb[77].mxu1 }
 0x5d3   : > { %v5700_v39 = vpop.f32.mrb[78].mxu1 }
 0x5d4   : > { %v8131_v18 = vpop.f32.mrb[79].mxu1 }
 0x5d7   : > { %v5852_v9 = vpop.f32.mrb[80].mxu1 }
 0x5d8   : > { %v8141_v33 = vpop.f32.mrb[81].mxu1 }
 0x5db   : > { %v6004_v7 = vpop.f32.mrb[82].mxu1 }
 0x5dc   : > { %v8151_v31 = vpop.f32.mrb[83].mxu1 }
 0x5df   : > { %v6156_v10 = vpop.f32.mrb[84].mxu1 }
 0x5e0   : > { %v5320_v5 = vpop.f32.mrb[76].mxu0  ;;  %v8161_v45 = vpop.f32.mrb[85].mxu1 }
 0x5e1   : > { %v8310_v38 = vpack.i.bf16 %v5320_v5, %v5244_v51  ;;  %v8106_v16 = vpop.f32.mrb[77].mxu0 }
 0x5e3   : > { %8311 = vrot.lane.b32.xlu1 %v8310_v38, %s8637_s11 }
 0x5e4   : > { %v5472_v37 = vpop.f32.mrb[78].mxu0 }
 0x5e5   : > { %v8315_v52 = vpack.i.bf16 %v5472_v37, %v5396_v60  ;;  %v8116_v24 = vpop.f32.mrb[79].mxu0 }
 0x5e7   : > { %8316 = vrot.lane.b32.xlu0 %v8315_v52, %s8637_s11 }
 0x5e8   : > { %v5624_v35 = vpop.f32.mrb[80].mxu0 }
 0x5e9   : > { %v8320_v20 = vpack.i.bf16 %v5624_v35, %v5548_v46  ;;  %v8126_v0 = vpop.f32.mrb[81].mxu0 }
 0x5eb   : > { %8321 = vrot.lane.b32.xlu1 %v8320_v20, %s8637_s11 }
 0x5ec   : > { %v5776_v62 = vpop.f32.mrb[82].mxu0 }
 0x5ed   : > { %v8325_v30 = vpack.i.bf16 %v5776_v62, %v5700_v39  ;;  %v8136_v26 = vpop.f32.mrb[83].mxu0 }
 0x5ef   : > { %8326 = vrot.lane.b32.xlu0 %v8325_v30, %s8637_s11 }
 0x5f0   : > { %v5928_v42 = vpop.f32.mrb[84].mxu0 }
 0x5f1   : > { %v8330_v63 = vpack.i.bf16 %v5928_v42, %v5852_v9  ;;  %v8146_v54 = vpop.f32.mrb[85].mxu0 }
 0x5f3   : > { %8331 = vrot.lane.b32.xlu1 %v8330_v63, %s8637_s11  ;;  %v8551_v63 = vld [vmem:[%s8837_s23 + $0x100] sm:$0xff] }
 0x5f4   : > { %v6080_v27 = vpop.f32.mrb[86].mxu0 }
 0x5f5   : > { %v8335_v2 = vpack.i.bf16 %v6080_v27, %v6004_v7  ;;  %v8156_v28 = vpop.f32.mrb[87].mxu0  ;;  %v8552_v27 = vld [vmem:[%s8837_s23 + $0x110] sm:$0xff] }
 0x5f7   : > { %8336 = vrot.lane.b32.xlu0 %v8335_v2, %s8637_s11 }
 0x5f8   : > { %v6232_v11 = vpop.f32.mrb[88].mxu0 }
 0x5f9   : > { %v8340_v55 = vpack.i.bf16 %v6232_v11, %v6156_v10  ;;  %v8166_v13 = vpop.f32.mrb[89].mxu0  ;;  %v8553_v11 = vld [vmem:[%s8837_s23 + $0x108] sm:$0xff] }
 0x5fb   : > { %8341 = vrot.lane.b32.xlu1 %v8340_v55, %s8637_s11  ;;  %s8573_s11 = scalar_lea.vmem %s8572_s10, 4096 }
 0x620   : > { %v8307_v15 = vpop.permute.xlu1 %8306 }
 0x621   : > { %v8309_v17 = vunpack.i.h.bf16 %v8307_v15  ;;  %v8308_v25 = vunpack.i.l.bf16 %v8307_v15 }
 0x623   : > { %v6301_v40 = vsel %vm988_vm2, %v9825_v48, %v8309_v17  ;;  %v6300_v50 = vsel %vm988_vm2, %v9809_v49, %v8308_v25 }
 0x624   : > { %v6320_v19 = vpack.c.bf16 %v6301_v40, %v6300_v50  ;;  %v8554_v40 = vld [vmem:[%s8837_s23 + $0x118] sm:$0xff] }
 0x626   : > { %8171 = vmatprep.mubr.msk.bf16.mxu1 %vm537_vm0, %v6320_v19 }
 0x655   : > { %v8312_v57 = vpop.permute.xlu1 %8311 }
 0x656   : > { %v8314_v1 = vunpack.i.h.bf16 %v8312_v57  ;;  %v8313_v56 = vunpack.i.l.bf16 %v8312_v57 }
 0x658   : > { %v6303_v12 = vsel %vm988_vm2, %v9827_v47, %v8314_v1  ;;  %v6302_v29 = vsel %vm988_vm2, %v9818_v34, %v8313_v56 }
 0x659   : > { %v6321_v51 = vpack.c.bf16 %v6303_v12, %v6302_v29  ;;  %v8317_v61 = vpop.permute.xlu0 %8316  ;;  %v8555_v29 = vld [vmem:[%s8837_s23 + $0x120] sm:$0xff] }
 0x65a   : > { %v8319_v60 = vunpack.i.h.bf16 %v8317_v61  ;;  %v8318_v21 = vunpack.i.l.bf16 %v8317_v61 }
 0x65b   : > { %8172 = vmatmul.mubr.msk.bf16.vlgmr.msra.gmra.mrb[88].mxu1 %vm537_vm0, %v6321_v51 }
 0x65c   : > { %v6305_v49 = vsel %vm988_vm2, %v9831_v44, %v8319_v60  ;;  %v6304_v48 = vsel %vm988_vm2, %v9820_v6, %v8318_v21  ;;  %v8556_v21 = vld [vmem:[%s8837_s23 + $0x130] sm:$0xff] }
 0x65d   : > { %v6322_v46 = vpack.c.bf16 %v6305_v49, %v6304_v48  ;;  %v8322_v53 = vpop.permute.xlu1 %8321  ;;  %v8557_v48 = vld [vmem:[%s8837_s23 + $0x128] sm:$0xff] }
 0x65e   : > { %v8324_v8 = vunpack.i.h.bf16 %v8322_v53  ;;  %v8323_v39 = vunpack.i.l.bf16 %v8322_v53 }
 0x65f   : > { %8175 = vmatprep.mubr.msk.bf16.mxu1 %vm537_vm0, %v6322_v46 }
 0x660   : > { %v6307_v34 = vsel %vm988_vm2, %v9833_v41, %v8324_v8  ;;  %v6306_v47 = vsel %vm988_vm2, %v9823_v59, %v8323_v39 }
 0x661   : > { %v6323_v18 = vpack.c.bf16 %v6307_v34, %v6306_v47  ;;  %v8327_v36 = vpop.permute.xlu0 %8326  ;;  %v8558_v34 = vld [vmem:[%s8837_s23 + $0x138] sm:$0xff] }
 0x662   : > { %v8329_v9 = vunpack.i.h.bf16 %v8327_v36  ;;  %v8328_v33 = vunpack.i.l.bf16 %v8327_v36 }
 0x663   : > { %8176 = vmatmul.mubr.msk.bf16.gmra.mrb[92].mxu1 %vm537_vm0, %v6323_v18 }
 0x664   : > { %v6309_v6 = vsel %vm988_vm2, %v9840_v58, %v8329_v9  ;;  %v6308_v44 = vsel %vm988_vm2, %v9829_v32, %v8328_v33 }
 0x665   : > { %v6324_v7 = vpack.c.bf16 %v6309_v6, %v6308_v44  ;;  %v8332_v31 = vpop.permute.xlu1 %8331 }
 0x666   : > { %v8334_v10 = vunpack.i.h.bf16 %v8332_v31  ;;  %v8333_v5 = vunpack.i.l.bf16 %v8332_v31  ;;  %v8559_v31 = vld [vmem:[%s8837_s23 + $0x140] sm:$0xff] }
 0x667   : > { %8179 = vmatprep.mubr.msk.bf16.mxu1 %vm537_vm0, %v6324_v7 }
 0x668   : > { %v6311_v59 = vsel %vm988_vm2, %v9844_v43, %v8334_v10  ;;  %v6310_v41 = vsel %vm988_vm2, %v9836_v4, %v8333_v5 }
 0x669   : > { %v6325_v45 = vpack.c.bf16 %v6311_v59, %v6310_v41  ;;  %v8337_v38 = vpop.permute.xlu0 %8336  ;;  %v8560_v41 = vld [vmem:[%s8837_s23 + $0x150] sm:$0xff] }
 0x66a   : > { %v8339_v16 = vunpack.i.h.bf16 %v8337_v38  ;;  %v8338_v37 = vunpack.i.l.bf16 %v8337_v38  ;;  %v8561_v38 = vld [vmem:[%s8837_s23 + $0x148] sm:$0xff] }
 0x66b   : > { %8180 = vmatmul.mubr.msk.bf16.gmra.mrb[96].mxu1 %vm537_vm0, %v6325_v45 }
 0x66c   : > { %v6313_v32 = vsel %vm988_vm2, %v9931_v22, %v8339_v16  ;;  %v6312_v58 = vsel %vm988_vm2, %v9929_v23, %v8338_v37  ;;  %v9994_v23 = vld [vmem:[%s10717_s4 + $0x1] ss:$0 sm:$0xff] }
 0x66d   : > { %v6326_v52 = vpack.c.bf16 %v6313_v32, %v6312_v58  ;;  %v8342_v24 = vpop.permute.xlu1 %8341 }
 0x66e   : > { %v8344_v35 = vunpack.i.h.bf16 %v8342_v24  ;;  %v8343_v43 = vunpack.i.l.bf16 %v8342_v24 }
 0x66f   : > { %8183 = vmatprep.mubr.msk.bf16.mxu1 %vm537_vm0, %v6326_v52  ;;  %v8562_v52 = vld [vmem:[%s8837_s23 + $0x158] sm:$0xff] }
 0x670   : > { %v6315_v4 = vsel %vm988_vm2, %v9941_v14, %v8344_v35  ;;  %v6314_v20 = vsel %vm988_vm2, %v9936_v3, %v8343_v43 }
 0x671   : > { %v6327_v0 = vpack.c.bf16 %v6315_v4, %v6314_v20 }
 0x673   : > { %8184 = vmatmul.mubr.msk.bf16.gmra.mrb[100].mxu1 %vm537_vm0, %v6327_v0 }
 0x72e   : > { %v8173_v22 = vpop.f32.mrb[88].mxu1 }
 0x72f   : > { %v6406_v62 = vpop.f32.mrb[89].mxu1  ;;  %v6415_v30 = vadd.f32 %v8173_v22, %v9994_v23 }
 0x730   : > { %v6407_v26 = vadd.f32 %v9994_v23, %v6406_v62  ;;  %v8174_v42 = vpop.f32.mrb[90].mxu1 }
 0x731   : > { %v6409_v14 = vpop.f32.mrb[91].mxu1  ;;  %v10003_v2 = vadd.f32 %v8552_v27, %v6415_v30  ;;  %v6418_v28 = vadd.f32 %v8174_v42, %v9994_v23  ;;  %v8563_v30 = vld [vmem:[%s8837_s23 + $0x160] sm:$0xff] }
 0x732   : > { %v9999_v3 = vadd.f32 %v8551_v63, %v6407_v26  ;;  %v6410_v54 = vadd.f32 %v9994_v23, %v6409_v14  ;;  %v8564_v63 = vld [vmem:[%s8837_s23 + $0x170] sm:$0xff] }
 0x733   : > { %v10014_v50 = vadd.f32 %v8554_v40, %v6418_v28  ;;  %v6491_v56 = vsel %vm537_vm0, %v10003_v2, 0.0  ;;  %v8565_v28 = vld [vmem:[%s8837_s23 + $0x168] sm:$0xff] }
 0x734   : > { %v10007_v55 = vadd.f32 %v8553_v11, %v6410_v54  ;;  %v6485_v13 = vsel %vm537_vm0, %v9999_v3, 0.0 }
 0x735   : > { %6486 = vadd.xlane.f32.xlu0 %v6485_v13  ;;  %v6494_v53 = vsel %vm537_vm0, %v10014_v50, 0.0 }
 0x736   : > { %v8177_v15 = vpop.f32.mrb[92].mxu1  ;;  %v6488_v17 = vsel %vm537_vm0, %v10007_v55, 0.0 }
 0x737   : > { %v6422_v25 = vpop.f32.mrb[93].mxu1  ;;  %6489 = vadd.xlane.f32.xlu1 %v6488_v17  ;;  %v6431_v19 = vadd.f32 %v8177_v15, %v9994_v23  ;;  %v8566_v15 = vld [vmem:[%s8837_s23 + $0x178] sm:$0xff]  ;;  %s10585_s23 = scalar_lea.vmem [#allocation3], %s7440_s15 }
 0x738   : > { %v6423_v57 = vadd.f32 %v9994_v23, %v6422_v25  ;;  %v8178_v1 = vpop.f32.mrb[94].mxu1  ;;  %s7366_s26 = sshll.u32 %s10585_s23, 4  ;;  %s10664_s26 = int_to_ptr.vmem [resolvable:$true] %s7366_s26 }
 0x739   : > { %v6425_v12 = vpop.f32.mrb[95].mxu1  ;;  %6492 = vadd.xlane.f32.xlu0 %v6491_v56  ;;  %v6434_v60 = vadd.f32 %v8178_v1, %v9994_v23  ;;  %v10026_v49 = vadd.f32 %v8556_v21, %v6431_v19  ;;  %s8567_s8 = scalar_lea.vmem %s10664_s26, 2048  ;;  %p8574_p2 = scmp.lt.s32.totalorder %s10664_s26, %s8572_s10 }
 0x73a   : > { %v10021_v51 = vadd.f32 %v8555_v29, %v6423_v57  ;;  %v6426_v61 = vadd.f32 %v9994_v23, %v6425_v12  ;;  %p8568_p13 = scmp.ne.s32.totalorder %s10664_s26, %s8567_s8  ;;  %p8575_p3 = scmp.lt.s32.totalorder %s8573_s11, %s8567_s8 }
 0x73b   : > { %v10036_v47 = vadd.f32 %v8558_v34, %v6434_v60  ;;  %v6503_v44 = vsel %vm537_vm0, %v10026_v49, 0.0 }
 0x73c   : > { %v10029_v46 = vadd.f32 %v8557_v48, %v6426_v61  ;;  %v6497_v8 = vsel %vm537_vm0, %v10021_v51, 0.0  ;;  %p8569_p0 = pnand %p8568_p13, %p8709_p6  ;;  %p8576_p4 = por %p8575_p3, %p8574_p2 }
 0x73d   : > { %6495 = vadd.xlane.f32.xlu0 %v6494_v53  ;;  %6498 = vadd.xlane.f32.xlu1 %v6497_v8  ;;  %v6506_v37 = vsel %vm537_vm0, %v10036_v47, 0.0 }
 0x73e   : > { %v8181_v39 = vpop.f32.mrb[96].mxu1  ;;  %v6500_v6 = vsel %vm537_vm0, %v10029_v46, 0.0  ;;  %p8570_p1 = pneg %p8569_p0 }
 0x73f   : > { %v6438_v18 = vpop.f32.mrb[97].mxu1  ;;  %v6447_v36 = vadd.f32 %v8181_v39, %v9994_v23 }
 0x740   : > { %v6439_v9 = vadd.f32 %v9994_v23, %v6438_v18  ;;  %v8182_v33 = vpop.f32.mrb[98].mxu1  ;;  %p8577_p5 = pnand %p8576_p4, %p8570_p1 }
 0x741   : > { %v6441_v7 = vpop.f32.mrb[99].mxu1  ;;  %6501 = vadd.xlane.f32.xlu0 %v6500_v6  ;;  %6504 = vadd.xlane.f32.xlu1 %v6503_v44  ;;  %v6450_v59 = vadd.f32 %v8182_v33, %v9994_v23  ;;  %v10050_v45 = vadd.f32 %v8560_v41, %v6447_v36 }
 0x742   : > { %v10045_v10 = vadd.f32 %v8559_v31, %v6439_v9  ;;  %v6442_v5 = vadd.f32 %v9994_v23, %v6441_v7 }
 0x743   : > { %v10060_v24 = vadd.f32 %v8562_v52, %v6450_v59  ;;  %v6515_v22 = vsel %vm537_vm0, %v10050_v45, 0.0 }
 0x744   : > { %v10053_v16 = vadd.f32 %v8561_v38, %v6442_v5  ;;  %v6509_v32 = vsel %vm537_vm0, %v10045_v10, 0.0 }
 0x745   : > { %6507 = vadd.xlane.f32.xlu0 %v6506_v37  ;;  %6510 = vadd.xlane.f32.xlu1 %v6509_v32  ;;  %v6518_v14 = vsel %vm537_vm0, %v10060_v24, 0.0 }
 0x746   : > { %v8185_v58 = vpop.f32.mrb[100].mxu1  ;;  %v6512_v0 = vsel %vm537_vm0, %v10053_v16, 0.0 }
 0x747   : > { %v6454_v35 = vpop.f32.mrb[101].mxu1  ;;  %v6463_v43 = vadd.f32 %v8185_v58, %v9994_v23 }
 0x748   : > { %v6455_v4 = vadd.f32 %v9994_v23, %v6454_v35  ;;  %v8186_v20 = vpop.f32.mrb[102].mxu1 }
 0x749   : > { %6513 = vadd.xlane.f32.xlu0 %v6512_v0  ;;  %6516 = vadd.xlane.f32.xlu1 %v6515_v22  ;;  %v6457_v62 = vpop.f32.mrb[103].mxu1  ;;  %v10075_v54 = vadd.f32 %v8564_v63, %v6463_v43  ;;  %v6466_v27 = vadd.f32 %v8186_v20, %v9994_v23 }
 0x74a   : > { %v10069_v26 = vadd.f32 %v8563_v30, %v6455_v4  ;;  %v6458_v42 = vadd.f32 %v9994_v23, %v6457_v62 }
 0x74b   : > { %v10084_v17 = vadd.f32 %v8566_v15, %v6466_v27  ;;  %v6527_v40 = vsel %vm537_vm0, %v10075_v54, 0.0 }
 0x74c   : > { %v10079_v11 = vadd.f32 %v8565_v28, %v6458_v42  ;;  %v6521_v13 = vsel %vm537_vm0, %v10069_v26, 0.0 }
 0x74d   : > { %6519 = vadd.xlane.f32.xlu0 %v6518_v14  ;;  %6522 = vadd.xlane.f32.xlu1 %v6521_v13  ;;  %v6530_v23 = vsel %vm537_vm0, %v10084_v17, 0.0 }
 0x74e   : > { %v6524_v25 = vsel %vm537_vm0, %v10079_v11, 0.0 }
 0x751   : > { %6525 = vadd.xlane.f32.xlu0 %v6524_v25  ;;  %6528 = vadd.xlane.f32.xlu1 %v6527_v40 }
 0x755   : > { %6531 = vadd.xlane.f32.xlu0 %v6530_v23 }
 0x7c2   : > { %v6487_v19 = vpop.xlane.xlu0 %6486 }
 0x7c3   : > { %v6534_v57 = vmul.f32 0.03125, %v6487_v19 }
 0x7c4   : > { %v6490_v1 = vpop.xlane.xlu1 %6489 }
 0x7c5   : > { %v10093_v56 = vsub.f32 %v9999_v3, %v6534_v57  ;;  %v6535_v12 = vmul.f32 0.03125, %v6490_v1 }
 0x7c6   : > { %v6493_v29 = vpop.xlane.xlu0 %6492 }
 0x7c7   : > { %v10096_v61 = vsub.f32 %v10007_v55, %v6535_v12  ;;  %v6536_v60 = vmul.f32 0.03125, %v6493_v29  ;;  %v6566_v21 = vmul.f32 %v10093_v56, %v10093_v56 }
 0x7c9   : > { %v10101_v48 = vsub.f32 %v10003_v2, %v6536_v60  ;;  %v6582_v53 = vsel %vm537_vm0, %v6566_v21, 0.0  ;;  %v6567_v8 = vmul.f32 %v10096_v61, %v10096_v61 }
 0x7ca   : > { %v6496_v39 = vpop.xlane.xlu0 %6495  ;;  %v6499_v3 = vpop.xlane.xlu1 %6498  ;;  %6583 = vadd.xlane.f32.xlu1 %v6582_v53 }
 0x7cb   : > { %v6537_v34 = vmul.f32 0.03125, %v6496_v39  ;;  %v6538_v18 = vmul.f32 0.03125, %v6499_v3  ;;  %v6585_v55 = vsel %vm537_vm0, %v6567_v8, 0.0  ;;  %v6568_v36 = vmul.f32 %v10101_v48, %v10101_v48 }
 0x7cc   : > { %6586 = vadd.xlane.f32.xlu0 %v6585_v55 }
 0x7cd   : > { %v10110_v9 = vsub.f32 %v10014_v50, %v6537_v34  ;;  %v10113_v2 = vsub.f32 %v10021_v51, %v6538_v18  ;;  %v6588_v33 = vsel %vm537_vm0, %v6568_v36, 0.0 }
 0x7ce   : > { %v6502_v6 = vpop.xlane.xlu0 %6501  ;;  %v6505_v44 = vpop.xlane.xlu1 %6504  ;;  %6589 = vadd.xlane.f32.xlu1 %v6588_v33 }
 0x7cf   : > { %v6539_v7 = vmul.f32 0.03125, %v6502_v6  ;;  %v6540_v31 = vmul.f32 0.03125, %v6505_v44  ;;  %v6569_v5 = vmul.f32 %v10110_v9, %v10110_v9  ;;  %v6570_v59 = vmul.f32 %v10113_v2, %v10113_v2  ;;  %v8349_v44 = vld [vmem:[%s10715_s2] sm:$0xff]  }
 0x7d0   : > { %8187 = vmatprep.subr.bf16.mxu0 %v8349_v44 }
 0x7d1   : > { %v10121_v41 = vsub.f32 %v10029_v46, %v6539_v7  ;;  %v10124_v50 = vsub.f32 %v10026_v49, %v6540_v31  ;;  %v6591_v51 = vsel %vm537_vm0, %v6569_v5, 0.0  ;;  %v6594_v38 = vsel %vm537_vm0, %v6570_v59, 0.0  ;;  %8188 = vmatpush3.bf16.msra.mxu0 %v8349_v44  ;;  %v10197_v7 = vld [vmem:[%s10716_s3] sm:$0xff]   ;;  %v10203_v31 = vld [vmem:[%s10716_s3 + $0x8] sm:$0xff]   ;;  %v10211_v5 = vld [vmem:[%s10716_s3 + $0x10] sm:$0xff]  }
 0x7d2   : > { %v6508_v37 = vpop.xlane.xlu0 %6507  ;;  %v6511_v32 = vpop.xlane.xlu1 %6510  ;;  %6592 = vadd.xlane.f32.xlu0 %v6591_v51  ;;  %6595 = vadd.xlane.f32.xlu1 %v6594_v38  ;;  %v10218_v59 = vld [vmem:[%s10716_s3 + $0x18] sm:$0xff]   ;;  %v10225_v51 = vld [vmem:[%s10716_s3 + $0x20] sm:$0xff]   ;;  %v10232_v38 = vld [vmem:[%s10716_s3 + $0x28] sm:$0xff]  }
 0x7d3   : > { %v6541_v58 = vmul.f32 0.03125, %v6508_v37  ;;  %v6542_v52 = vmul.f32 0.03125, %v6511_v32  ;;  %v6571_v35 = vmul.f32 %v10121_v41, %v10121_v41  ;;  %v6572_v46 = vmul.f32 %v10124_v50, %v10124_v50  ;;  %8239 = vmatprep.subr.bf16.mxu1 %v10197_v7 }
 0x7d4   : > { %8247 = vmatpush3.bf16.msra.mxu1 %v10197_v7 }
 0x7d5   : > { %v10133_v43 = vsub.f32 %v10036_v47, %v6541_v58  ;;  %v10136_v49 = vsub.f32 %v10045_v10, %v6542_v52  ;;  %v6597_v4 = vsel %vm537_vm0, %v6571_v35, 0.0  ;;  %v6600_v20 = vsel %vm537_vm0, %v6572_v46, 0.0  ;;  %8240 = vmatprep.subr.bf16.mxu1 %v10203_v31 }
 0x7d6   : > { %v6514_v0 = vpop.xlane.xlu0 %6513  ;;  %v6517_v22 = vpop.xlane.xlu1 %6516  ;;  %6598 = vadd.xlane.f32.xlu0 %v6597_v4  ;;  %6601 = vadd.xlane.f32.xlu1 %v6600_v20 }
 0x7d7   : > { %v6543_v62 = vmul.f32 0.03125, %v6514_v0  ;;  %v6544_v30 = vmul.f32 0.03125, %v6517_v22  ;;  %v6573_v42 = vmul.f32 %v10133_v43, %v10133_v43  ;;  %v6574_v47 = vmul.f32 %v10136_v49, %v10136_v49 }
 0x7d8   : > { %8248 = vmatpush3.bf16.msra.mxu1 %v10203_v31 }
 0x7d9   : > { %v10145_v14 = vsub.f32 %v10053_v16, %v6543_v62  ;;  %v10148_v10 = vsub.f32 %v10050_v45, %v6544_v30  ;;  %v6603_v63 = vsel %vm537_vm0, %v6573_v42, 0.0  ;;  %v6606_v27 = vsel %vm537_vm0, %v6574_v47, 0.0  ;;  %8241 = vmatprep.subr.bf16.mxu1 %v10211_v5 }
 0x7da   : > { %v6520_v28 = vpop.xlane.xlu0 %6519  ;;  %6604 = vadd.xlane.f32.xlu0 %v6603_v63  ;;  %6607 = vadd.xlane.f32.xlu1 %v6606_v27  ;;  %v6523_v13 = vpop.xlane.xlu1 %6522 }
 0x7db   : > { %v6545_v15 = vmul.f32 0.03125, %v6520_v28  ;;  %v6546_v25 = vmul.f32 0.03125, %v6523_v13  ;;  %v6575_v40 = vmul.f32 %v10145_v14, %v10145_v14  ;;  %v6576_v16 = vmul.f32 %v10148_v10, %v10148_v10 }
 0x7dc   : > { %8249 = vmatpush3.bf16.msra.mxu1 %v10211_v5 }
 0x7dd   : > { %v10157_v23 = vsub.f32 %v10060_v24, %v6545_v15  ;;  %v10160_v45 = vsub.f32 %v10069_v26, %v6546_v25  ;;  %v6609_v19 = vsel %vm537_vm0, %v6575_v40, 0.0  ;;  %v6612_v57 = vsel %vm537_vm0, %v6576_v16, 0.0  ;;  %8242 = vmatprep.subr.bf16.mxu1 %v10218_v59  ;;  %v10240_v40 = vld [vmem:[%s10717_s4 + $0x2] ss:$0 sm:$0xff] }
 0x7de   : > { %6610 = vadd.xlane.f32.xlu0 %v6609_v19  ;;  %v6526_v1 = vpop.xlane.xlu0 %6525  ;;  %6613 = vadd.xlane.f32.xlu1 %v6612_v57  ;;  %v6529_v12 = vpop.xlane.xlu1 %6528 }
 0x7df   : > { %v6547_v29 = vmul.f32 0.03125, %v6526_v1  ;;  %v6548_v60 = vmul.f32 0.03125, %v6529_v12  ;;  %v6577_v21 = vmul.f32 %v10157_v23, %v10157_v23  ;;  %v6578_v24 = vmul.f32 %v10160_v45, %v10160_v45 }
 0x7e0   : > { %8250 = vmatpush3.bf16.msra.mxu1 %v10218_v59 }
 0x7e1   : > { %v10169_v53 = vsub.f32 %v10079_v11, %v6547_v29  ;;  %v10172_v26 = vsub.f32 %v10075_v54, %v6548_v60  ;;  %v6615_v8 = vsel %vm537_vm0, %v6577_v21, 0.0  ;;  %v6618_v39 = vsel %vm537_vm0, %v6578_v24, 0.0  ;;  %8243 = vmatprep.subr.bf16.mxu1 %v10225_v51 }
 0x7e2   : > { %6616 = vadd.xlane.f32.xlu0 %v6615_v8  ;;  %v6532_v3 = vpop.xlane.xlu0 %6531  ;;  %6619 = vadd.xlane.f32.xlu1 %v6618_v39 }
 0x7e3   : > { %v6549_v34 = vmul.f32 0.03125, %v6532_v3  ;;  %v6579_v18 = vmul.f32 %v10169_v53, %v10169_v53  ;;  %v6580_v55 = vmul.f32 %v10172_v26, %v10172_v26 }
 0x7e4   : > { %8251 = vmatpush3.bf16.msra.mxu1 %v10225_v51 }
 0x7e5   : > { %v10181_v11 = vsub.f32 %v10084_v17, %v6549_v34  ;;  %v6621_v54 = vsel %vm537_vm0, %v6579_v18, 0.0  ;;  %v6624_v36 = vsel %vm537_vm0, %v6580_v55, 0.0  ;;  %v8350_v17 = vld [vmem:[%s10715_s2 + $0x8] sm:$0xff]   ;;  %8244 = vmatprep.subr.bf16.mxu1 %v10232_v38  ;;  %v10248_v18 = vld [vmem:[%s10717_s4 + $0x3] ss:$0 sm:$0xff] }
 0x7e6   : > { %6622 = vadd.xlane.f32.xlu0 %v6621_v54  ;;  %6625 = vadd.xlane.f32.xlu1 %v6624_v36 }
 0x7e7   : > { %v6581_v33 = vmul.f32 %v10181_v11, %v10181_v11  ;;  %8189 = vmatprep.subr.bf16.mxu0 %v8350_v17 }
 0x7e8   : > { %8190 = vmatpush3.bf16.msra.mxu0 %v8350_v17  ;;  %8252 = vmatpush3.bf16.msra.mxu1 %v10232_v38 }
 0x7e9   : > { %v6627_v6 = vsel %vm537_vm0, %v6581_v33, 0.0  ;;  %8207 = vmatprep.subr.bf16.mxu0 %v10197_v7 }
 0x7ea   : > { %6628 = vadd.xlane.f32.xlu0 %v6627_v6 }
 0x857   : > { %v6584_v37 = vpop.xlane.xlu1 %6583 }
 0x858   : > { %v6630_v32 = vmul.f32 0.03125, %v6584_v37 }
 0x859   : > { %v6587_v58 = vpop.xlane.xlu0 %6586 }
 0x85a   : > { %v6646_v52 = vadd.f32 1e-05, %v6630_v32  ;;  %v6631_v35 = vmul.f32 0.03125, %v6587_v58 }
 0x85b   : > { %v6590_v46 = vpop.xlane.xlu1 %6589 }
 0x85c   : > { %8487 = vrsqrt.f32 %v6646_v52  ;;  %v6647_v4 = vadd.f32 1e-05, %v6631_v35  ;;  %v6632_v20 = vmul.f32 0.03125, %v6590_v46 }
 0x85e   : > { %8489 = vrsqrt.f32 %v6647_v4  ;;  %v6648_v0 = vadd.f32 1e-05, %v6632_v20 }
 0x85f   : > { %v6593_v22 = vpop.xlane.xlu0 %6592  ;;  %v6596_v62 = vpop.xlane.xlu1 %6595 }
 0x860   : > { %8491 = vrsqrt.f32 %v6648_v0  ;;  %v6633_v30 = vmul.f32 0.03125, %v6593_v22  ;;  %v6634_v42 = vmul.f32 0.03125, %v6596_v62 }
 0x862   : > { %v6649_v47 = vadd.f32 1e-05, %v6633_v30  ;;  %v6650_v63 = vadd.f32 1e-05, %v6634_v42 }
 0x863   : > { %v6599_v27 = vpop.xlane.xlu0 %6598  ;;  %v6602_v28 = vpop.xlane.xlu1 %6601 }
 0x864   : > { %8493 = vrsqrt.f32 %v6649_v47  ;;  %v6635_v13 = vmul.f32 0.03125, %v6599_v27  ;;  %v6636_v15 = vmul.f32 0.03125, %v6602_v28 }
 0x865   : > { %8495 = vrsqrt.f32 %v6650_v63 }
 0x866   : > { %v8488_v25 = vpop.eup %8487  ;;  %v6651_v16 = vadd.f32 1e-05, %v6635_v13  ;;  %v6652_v19 = vadd.f32 1e-05, %v6636_v15 }
 0x867   : > { %v6678_v57 = vmul.f32 %v8488_v25, %v10093_v56  ;;  %v6605_v1 = vpop.xlane.xlu0 %6604  ;;  %v6608_v12 = vpop.xlane.xlu1 %6607 }
 0x868   : > { %v8490_v29 = vpop.eup %8489  ;;  %8497 = vrsqrt.f32 %v6651_v16  ;;  %v6637_v60 = vmul.f32 0.03125, %v6605_v1  ;;  %v6638_v21 = vmul.f32 0.03125, %v6608_v12 }
 0x869   : > { %v6679_v24 = vmul.f32 %v8490_v29, %v10096_v61  ;;  %8499 = vrsqrt.f32 %v6652_v19  ;;  %v6698_v8 = vmul.f32 %v10240_v40, %v6678_v57 }
 0x86a   : > { %v8492_v39 = vpop.eup %8491  ;;  %v6653_v3 = vadd.f32 1e-05, %v6637_v60  ;;  %v6654_v34 = vadd.f32 1e-05, %v6638_v21 }
 0x86b   : > { %v6680_v56 = vmul.f32 %v8492_v39, %v10101_v48  ;;  %v6611_v55 = vpop.xlane.xlu0 %6610  ;;  %v6614_v54 = vpop.xlane.xlu1 %6613  ;;  %v6699_v36 = vmul.f32 %v10240_v40, %v6679_v24  ;;  %v10253_v6 = vadd.f32 %v10248_v18, %v6698_v8 }
 0x86c   : > { %8501 = vrsqrt.f32 %v6653_v3  ;;  %v6639_v33 = vmul.f32 0.03125, %v6611_v55  ;;  %v6640_v61 = vmul.f32 0.03125, %v6614_v54 }
 0x86d   : > { %8503 = vrsqrt.f32 %v6654_v34  ;;  %v10256_v44 = vadd.f32 %v10248_v18, %v6699_v36  ;;  %v6700_v48 = vmul.f32 %v10240_v40, %v6680_v56 }
 0x86e   : > { %v8494_v17 = vpop.eup %8493  ;;  %v6655_v37 = vadd.f32 1e-05, %v6639_v33  ;;  %v6656_v32 = vadd.f32 1e-05, %v6640_v61 }
 0x86f   : > { %v8496_v58 = vpop.eup %8495  ;;  %v6681_v52 = vmul.f32 %v8494_v17, %v10110_v9  ;;  %v6617_v35 = vpop.xlane.xlu0 %6616  ;;  %v6734_v4 = vpack.c.bf16 %v10256_v44, %v10253_v6  ;;  %v10267_v13 = vadd.f32 %v10248_v18, %v6700_v48 }
 0x870   : > { %v6620_v46 = vpop.xlane.xlu1 %6619  ;;  %v6682_v20 = vmul.f32 %v8496_v58, %v10113_v2  ;;  %8505 = vrsqrt.f32 %v6655_v37  ;;  %v6641_v0 = vmul.f32 0.03125, %v6617_v35 }
 0x871   : > { %v6642_v22 = vmul.f32 0.03125, %v6620_v46  ;;  %v6701_v62 = vmul.f32 %v10240_v40, %v6681_v52  ;;  %8507 = vrsqrt.f32 %v6656_v32  ;;  %8191 = vmatprep.mubr.msk.bf16.mxu0 %vm537_vm0, %v6734_v4 }
 0x872   : > { %v8498_v30 = vpop.eup %8497  ;;  %v6657_v42 = vadd.f32 1e-05, %v6641_v0  ;;  %v6702_v15 = vmul.f32 %v10240_v40, %v6682_v20 }
 0x873   : > { %v6658_v47 = vadd.f32 1e-05, %v6642_v22  ;;  %v8500_v63 = vpop.eup %8499  ;;  %v6683_v9 = vmul.f32 %v8498_v30, %v10121_v41  ;;  %v6623_v27 = vpop.xlane.xlu0 %6622  ;;  %v10270_v2 = vadd.f32 %v10248_v18, %v6701_v62 }
 0x874   : > { %v6626_v28 = vpop.xlane.xlu1 %6625  ;;  %v6684_v25 = vmul.f32 %v8500_v63, %v10124_v50  ;;  %8509 = vrsqrt.f32 %v6657_v42  ;;  %v6643_v16 = vmul.f32 0.03125, %v6623_v27  ;;  %v10280_v50 = vadd.f32 %v10248_v18, %v6702_v15 }
 0x875   : > { %v6644_v19 = vmul.f32 0.03125, %v6626_v28  ;;  %8511 = vrsqrt.f32 %v6658_v47  ;;  %v6735_v57 = vpack.c.bf16 %v10270_v2, %v10267_v13  ;;  %v6703_v41 = vmul.f32 %v10240_v40, %v6683_v9 }
 0x876   : > { %v8502_v1 = vpop.eup %8501  ;;  %v6659_v12 = vadd.f32 1e-05, %v6643_v16  ;;  %v6704_v39 = vmul.f32 %v10240_v40, %v6684_v25 }
 0x877   : > { %v6660_v29 = vadd.f32 1e-05, %v6644_v19  ;;  %v8504_v60 = vpop.eup %8503  ;;  %v6685_v21 = vmul.f32 %v8502_v1, %v10133_v43  ;;  %v6629_v24 = vpop.xlane.xlu0 %6628  ;;  %8192 = vmatmul.mubr.msk.bf16.vlgmr.msra.gmra.mrb[92].mxu0 %vm537_vm0, %v6735_v57  ;;  %v10283_v8 = vadd.f32 %v10248_v18, %v6703_v41 }
 0x878   : > { %v6686_v3 = vmul.f32 %v8504_v60, %v10136_v49  ;;  %8513 = vrsqrt.f32 %v6659_v12  ;;  %v6645_v34 = vmul.f32 0.03125, %v6629_v24  ;;  %8208 = vmatpush3.bf16.msra.mxu0 %v10197_v7  ;;  %v10295_v49 = vadd.f32 %v10248_v18, %v6704_v39 }
 0x879   : > { %8515 = vrsqrt.f32 %v6660_v29  ;;  %v6736_v43 = vpack.c.bf16 %v10283_v8, %v10280_v50  ;;  %v6705_v56 = vmul.f32 %v10240_v40, %v6685_v21  ;;  %8209 = vmatprep.subr.bf16.mxu0 %v10203_v31 }
 0x87a   : > { %v8506_v55 = vpop.eup %8505  ;;  %v6661_v54 = vadd.f32 1e-05, %v6645_v34  ;;  %v6706_v61 = vmul.f32 %v10240_v40, %v6686_v3 }
 0x87b   : > { %v8508_v36 = vpop.eup %8507  ;;  %v6687_v33 = vmul.f32 %v8506_v55, %v10145_v14  ;;  %8195 = vmatprep.mubr.msk.bf16.mxu0 %vm537_vm0, %v6736_v43  ;;  %v10298_v7 = vadd.f32 %v10248_v18, %v6705_v56 }
 0x87c   : > { %v6688_v17 = vmul.f32 %v8508_v36, %v10148_v10  ;;  %8517 = vrsqrt.f32 %v6661_v54  ;;  %8210 = vmatpush3.bf16.msra.mxu0 %v10203_v31  ;;  %v10310_v52 = vadd.f32 %v10248_v18, %v6706_v61 }
 0x87d   : > { %v6737_v37 = vpack.c.bf16 %v10298_v7, %v10295_v49  ;;  %v6707_v14 = vmul.f32 %v10240_v40, %v6687_v33  ;;  %8211 = vmatprep.subr.bf16.mxu0 %v10211_v5 }
 0x87e   : > { %v8510_v32 = vpop.eup %8509  ;;  %v6708_v31 = vmul.f32 %v10240_v40, %v6688_v17 }
 0x87f   : > { %v8512_v58 = vpop.eup %8511  ;;  %v6689_v48 = vmul.f32 %v8510_v32, %v10157_v23  ;;  %8196 = vmatmul.mubr.msk.bf16.gmra.mrb[96].mxu0 %vm537_vm0, %v6737_v37  ;;  %v10313_v10 = vadd.f32 %v10248_v18, %v6707_v14 }
 0x880   : > { %v6690_v35 = vmul.f32 %v8512_v58, %v10160_v45  ;;  %8212 = vmatpush3.bf16.msra.mxu0 %v10211_v5  ;;  %v10325_v22 = vadd.f32 %v10248_v18, %v6708_v31 }
 0x881   : > { %v6738_v46 = vpack.c.bf16 %v10313_v10, %v10310_v52  ;;  %v6709_v4 = vmul.f32 %v10240_v40, %v6689_v48  ;;  %8213 = vmatprep.subr.bf16.mxu0 %v10218_v59 }
 0x882   : > { %v8514_v23 = vpop.eup %8513  ;;  %v6710_v5 = vmul.f32 %v10240_v40, %v6690_v35 }
 0x883   : > { %v8516_v20 = vpop.eup %8515  ;;  %v6691_v0 = vmul.f32 %v8514_v23, %v10169_v53  ;;  %8199 = vmatprep.mubr.msk.bf16.mxu0 %vm537_vm0, %v6738_v46  ;;  %v10328_v45 = vadd.f32 %v10248_v18, %v6709_v4 }
 0x884   : > { %v6692_v62 = vmul.f32 %v8516_v20, %v10172_v26  ;;  %8214 = vmatpush3.bf16.msra.mxu0 %v10218_v59  ;;  %v10340_v63 = vadd.f32 %v10248_v18, %v6710_v5 }
 0x885   : > { %v6739_v30 = vpack.c.bf16 %v10328_v45, %v10325_v22  ;;  %v6711_v42 = vmul.f32 %v10240_v40, %v6691_v0  ;;  %8215 = vmatprep.subr.bf16.mxu0 %v10225_v51 }
 0x886   : > { %v8518_v53 = vpop.eup %8517  ;;  %v6712_v26 = vmul.f32 %v10240_v40, %v6692_v62 }
 0x887   : > { %v6693_v47 = vmul.f32 %v8518_v53, %v10181_v11  ;;  %8200 = vmatmul.mubr.msk.bf16.gmra.mrb[100].mxu0 %vm537_vm0, %v6739_v30  ;;  %v10343_v9 = vadd.f32 %v10248_v18, %v6711_v42 }
 0x888   : > { %8216 = vmatpush3.bf16.msra.mxu0 %v10225_v51  ;;  %v10353_v11 = vadd.f32 %v10248_v18, %v6712_v26 }
 0x889   : > { %v6740_v59 = vpack.c.bf16 %v10343_v9, %v10340_v63  ;;  %v6713_v27 = vmul.f32 %v10240_v40, %v6693_v47  ;;  %8217 = vmatprep.subr.bf16.mxu0 %v10232_v38  ;;  %v8357_v40 = vld [vmem:[%s10716_s3 + $0x30] sm:$0xff]  }
 0x88a   : > { %8245 = vmatprep.subr.bf16.mxu1 %v8357_v40 }
 0x88b   : > { %8203 = vmatprep.mubr.msk.bf16.mxu0 %vm537_vm0, %v6740_v59  ;;  %v10356_v28 = vadd.f32 %v10248_v18, %v6713_v27  ;;  %8253 = vmatpush3.bf16.msra.mxu1 %v8357_v40  ;;  %v8358_v18 = vld [vmem:[%s10716_s3 + $0x38] sm:$0xff]  }
 0x88c   : > { %8218 = vmatpush3.bf16.msra.mxu0 %v10232_v38  ;;  %8246 = vmatprep.subr.bf16.mxu1 %v8358_v18  ;;  %v7576_v38 = vld [vmem:[%s10717_s4] ss:$0 sm:$0xff] }
 0x88d   : > { %v6741_v51 = vpack.c.bf16 %v10356_v28, %v10353_v11  ;;  %8219 = vmatprep.subr.bf16.mxu0 %v8357_v40 }
 0x88f   : > { %8204 = vmatmul.mubr.msk.bf16.gmra.mrb[104].mxu0 %vm537_vm0, %v6741_v51  ;;  %8254 = vmatpush3.bf16.msra.mxu1 %v8358_v18 }
 0x890   : > { %8220 = vmatpush3.bf16.msra.mxu0 %v8357_v40 }
 0x891   : > { %8221 = vmatprep.subr.bf16.mxu0 %v8358_v18 }
 0x894   : > { %8222 = vmatpush3.bf16.msra.mxu0 %v8358_v18 }
 0x94a   : > { %v8193_v15 = vpop.f32.mrb[92].mxu0 }
 0x94b   : > { %v6829_v25 = vadd.f32 %v8193_v15, %v7576_v38  ;;  %v6820_v16 = vpop.f32.mrb[93].mxu0 }
 0x94c   : > { %v6821_v19 = vadd.f32 %v7576_v38, %v6820_v16  ;;  %v8194_v57 = vpop.f32.mrb[94].mxu0 }
 0x94d   : > { %v6832_v41 = vadd.f32 %v8194_v57, %v7576_v38  ;;  %v6823_v1 = vpop.f32.mrb[95].mxu0  ;;  %v6885_v29 = vmax.f32 %v6829_v25, 0.0 }
 0x94e   : > { %v6824_v12 = vadd.f32 %v7576_v38, %v6823_v1  ;;  %v6883_v21 = vmax.f32 %v6821_v19, 0.0 }
 0x94f   : > { %v6886_v60 = vmax.f32 %v6832_v41, 0.0 }
 0x950   : > { %v6884_v24 = vmax.f32 %v6824_v12, 0.0 }
 0x951   : > { %v6900_v39 = vpack.c.bf16 %v6886_v60, %v6885_v29  ;;  %v10374_v60 = vld [vmem:[%s10717_s4 + $0x4] ss:$0 sm:$0xff] }
 0x952   : > { %v6899_v3 = vpack.c.bf16 %v6884_v24, %v6883_v21  ;;  %v8197_v34 = vpop.f32.mrb[96].mxu0 }
 0x953   : > { %v6845_v43 = vadd.f32 %v8197_v34, %v7576_v38  ;;  %v6836_v56 = vpop.f32.mrb[97].mxu0 }
 0x954   : > { %v6837_v55 = vadd.f32 %v7576_v38, %v6836_v56  ;;  %v8198_v54 = vpop.f32.mrb[98].mxu0  ;;  %8223 = vmatprep.mubr.bf16.mxu0 %v6899_v3 }
 0x955   : > { %v6848_v36 = vadd.f32 %v8198_v54, %v7576_v38  ;;  %v6839_v33 = vpop.f32.mrb[99].mxu0  ;;  %8224 = vmatmul.mubr.bf16.vlgmr.msra.gmra.mrb[108].mxu0 %v6900_v39  ;;  %v6889_v17 = vmax.f32 %v6845_v43, 0.0 }
 0x956   : > { %v6840_v61 = vadd.f32 %v7576_v38, %v6839_v33  ;;  %v6887_v14 = vmax.f32 %v6837_v55, 0.0 }
 0x957   : > { %v6890_v37 = vmax.f32 %v6848_v36, 0.0 }
 0x958   : > { %v6888_v32 = vmax.f32 %v6840_v61, 0.0 }
 0x959   : > { %v6902_v58 = vpack.c.bf16 %v6890_v37, %v6889_v17 }
 0x95a   : > { %v6901_v48 = vpack.c.bf16 %v6888_v32, %v6887_v14  ;;  %v8201_v31 = vpop.f32.mrb[100].mxu0 }
 0x95b   : > { %v6861_v35 = vadd.f32 %v8201_v31, %v7576_v38  ;;  %v6852_v46 = vpop.f32.mrb[101].mxu0 }
 0x95c   : > { %v6853_v4 = vadd.f32 %v7576_v38, %v6852_v46  ;;  %v8202_v23 = vpop.f32.mrb[102].mxu0  ;;  %8227 = vmatprep.mubr.bf16.mxu1 %v6901_v48 }
 0x95d   : > { %v6864_v20 = vadd.f32 %v8202_v23, %v7576_v38  ;;  %v6855_v0 = vpop.f32.mrb[103].mxu0  ;;  %8228 = vmatmul.mubr.bf16.vlgmr.msra.gmra.mrb[104].mxu1 %v6902_v58  ;;  %v6893_v62 = vmax.f32 %v6861_v35, 0.0 }
 0x95e   : > { %v6856_v5 = vadd.f32 %v7576_v38, %v6855_v0  ;;  %v6891_v42 = vmax.f32 %v6853_v4, 0.0 }
 0x95f   : > { %v6894_v30 = vmax.f32 %v6864_v20, 0.0 }
 0x960   : > { %v6892_v53 = vmax.f32 %v6856_v5, 0.0 }
 0x961   : > { %v6904_v47 = vpack.c.bf16 %v6894_v30, %v6893_v62 }
 0x962   : > { %v6903_v26 = vpack.c.bf16 %v6892_v53, %v6891_v42  ;;  %v8205_v59 = vpop.f32.mrb[104].mxu0 }
 0x963   : > { %v6877_v27 = vadd.f32 %v8205_v59, %v7576_v38  ;;  %v6868_v51 = vpop.f32.mrb[105].mxu0 }
 0x964   : > { %v6869_v40 = vadd.f32 %v7576_v38, %v6868_v51  ;;  %v8206_v18 = vpop.f32.mrb[106].mxu0  ;;  %8231 = vmatprep.mubr.bf16.mxu1 %v6903_v26 }
 0x965   : > { %v6880_v15 = vadd.f32 %v8206_v18, %v7576_v38  ;;  %v6871_v25 = vpop.f32.mrb[107].mxu0  ;;  %8232 = vmatmul.mubr.bf16.gmra.mrb[108].mxu1 %v6904_v47  ;;  %v6897_v19 = vmax.f32 %v6877_v27, 0.0 }
 0x966   : > { %v6872_v16 = vadd.f32 %v7576_v38, %v6871_v25  ;;  %v6895_v41 = vmax.f32 %v6869_v40, 0.0 }
 0x967   : > { %v6898_v57 = vmax.f32 %v6880_v15, 0.0 }
 0x968   : > { %v6896_v1 = vmax.f32 %v6872_v16, 0.0 }
 0x969   : > { %v6906_v12 = vpack.c.bf16 %v6898_v57, %v6897_v19 }
 0x96a   : > { %v6905_v29 = vpack.c.bf16 %v6896_v1, %v6895_v41 }
 0x96c   : > { %8235 = vmatprep.mubr.bf16.mxu1 %v6905_v29 }
 0x96d   : > { %8236 = vmatmul.mubr.bf16.gmra.mrb[112].mxu1 %v6906_v12 }
 0xa28   : > { %v8225_v21 = vpop.f32.mrb[108].mxu0 }
 0xa29   : > { %v7018_v24 = vadd.f32 %v8225_v21, %v10374_v60  ;;  %v7009_v39 = vpop.f32.mrb[109].mxu0 }
 0xa2a   : > { %v7010_v3 = vadd.f32 %v10374_v60, %v7009_v39  ;;  %v8226_v38 = vpop.f32.mrb[110].mxu0 }
 0xa2b   : > { %v10379_v34 = vadd.f32 %v7018_v24, %v10267_v13  ;;  %v7021_v43 = vadd.f32 %v8226_v38, %v10374_v60  ;;  %v7012_v56 = vpop.f32.mrb[111].mxu0 }
 0xa2c   : > { %v7013_v55 = vadd.f32 %v10374_v60, %v7012_v56  ;;  %v10384_v54 = vadd.f32 %v7010_v3, %v10253_v6 }
 0xa2d   : > { %v10387_v36 = vadd.f32 %v7021_v43, %v10270_v2  ;;  %v7094_v33 = vsel %vm537_vm0, %v10379_v34, 0.0 }
 0xa2e   : > { %7095 = vadd.xlane.f32.xlu1 %v7094_v33  ;;  %v10392_v61 = vadd.f32 %v7013_v55, %v10256_v44  ;;  %v7088_v6 = vsel %vm537_vm0, %v10384_v54, 0.0 }
 0xa2f   : > { %v7097_v13 = vsel %vm537_vm0, %v10387_v36, 0.0 }
 0xa30   : > { %v8229_v17 = vpop.f32.mrb[104].mxu1  ;;  %7098 = vadd.xlane.f32.xlu0 %v7097_v13  ;;  %v7091_v31 = vsel %vm537_vm0, %v10392_v61, 0.0 }
 0xa31   : > { %v7034_v37 = vadd.f32 %v8229_v17, %v10374_v60  ;;  %v7025_v14 = vpop.f32.mrb[105].mxu1 }
 0xa32   : > { %v7026_v2 = vadd.f32 %v10374_v60, %v7025_v14  ;;  %v8230_v32 = vpop.f32.mrb[106].mxu1  ;;  %7089 = vadd.xlane.f32.xlu1 %v7088_v6 }
 0xa33   : > { %v10401_v58 = vadd.f32 %v7034_v37, %v10295_v49  ;;  %v7037_v44 = vadd.f32 %v8230_v32, %v10374_v60  ;;  %v7028_v48 = vpop.f32.mrb[107].mxu1 }
 0xa34   : > { %v7029_v35 = vadd.f32 %v10374_v60, %v7028_v48  ;;  %7092 = vadd.xlane.f32.xlu0 %v7091_v31  ;;  %v10408_v46 = vadd.f32 %v7026_v2, %v10280_v50 }
 0xa35   : > { %v10411_v4 = vadd.f32 %v7037_v44, %v10298_v7  ;;  %v7106_v23 = vsel %vm537_vm0, %v10401_v58, 0.0 }
 0xa36   : > { %7107 = vadd.xlane.f32.xlu1 %v7106_v23  ;;  %v10416_v49 = vadd.f32 %v7029_v35, %v10283_v8  ;;  %v7100_v50 = vsel %vm537_vm0, %v10408_v46, 0.0 }
 0xa37   : > { %v7109_v20 = vsel %vm537_vm0, %v10411_v4, 0.0 }
 0xa38   : > { %v8233_v0 = vpop.f32.mrb[108].mxu1  ;;  %7110 = vadd.xlane.f32.xlu0 %v7109_v20  ;;  %v7103_v47 = vsel %vm537_vm0, %v10416_v49, 0.0 }
 0xa39   : > { %v7050_v5 = vadd.f32 %v8233_v0, %v10374_v60  ;;  %v7041_v62 = vpop.f32.mrb[109].mxu1 }
 0xa3a   : > { %v7042_v7 = vadd.f32 %v10374_v60, %v7041_v62  ;;  %v8234_v30 = vpop.f32.mrb[110].mxu1  ;;  %7101 = vadd.xlane.f32.xlu1 %v7100_v50 }
 0xa3b   : > { %v10425_v42 = vadd.f32 %v7050_v5, %v10325_v22  ;;  %v7053_v8 = vadd.f32 %v8234_v30, %v10374_v60  ;;  %v7044_v53 = vpop.f32.mrb[111].mxu1 }
 0xa3c   : > { %v7045_v26 = vadd.f32 %v10374_v60, %v7044_v53  ;;  %7104 = vadd.xlane.f32.xlu0 %v7103_v47  ;;  %v10432_v59 = vadd.f32 %v7042_v7, %v10310_v52 }
 0xa3d   : > { %v10435_v27 = vadd.f32 %v7053_v8, %v10328_v45  ;;  %v7118_v51 = vsel %vm537_vm0, %v10425_v42, 0.0 }
 0xa3e   : > { %7119 = vadd.xlane.f32.xlu1 %v7118_v51  ;;  %v10440_v22 = vadd.f32 %v7045_v26, %v10313_v10  ;;  %v7112_v52 = vsel %vm537_vm0, %v10432_v59, 0.0 }
 0xa3f   : > { %v7121_v40 = vsel %vm537_vm0, %v10435_v27, 0.0 }
 0xa40   : > { %v8237_v18 = vpop.f32.mrb[112].mxu1  ;;  %7122 = vadd.xlane.f32.xlu0 %v7121_v40  ;;  %v7115_v10 = vsel %vm537_vm0, %v10440_v22, 0.0 }
 0xa41   : > { %v7057_v15 = vpop.f32.mrb[113].mxu1  ;;  %v7066_v25 = vadd.f32 %v8237_v18, %v10374_v60 }
 0xa42   : > { %v7058_v45 = vadd.f32 %v10374_v60, %v7057_v15  ;;  %v8238_v16 = vpop.f32.mrb[114].mxu1  ;;  %7113 = vadd.xlane.f32.xlu1 %v7112_v52 }
 0xa43   : > { %v7060_v19 = vpop.f32.mrb[115].mxu1  ;;  %v7069_v41 = vadd.f32 %v8238_v16, %v10374_v60  ;;  %v10456_v12 = vadd.f32 %v7066_v25, %v10353_v11 }
 0xa44   : > { %v10451_v57 = vadd.f32 %v7058_v45, %v10340_v63  ;;  %v7061_v1 = vadd.f32 %v10374_v60, %v7060_v19  ;;  %7116 = vadd.xlane.f32.xlu0 %v7115_v10 }
 0xa45   : > { %v10464_v24 = vadd.f32 %v7069_v41, %v10356_v28  ;;  %v7130_v60 = vsel %vm537_vm0, %v10456_v12, 0.0 }
 0xa46   : > { %v10459_v29 = vadd.f32 %v7061_v1, %v10343_v9  ;;  %v7124_v21 = vsel %vm537_vm0, %v10451_v57, 0.0 }
 0xa47   : > { %7125 = vadd.xlane.f32.xlu1 %v7124_v21  ;;  %v7133_v11 = vsel %vm537_vm0, %v10464_v24, 0.0 }
 0xa48   : > { %v7127_v63 = vsel %vm537_vm0, %v10459_v29, 0.0 }
 0xa49   : > { %7128 = vadd.xlane.f32.xlu0 %v7127_v63 }
 0xa4b   : > { %7131 = vadd.xlane.f32.xlu1 %v7130_v60 }
 0xa4d   : > { %7134 = vadd.xlane.f32.xlu0 %v7133_v11 }
 0xabb   : > { %v7096_v9 = vpop.xlane.xlu1 %7095 }
 0xabc   : > { %v7138_v39 = vmul.f32 0.03125, %v7096_v9 }
 0xabd   : > { %v7099_v3 = vpop.xlane.xlu0 %7098 }
 0xabe   : > { %v10473_v38 = vsub.f32 %v10379_v34, %v7138_v39  ;;  %v7139_v28 = vmul.f32 0.03125, %v7099_v3 }
 0xabf   : > { %v7090_v43 = vpop.xlane.xlu1 %7089 }
 0xac0   : > { %v10476_v56 = vsub.f32 %v10387_v36, %v7139_v28  ;;  %v7136_v55 = vmul.f32 0.03125, %v7090_v43  ;;  %v7170_v33 = vmul.f32 %v10473_v38, %v10473_v38 }
 0xac1   : > { %v7093_v13 = vpop.xlane.xlu0 %7092 }
 0xac2   : > { %v10481_v17 = vsub.f32 %v10384_v54, %v7136_v55  ;;  %v7137_v37 = vmul.f32 0.03125, %v7093_v13  ;;  %v7190_v14 = vsel %vm537_vm0, %v7170_v33, 0.0  ;;  %v7171_v34 = vmul.f32 %v10476_v56, %v10476_v56 }
 0xac3   : > { %7191 = vadd.xlane.f32.xlu1 %v7190_v14  ;;  %v7108_v6 = vpop.xlane.xlu1 %7107 }
 0xac4   : > { %v10487_v2 = vsub.f32 %v10392_v61, %v7137_v37  ;;  %v7142_v36 = vmul.f32 0.03125, %v7108_v6  ;;  %v7193_v32 = vsel %vm537_vm0, %v7171_v34, 0.0  ;;  %v7168_v44 = vmul.f32 %v10481_v17, %v10481_v17 }
 0xac5   : > { %7194 = vadd.xlane.f32.xlu0 %v7193_v32  ;;  %v7111_v54 = vpop.xlane.xlu0 %7110 }
 0xac6   : > { %v10493_v48 = vsub.f32 %v10401_v58, %v7142_v36  ;;  %v7143_v31 = vmul.f32 0.03125, %v7111_v54  ;;  %v7184_v35 = vsel %vm537_vm0, %v7168_v44, 0.0  ;;  %v7169_v23 = vmul.f32 %v10487_v2, %v10487_v2 }
 0xac7   : > { %7185 = vadd.xlane.f32.xlu1 %v7184_v35  ;;  %v7102_v61 = vpop.xlane.xlu1 %7101 }
 0xac8   : > { %v10499_v20 = vsub.f32 %v10411_v4, %v7143_v31  ;;  %v7140_v0 = vmul.f32 0.03125, %v7102_v61  ;;  %v7187_v5 = vsel %vm537_vm0, %v7169_v23, 0.0  ;;  %v7174_v62 = vmul.f32 %v10493_v48, %v10493_v48 }
 0xac9   : > { %7188 = vadd.xlane.f32.xlu0 %v7187_v5  ;;  %v7105_v58 = vpop.xlane.xlu0 %7104 }
 0xaca   : > { %v10505_v50 = vsub.f32 %v10408_v46, %v7140_v0  ;;  %v7141_v7 = vmul.f32 0.03125, %v7105_v58  ;;  %v7202_v30 = vsel %vm537_vm0, %v7174_v62, 0.0  ;;  %v7175_v8 = vmul.f32 %v10499_v20, %v10499_v20 }
 0xacb   : > { %7203 = vadd.xlane.f32.xlu1 %v7202_v30  ;;  %v7120_v4 = vpop.xlane.xlu1 %7119 }
 0xacc   : > { %v10511_v53 = vsub.f32 %v10416_v49, %v7141_v7  ;;  %v7146_v47 = vmul.f32 0.03125, %v7120_v4  ;;  %v7205_v26 = vsel %vm537_vm0, %v7175_v8, 0.0  ;;  %v7172_v51 = vmul.f32 %v10505_v50, %v10505_v50 }
 0xacd   : > { %7206 = vadd.xlane.f32.xlu0 %v7205_v26  ;;  %v7123_v46 = vpop.xlane.xlu0 %7122 }
 0xace   : > { %v10517_v40 = vsub.f32 %v10425_v42, %v7146_v47  ;;  %v7147_v18 = vmul.f32 0.03125, %v7123_v46  ;;  %v7196_v15 = vsel %vm537_vm0, %v7172_v51, 0.0  ;;  %v7173_v52 = vmul.f32 %v10511_v53, %v10511_v53 }
 0xacf   : > { %7197 = vadd.xlane.f32.xlu1 %v7196_v15  ;;  %v7114_v49 = vpop.xlane.xlu1 %7113 }
 0xad0   : > { %v10523_v25 = vsub.f32 %v10435_v27, %v7147_v18  ;;  %v7144_v45 = vmul.f32 0.03125, %v7114_v49  ;;  %v7199_v16 = vsel %vm537_vm0, %v7173_v52, 0.0  ;;  %v7178_v19 = vmul.f32 %v10517_v40, %v10517_v40 }
 0xad1   : > { %7200 = vadd.xlane.f32.xlu0 %v7199_v16  ;;  %v7117_v42 = vpop.xlane.xlu0 %7116 }
 0xad2   : > { %v10529_v10 = vsub.f32 %v10432_v59, %v7144_v45  ;;  %v7145_v41 = vmul.f32 0.03125, %v7117_v42  ;;  %v7214_v1 = vsel %vm537_vm0, %v7178_v19, 0.0  ;;  %v7179_v21 = vmul.f32 %v10523_v25, %v10523_v25  ;;  %v10571_v19 = vld [vmem:[%s10717_s4 + $0x5] ss:$0 sm:$0xff] }
 0xad3   : > { %7215 = vadd.xlane.f32.xlu1 %v7214_v1 }
 0xad4   : > { %v10535_v27 = vsub.f32 %v10440_v22, %v7145_v41  ;;  %v7126_v63 = vpop.xlane.xlu1 %7125  ;;  %v7217_v60 = vsel %vm537_vm0, %v7179_v21, 0.0  ;;  %v7176_v11 = vmul.f32 %v10529_v10, %v10529_v10 }
 0xad5   : > { %v7148_v9 = vmul.f32 0.03125, %v7126_v63  ;;  %7218 = vadd.xlane.f32.xlu0 %v7217_v60  ;;  %v10578_v60 = vld [vmem:[%s10717_s4 + $0x6] ss:$0 sm:$0xff] }
 0xad6   : > { %v7129_v59 = vpop.xlane.xlu0 %7128  ;;  %v7208_v39 = vsel %vm537_vm0, %v7176_v11, 0.0  ;;  %v7177_v3 = vmul.f32 %v10535_v27, %v10535_v27 }
 0xad7   : > { %v10544_v28 = vsub.f32 %v10451_v57, %v7148_v9  ;;  %v7149_v43 = vmul.f32 0.03125, %v7129_v59  ;;  %7209 = vadd.xlane.f32.xlu1 %v7208_v39 }
 0xad8   : > { %v7132_v22 = vpop.xlane.xlu1 %7131  ;;  %v7211_v55 = vsel %vm537_vm0, %v7177_v3, 0.0 }
 0xad9   : > { %v10548_v33 = vsub.f32 %v10459_v29, %v7149_v43  ;;  %v7150_v13 = vmul.f32 0.03125, %v7132_v22  ;;  %7212 = vadd.xlane.f32.xlu0 %v7211_v55  ;;  %v7180_v37 = vmul.f32 %v10544_v28, %v10544_v28 }
 0xada   : > { %v7135_v14 = vpop.xlane.xlu0 %7134 }
 0xadb   : > { %v10553_v34 = vsub.f32 %v10456_v12, %v7150_v13  ;;  %v7151_v6 = vmul.f32 0.03125, %v7135_v14  ;;  %v7220_v57 = vsel %vm537_vm0, %v7180_v37, 0.0  ;;  %v7181_v36 = vmul.f32 %v10548_v33, %v10548_v33 }
 0xadc   : > { %7221 = vadd.xlane.f32.xlu1 %v7220_v57 }
 0xadd   : > { %v10559_v32 = vsub.f32 %v10464_v24, %v7151_v6  ;;  %v7223_v29 = vsel %vm537_vm0, %v7181_v36, 0.0  ;;  %v7182_v44 = vmul.f32 %v10553_v34, %v10553_v34 }
 0xade   : > { %7224 = vadd.xlane.f32.xlu0 %v7223_v29 }
 0xadf   : > { %v7226_v54 = vsel %vm537_vm0, %v7182_v44, 0.0  ;;  %v7183_v12 = vmul.f32 %v10559_v32, %v10559_v32 }
 0xae0   : > { %7227 = vadd.xlane.f32.xlu1 %v7226_v54 }
 0xae1   : > { %v7229_v31 = vsel %vm537_vm0, %v7183_v12, 0.0 }
 0xae2   : > { %7230 = vadd.xlane.f32.xlu0 %v7229_v31 }
 0xb50   : > { %v7192_v35 = vpop.xlane.xlu1 %7191 }
 0xb51   : > { %v7234_v23 = vmul.f32 0.03125, %v7192_v35 }
 0xb52   : > { %v7195_v61 = vpop.xlane.xlu0 %7194 }
 0xb53   : > { %v7250_v24 = vadd.f32 1e-05, %v7234_v23  ;;  %v7235_v0 = vmul.f32 0.03125, %v7195_v61 }
 0xb54   : > { %v7186_v5 = vpop.xlane.xlu1 %7185 }
 0xb55   : > { %8519 = vrsqrt.f32 %v7250_v24  ;;  %v7251_v62 = vadd.f32 1e-05, %v7235_v0  ;;  %v7232_v58 = vmul.f32 0.03125, %v7186_v5 }
 0xb56   : > { %v7189_v7 = vpop.xlane.xlu0 %7188 }
 0xb57   : > { %8521 = vrsqrt.f32 %v7251_v62  ;;  %v7248_v30 = vadd.f32 1e-05, %v7232_v58  ;;  %v7233_v8 = vmul.f32 0.03125, %v7189_v7 }
 0xb58   : > { %v7204_v4 = vpop.xlane.xlu1 %7203 }
 0xb59   : > { %8523 = vrsqrt.f32 %v7248_v30  ;;  %v7249_v47 = vadd.f32 1e-05, %v7233_v8  ;;  %v7238_v26 = vmul.f32 0.03125, %v7204_v4 }
 0xb5a   : > { %v7207_v51 = vpop.xlane.xlu0 %7206 }
 0xb5b   : > { %8525 = vrsqrt.f32 %v7249_v47  ;;  %v7254_v46 = vadd.f32 1e-05, %v7238_v26  ;;  %v7239_v18 = vmul.f32 0.03125, %v7207_v51 }
 0xb5c   : > { %v7198_v15 = vpop.xlane.xlu1 %7197 }
 0xb5d   : > { %8527 = vrsqrt.f32 %v7254_v46  ;;  %v7255_v52 = vadd.f32 1e-05, %v7239_v18  ;;  %v7236_v49 = vmul.f32 0.03125, %v7198_v15 }
 0xb5e   : > { %v7201_v45 = vpop.xlane.xlu0 %7200 }
 0xb5f   : > { %v8520_v16 = vpop.eup %8519  ;;  %8529 = vrsqrt.f32 %v7255_v52  ;;  %v7252_v42 = vadd.f32 1e-05, %v7236_v49  ;;  %v7237_v41 = vmul.f32 0.03125, %v7201_v45 }
 0xb60   : > { %v7282_v1 = vmul.f32 %v8520_v16, %v10473_v38  ;;  %v7216_v21 = vpop.xlane.xlu1 %7215 }
 0xb61   : > { %v8522_v63 = vpop.eup %8521  ;;  %8531 = vrsqrt.f32 %v7252_v42  ;;  %v7253_v11 = vadd.f32 1e-05, %v7237_v41  ;;  %v7242_v9 = vmul.f32 0.03125, %v7216_v21 }
 0xb62   : > { %v7302_v59 = vmul.f32 %v10571_v19, %v7282_v1  ;;  %v7283_v39 = vmul.f32 %v8522_v63, %v10476_v56  ;;  %v7219_v3 = vpop.xlane.xlu0 %7218 }
 0xb63   : > { %v8524_v43 = vpop.eup %8523  ;;  %8533 = vrsqrt.f32 %v7253_v11  ;;  %v7258_v22 = vadd.f32 1e-05, %v7242_v9  ;;  %v7243_v55 = vmul.f32 0.03125, %v7219_v3 }
 0xb64   : > { %v7322_v38 = vadd.f32 %v10578_v60, %v7302_v59  ;;  %v7303_v13 = vmul.f32 %v10571_v19, %v7283_v39  ;;  %v7280_v37 = vmul.f32 %v8524_v43, %v10481_v17  ;;  %v7210_v14 = vpop.xlane.xlu1 %7209 }
 0xb65   : > { %v8526_v6 = vpop.eup %8525  ;;  %8535 = vrsqrt.f32 %v7258_v22  ;;  %v7259_v57 = vadd.f32 1e-05, %v7243_v55  ;;  %v7240_v36 = vmul.f32 0.03125, %v7210_v14 }
 0xb66   : > { %7338 = vst.msk [vmem:[%s10585_s23 + $0x10] sm:$0xff] %vm537_vm0, %v7322_v38  ;;  %v7323_v56 = vadd.f32 %v10578_v60, %v7303_v13  ;;  %v7300_v29 = vmul.f32 %v10571_v19, %v7280_v37  ;;  %v7281_v44 = vmul.f32 %v8526_v6, %v10487_v2  ;;  %v7213_v54 = vpop.xlane.xlu0 %7212 }
 0xb67   : > { %v8528_v17 = vpop.eup %8527  ;;  %8537 = vrsqrt.f32 %v7259_v57  ;;  %v7256_v12 = vadd.f32 1e-05, %v7240_v36  ;;  %v7241_v31 = vmul.f32 0.03125, %v7213_v54 }
 0xb68   : > { %7339 = vst.msk [vmem:[%s10585_s23 + $0x18] sm:$0xff] %vm537_vm0, %v7323_v56  ;;  %v7320_v35 = vadd.f32 %v10578_v60, %v7300_v29  ;;  %v7301_v23 = vmul.f32 %v10571_v19, %v7281_v44  ;;  %v7286_v61 = vmul.f32 %v8528_v17, %v10493_v48 }
 0xb69   : > { %v8530_v24 = vpop.eup %8529  ;;  %8539 = vrsqrt.f32 %v7256_v12  ;;  %v7257_v0 = vadd.f32 1e-05, %v7241_v31  ;;  %v7222_v5 = vpop.xlane.xlu1 %7221 }
 0xb6a   : > { %7336 = vst.msk [vmem:[%s10585_s23] sm:$0xff] %vm537_vm0, %v7320_v35  ;;  %v7321_v2 = vadd.f32 %v10578_v60, %v7301_v23  ;;  %v7306_v62 = vmul.f32 %v10571_v19, %v7286_v61  ;;  %v7287_v58 = vmul.f32 %v8530_v24, %v10499_v20  ;;  %v7244_v7 = vmul.f32 0.03125, %v7222_v5 }
 0xb6b   : > { %v8532_v30 = vpop.eup %8531  ;;  %8541 = vrsqrt.f32 %v7257_v0  ;;  %v7225_v8 = vpop.xlane.xlu0 %7224 }
 0xb6c   : > { %7337 = vst.msk [vmem:[%s10585_s23 + $0x8] sm:$0xff] %vm537_vm0, %v7321_v2  ;;  %v7326_v48 = vadd.f32 %v10578_v60, %v7306_v62  ;;  %v7307_v4 = vmul.f32 %v10571_v19, %v7287_v58  ;;  %v7284_v47 = vmul.f32 %v8532_v30, %v10505_v50  ;;  %v7260_v26 = vadd.f32 1e-05, %v7244_v7 }
 0xb6d   : > { %v8534_v51 = vpop.eup %8533  ;;  %v7245_v46 = vmul.f32 0.03125, %v7225_v8  ;;  %v7228_v18 = vpop.xlane.xlu1 %7227 }
 0xb6e   : > { %7342 = vst.msk [vmem:[%s10585_s23 + $0x30] sm:$0xff] %vm537_vm0, %v7326_v48  ;;  %v7327_v20 = vadd.f32 %v10578_v60, %v7307_v4  ;;  %v7304_v15 = vmul.f32 %v10571_v19, %v7284_v47  ;;  %v7285_v52 = vmul.f32 %v8534_v51, %v10511_v53  ;;  %8543 = vrsqrt.f32 %v7260_v26 }
 0xb6f   : > { %v8536_v49 = vpop.eup %8535  ;;  %v7261_v45 = vadd.f32 1e-05, %v7245_v46  ;;  %v7246_v16 = vmul.f32 0.03125, %v7228_v18  ;;  %v7231_v42 = vpop.xlane.xlu0 %7230 }
 0xb70   : > { %7343 = vst.msk [vmem:[%s10585_s23 + $0x38] sm:$0xff] %vm537_vm0, %v7327_v20  ;;  %v7324_v50 = vadd.f32 %v10578_v60, %v7304_v15  ;;  %v7305_v41 = vmul.f32 %v10571_v19, %v7285_v52  ;;  %v7290_v1 = vmul.f32 %v8536_v49, %v10517_v40  ;;  %v7247_v21 = vmul.f32 0.03125, %v7231_v42 }
 0xb71   : > { %v8538_v63 = vpop.eup %8537  ;;  %8545 = vrsqrt.f32 %v7261_v45  ;;  %v7262_v11 = vadd.f32 1e-05, %v7246_v16 }
 0xb72   : > { %7340 = vst.msk [vmem:[%s10585_s23 + $0x20] sm:$0xff] %vm537_vm0, %v7324_v50  ;;  %v7325_v53 = vadd.f32 %v10578_v60, %v7305_v41  ;;  %v7310_v9 = vmul.f32 %v10571_v19, %v7290_v1  ;;  %v7291_v59 = vmul.f32 %v8538_v63, %v10523_v25  ;;  %v7263_v39 = vadd.f32 1e-05, %v7247_v21 }
 0xb73   : > { %v8540_v3 = vpop.eup %8539  ;;  %8547 = vrsqrt.f32 %v7262_v11 }
 0xb74   : > { %7341 = vst.msk [vmem:[%s10585_s23 + $0x28] sm:$0xff] %vm537_vm0, %v7325_v53  ;;  %v7330_v40 = vadd.f32 %v10578_v60, %v7310_v9  ;;  %v7311_v43 = vmul.f32 %v10571_v19, %v7291_v59  ;;  %v7288_v22 = vmul.f32 %v8540_v3, %v10529_v10  ;;  %8549 = vrsqrt.f32 %v7263_v39 }
 0xb75   : > { %v8542_v55 = vpop.eup %8541 }
 0xb76   : > { %7346 = vst.msk [vmem:[%s10585_s23 + $0x50] sm:$0xff] %vm537_vm0, %v7330_v40  ;;  %v7331_v38 = vadd.f32 %v10578_v60, %v7311_v43  ;;  %v7308_v25 = vmul.f32 %v10571_v19, %v7288_v22  ;;  %v7289_v13 = vmul.f32 %v8542_v55, %v10535_v27 }
 0xb78   : > { %v8544_v37 = vpop.eup %8543  ;;  %7347 = vst.msk [vmem:[%s10585_s23 + $0x58] sm:$0xff] %vm537_vm0, %v7331_v38  ;;  %v7328_v14 = vadd.f32 %v10578_v60, %v7308_v25  ;;  %v7309_v10 = vmul.f32 %v10571_v19, %v7289_v13 }
 0xb79   : > { %v7292_v6 = vmul.f32 %v8544_v37, %v10544_v28 }
 0xb7a   : > { %7344 = vst.msk [vmem:[%s10585_s23 + $0x40] sm:$0xff] %vm537_vm0, %v7328_v14  ;;  %v7329_v57 = vadd.f32 %v10578_v60, %v7309_v10 }
 0xb7b   : > { %v8546_v36 = vpop.eup %8545  ;;  %v7312_v27 = vmul.f32 %v10571_v19, %v7292_v6 }
 0xb7c   : > { %7345 = vst.msk [vmem:[%s10585_s23 + $0x48] sm:$0xff] %vm537_vm0, %v7329_v57  ;;  %v7293_v56 = vmul.f32 %v8546_v36, %v10548_v33 }
 0xb7d   : > { %v8548_v29 = vpop.eup %8547  ;;  %v7332_v44 = vadd.f32 %v10578_v60, %v7312_v27 }
 0xb7e   : > { %v8550_v54 = vpop.eup %8549  ;;  %v7313_v28 = vmul.f32 %v10571_v19, %v7293_v56  ;;  %v7294_v17 = vmul.f32 %v8548_v29, %v10553_v34 }
 0xb7f   : > { %7348 = vst.msk [vmem:[%s10585_s23 + $0x60] sm:$0xff] %vm537_vm0, %v7332_v44  ;;  %v7295_v12 = vmul.f32 %v8550_v54, %v10559_v32 }
 0xb80   : > { %v7333_v33 = vadd.f32 %v10578_v60, %v7313_v28  ;;  %v7314_v31 = vmul.f32 %v10571_v19, %v7294_v17 }
 0xb81   : > { %v7315_v35 = vmul.f32 %v10571_v19, %v7295_v12 }
 0xb82   : > { %7349 = vst.msk [vmem:[%s10585_s23 + $0x68] sm:$0xff] %vm537_vm0, %v7333_v33  ;;  %v7334_v23 = vadd.f32 %v10578_v60, %v7314_v31 }
 0xb83   : > { %v7335_v34 = vadd.f32 %v10578_v60, %v7315_v35 }
 0xb84   : > { %7350 = vst.msk [vmem:[%s10585_s23 + $0x70] sm:$0xff] %vm537_vm0, %v7334_v23 }
 0xb85   : > { %7351 = vst.msk [vmem:[%s10585_s23 + $0x78] sm:$0xff] %vm537_vm0, %v7335_v34 }
 0xb86   : > { %8580 = shalt.err (!%p8577_p5)
}
 0xb87   : > { %s8581_s12 = scalar_lea.hbm %s10662_s7, 2048  ;;  %s8585_s16 = scalar_lea.hbm %s10718_s5, 4096 }
 0xb88   : > { %p8582_p7 = scmp.ne.s32.totalorder %s10662_s7, %s8581_s12  ;;  %p8586_p12 = scmp.lt.u32.totalorder %s10662_s7, %s10718_s5 }
 0xb89   : > { %p8587_p13 = scmp.lt.u32.totalorder %s8585_s16, %s8581_s12  ;;  %p8589_p1 = scmp.lt.u32.totalorder %s8581_s12, %s10662_s7 }
 0xb8a   : > { %p8583_p10 = pnand %p8582_p7, %p8709_p6 }
 0xb8b   : > { %p8588_p0 = por %p8587_p13, %p8586_p12 }
 0xb8c   : > { %p8584_p11 = pneg %p8583_p10 }
 0xb8d   : > { %p8590_p2 = por %p8589_p1, %p8588_p0 }
 0xb8f   : > { %p8591_p3 = pnand %p8590_p2, %p8584_p11 }
 0xb91   : > { %8594 = shalt.err (!%p8591_p3)
}
 0xb92   : > { %s8639_s25 = smov 128   ;;  %s8640_s30 = smov 8  }
 0xb93   : > { %8257 = dma.vmem_to_hbm [thread:$0]  (%p8709_p6), %s10664_s26, 2048, %s10662_s7, %s7353_s22, %s8639_s25, %s8639_s25, %s8640_s30  }
 0xb94 PF: > { %s7381_s6 = sand.u32 1, %s8617_s18   ;;  %p8260_p4 = pnand %p7436_p9, %p8713_p8 }
 0xb95   : > { %s7382_s8 = scalar_lea.sflag [#allocation4], %s7381_s6 }
 0xb96   : > { %8612 = dma.done.wait (!%p8260_p4), %s7382_s8, 2048  }
 0xb97   : > { %8614 = vsyncadd (!%p8260_p4), %s7382_s8, 4294965248  ;;  %p15_p5 = scmp.ge.s32.totalorder %s8694_s24, 4   ;;  %s10760_s18 = smov %s8621_s19 }
 0xb98   : > { %s10761_s19 = smov %s8625_s20  ;;  %s10762_s20 = smov %s8707_s27 }
 0xb99   : > { %s10763_s21 = smov %s8694_s24  ;;  %17 = sbr.rel (!%p15_p5) target bundleno = 3 (0x3), region = 118 }
 0xba0   :  { %7387 = vsyncpa [#allocation4], 1 }
 0xba1   :  { %7389 = vsyncpa [#allocation4 + $0x1], 1 }

</bundles_post_ra>
